<compile_context>
chip_gen: v6e
topology: v6e:2x2x1
jax: 0.10.0
libtpu: 0.0.40
codegen_flags: <defaults>
</compile_context>

<pallas_src>
import numpy as np
import jax
import jax.numpy as jnp
from jax import lax
from jax.experimental import pallas as pl
from jax.experimental.pallas import tpu as pltpu


# ----------------------------------------------------------------------------
# trace-time constant matrices (numpy): interpolation / selection / padding
# ----------------------------------------------------------------------------
def _bilinear_matrix(in_size, out_size):
    """Row-interpolation matrix for F.interpolate(mode='bilinear', align_corners=True)."""
    m = np.zeros((out_size, in_size), dtype=np.float32)
    if out_size == 1:
        m[0, 0] = 1.0
        return m
    scale = (in_size - 1) / (out_size - 1)
    for i in range(out_size):
        y = i * scale
        y0 = int(np.floor(y))
        y1 = min(y0 + 1, in_size - 1)
        w = y - y0
        m[i, y0] += 1.0 - w
        m[i, y1] += w
    return m


def _nearest_idx(in_size, out_size):
    """Source indices for F.interpolate(mode='nearest')."""
    return (np.arange(out_size) * in_size) // out_size


def _nearest_matrix(in_size, out_size):
    """One-hot (out,in) matrix so that M @ x == x[nearest_idx]."""
    idx = _nearest_idx(in_size, out_size)
    m = np.zeros((out_size, in_size), dtype=np.float32)
    m[np.arange(out_size), idx] = 1.0
    return m


def _pad_rows(m):
    """Embed (R,C) into (R+2,C) with zero first/last rows (free conv halo via matmul)."""
    out = np.zeros((m.shape[0] + 2, m.shape[1]), dtype=np.float32)
    out[1:-1] = m
    return out


def _pad_cols(m):
    """Embed (R,C) into (R,C+2) with zero first/last cols."""
    out = np.zeros((m.shape[0], m.shape[1] + 2), dtype=np.float32)
    out[:, 1:-1] = m
    return out


# ----------------------------------------------------------------------------
# the single fused Pallas kernel (one grid step == one batch element)
# ----------------------------------------------------------------------------
def _lpg_fusion_kernel(x0_ref, x1_ref, w_red_smem, b_red_smem, uvn_ref,
                       rn_ref, cn_ref, rdp_ref, cdp_ref, rbp_ref, cbp_ref,
                       wconv_ref, bconv_ref,
                       o_ref, lpg_ref, cat_ref):
    # x0_ref    : (1, F, H, W)      low-resolution features (NCHW)
    # x1_ref    : (1, F, Ho, Wo)    high-resolution features (NCHW), Ho=2H, Wo=2W
    # w_red_smem: (4, F)   SMEM     1x1 reduction conv weight (scalars)
    # b_red_smem: (4,)     SMEM     1x1 reduction conv bias   (scalars)
    # uvn_ref   : (3, oh, ow)       precomputed u, v, sqrt(u^2+v^2+1)
    # rn_ref    : (oh, H)           nearest-upsample row selector (one-hot)
    # cn_ref    : (W, ow)           nearest-upsample col selector (one-hot, transposed)
    # rdp_ref   : (Ho+2, oh)        nearest-downsample row selector with zero halo rows
    # cdp_ref   : (ow, Wo+2)        nearest-downsample col selector with zero halo cols
    # rbp_ref   : (Ho+2, H)         bilinear x2 row matrix with zero halo rows
    # cbp_ref   : (W, Wo+2)         bilinear x2 col matrix (transposed) with zero halo
    # wconv_ref : (9, Cout, Cin)    3x3 conv taps, Cin channel order = [x1 | up | lpg]
    # bconv_ref : (Cout, 1)
    # o_ref     : (1, Cout, Ho*Wo)  lane-dense output (reshapes to NCHW for free)
    # lpg_ref   : (1, oh, ow)       LPG output
    # cat_ref   : (Cin, Ho+2, Wo+2) VMEM scratch: zero-padded channel concat
    F = x0_ref.shape[1]
    Cin = cat_ref.shape[0]
    Hp = cat_ref.shape[1]
    Wp = cat_ref.shape[2]
    Ho, Wo = Hp - 2, Wp - 2
    Cout = wconv_ref.shape[1]

    # hoisted constant loads (reused across channels / taps)
    rn = rn_ref[...]
    cn = cn_ref[...]
    rdp = rdp_ref[...]
    cdp = cdp_ref[...]
    rbp = rbp_ref[...]
    cbp = cbp_ref[...]

    x0c = [x0_ref[0, f] for f in range(F)]          # F x (H, W) channel planes

    # ---- 1x1 reduction conv: VPU broadcast madds from SMEM scalars (no relayout) ----
    def conv1x1(c):
        acc = w_red_smem[c, 0] * x0c[0]
        for f in range(1, F):
            acc = acc + w_red_smem[c, f] * x0c[f]
        return acc + b_red_smem[c]

    p0, p1, p2, p3 = conv1x1(0), conv1x1(1), conv1x1(2), conv1x1(3)

    # tanh + L2-normalize of the 3 plane normals (per-pixel, no cross-lane reduce),
    # sigmoid on the 4th channel.
    n0, n1, n2 = jnp.tanh(p0), jnp.tanh(p1), jnp.tanh(p2)
    inv = pl.reciprocal(jnp.maximum(jnp.sqrt(n0 * n0 + n1 * n1 + n2 * n2), 1e-12))
    n0, n1, n2 = n0 * inv, n1 * inv, n2 * inv
    s3 = jax.nn.sigmoid(p3)

    # nearest-neighbour upsample to (oh, ow): exact 0/1 selection matmuls on the MXU.
    def up(x):
        return jnp.dot(rn, jnp.dot(x, cn, preferred_element_type=jnp.float32),
                       preferred_element_type=jnp.float32)

    up0, up1, up2, up3 = up(n0), up(n1), up(n2), up(s3)

    # LPG. NOTE: like the PyTorch reference, the denominator has no epsilon clamp.
    u, v, nrm = uvn_ref[0], uvn_ref[1], uvn_ref[2]
    denom = up0 * u + up1 * v + up2
    lpg = up3 * nrm * pl.reciprocal(denom)
    lpg_ref[0] = lpg

    # ---- build the zero-padded concat [x1 | bilinear2x(x0) | lpg_small] in VMEM ----
    # x1 channels: zero the slab (conv halo), then masked interior store.  No wrapper
    # jnp.pad, no HBM round trip of the padded tensor.
    cat_ref[0:F] = jnp.zeros((F, Hp, Wp), jnp.float32)
    cat_ref[0:F, 1:Ho + 1, 1:Wo + 1] = x1_ref[0]

    # bilinear x2 upsample of x0: zero halo comes for free from the padded matrices.
    for f in range(F):
        t = jnp.dot(x0c[f], cbp, preferred_element_type=jnp.float32)          # (H, Wp)
        cat_ref[F + f] = jnp.dot(rbp, t, preferred_element_type=jnp.float32)  # (Hp, Wp)

    # nearest-downsampled LPG, directly embedded in its zero halo.
    cat_ref[2 * F] = jnp.dot(
        jnp.dot(rdp, lpg, preferred_element_type=jnp.float32),
        cdp, preferred_element_type=jnp.float32)

    # ---- 3x3 conv: 3 column-shifted relayouts, 3 contiguous row windows each ----
    acc = jnp.zeros((Cout, Ho * Wo), jnp.float32)
    for kx in range(3):
        col = cat_ref[:, :, kx:kx + Wo]                 # (Cin, Hp, Wo)
        flat = col.reshape(Cin, Hp * Wo)                # single relayout per column tap
        for ky in range(3):
            acc = acc + jnp.dot(wconv_ref[3 * ky + kx],
                                flat[:, ky * Wo: ky * Wo + Ho * Wo],
                                preferred_element_type=jnp.float32)
    o_ref[0] = acc + bconv_ref[...]


# ----------------------------------------------------------------------------
# full forward (equivalent to LPGFeatureFusionBlock.forward)
# ----------------------------------------------------------------------------
def lpg_feature_fusion_forward(params, x0, x1, out_shape):
    B, F, H, W = x0.shape
    oh, ow = out_shape
    Ho, Wo = 2 * H, 2 * W
    Hp, Wp = Ho + 2, Wo + 2
    Cin = 2 * F + 1

    # -------- trace-time constants --------
    ug = np.linspace(-1.0, 1.0, oh).astype(np.float32)
    vg = np.linspace(-1.0, 1.0, ow).astype(np.float32)
    uu = np.tile(ug[:, None], (1, ow))
    vv = np.tile(vg[None, :], (oh, 1))
    nrm = np.sqrt(uu * uu + vv * vv + 1.0)
    uvn = jnp.asarray(np.stack([uu, vv, nrm], axis=0).astype(np.float32))   # (3,oh,ow)

    Rn = jnp.asarray(_nearest_matrix(H, oh))                  # (oh, H)
    CnT = jnp.asarray(_nearest_matrix(W, ow).T)               # (W, ow)
    Rdp = jnp.asarray(_pad_rows(_nearest_matrix(oh, Ho)))     # (Ho+2, oh)
    CdpT = jnp.asarray(_pad_cols(_nearest_matrix(ow, Wo).T))  # (ow, Wo+2)
    Rbp = jnp.asarray(_pad_rows(_bilinear_matrix(H, Ho)))     # (Ho+2, H)
    CbpT = jnp.asarray(_pad_cols(_bilinear_matrix(W, Wo).T))  # (W, Wo+2)

    w_red = params["w_red"].T                                 # (4, F)  SMEM scalars
    b_red = params["b_red"][0]                                # (4,)    SMEM scalars
    w_taps = jnp.transpose(params["w_ups"], (0, 1, 3, 2)).reshape(9, F, Cin)
    b_ups = params["b_ups"].T                                 # (F, 1)

    smem_w = pl.BlockSpec(memory_space=pltpu.MemorySpace.SMEM)
    smem_b = pl.BlockSpec(memory_space=pltpu.MemorySpace.SMEM)

    out_flat, lpg = pl.pallas_call(
        _lpg_fusion_kernel,
        out_shape=(jax.ShapeDtypeStruct((B, F, Ho * Wo), jnp.float32),
                   jax.ShapeDtypeStruct((B, oh, ow), jnp.float32)),
        grid=(B,),
        in_specs=[
            pl.BlockSpec((1, F, H, W), lambda b: (b, 0, 0, 0)),
            pl.BlockSpec((1, F, Ho, Wo), lambda b: (b, 0, 0, 0)),
            smem_w,                                            # (4, F) reduction weight
            smem_b,                                            # (4,)   reduction bias
            pl.BlockSpec((3, oh, ow), lambda b: (0, 0, 0)),
            pl.BlockSpec((oh, H), lambda b: (0, 0)),
            pl.BlockSpec((W, ow), lambda b: (0, 0)),
            pl.BlockSpec((Hp, oh), lambda b: (0, 0)),
            pl.BlockSpec((ow, Wp), lambda b: (0, 0)),
            pl.BlockSpec((Hp, H), lambda b: (0, 0)),
            pl.BlockSpec((W, Wp), lambda b: (0, 0)),
            pl.BlockSpec((9, F, Cin), lambda b: (0, 0, 0)),
            pl.BlockSpec((F, 1), lambda b: (0, 0)),
        ],
        out_specs=(pl.BlockSpec((1, F, Ho * Wo), lambda b: (b, 0, 0)),
                   pl.BlockSpec((1, oh, ow), lambda b: (b, 0, 0))),
        scratch_shapes=[pltpu.VMEM((Cin, Hp, Wp), jnp.float32)],
        compiler_params=pltpu.CompilerParams(dimension_semantics=("parallel",)),
    )(x0, x1, w_red, b_red, uvn, Rn, CnT, Rdp, CdpT, Rbp, CbpT, w_taps, b_ups)

    out = out_flat.reshape(B, F, Ho, Wo)                      # NCHW for free
    out_lpg = lpg[:, None]                                    # (B, 1, oh, ow)
    return out, out_lpg


def init_params(key, features):
    # reduction: Conv2d(features, 4, 1)    -> stored as (F, 4) matmul weight
    # ups_conv : Conv2d(2F+1, F, 3, pad=1) -> stored as (3, 3, Cin, Cout)
    k1, k2, k3 = jax.random.split(key, 3)
    w_red = 0.1 * jax.random.normal(k1, (features, 4), jnp.float32)
    # positive bias on the 3rd plane channel keeps the LPG denominator away from 0
    b_red = jnp.array([[0.0, 0.0, 1.0, 0.0]], jnp.float32)
    w_ups = 0.1 * jax.random.normal(k2, (3, 3, 2 * features + 1, features), jnp.float32)
    b_ups = 0.01 * jax.random.normal(k3, (1, features), jnp.float32)
    return dict(w_red=w_red, b_red=b_red, w_ups=w_ups, b_ups=b_ups)


# ----------------------------------------------------------------------------
# pure-JAX reference (same math, no Pallas) for a silent self-check
# ----------------------------------------------------------------------------
def reference_forward(params, x0, x1, out_shape):
    B, F, H, W = x0.shape
    oh, ow = out_shape
    R = jnp.asarray(_bilinear_matrix(H, 2 * H))
    Cm = jnp.asarray(_bilinear_matrix(W, 2 * W))
    out_up = jnp.einsum("oh,bchw,pw->bcop", R, x0, Cm,
                        precision=lax.Precision.HIGHEST)
    p = jnp.einsum("bchw,cf->bfhw", x0, params["w_red"],
                   precision=lax.Precision.HIGHEST) + params["b_red"][0][None, :, None, None]
    n = jnp.tanh(p[:, :3])
    n = n / jnp.maximum(jnp.sqrt(jnp.sum(n * n, axis=1, keepdims=True)), 1e-12)
    s = jax.nn.sigmoid(p[:, 3:4])
    plane = jnp.concatenate([n, s], axis=1)
    ridx = _nearest_idx(H, oh)
    cidx = _nearest_idx(W, ow)
    plane_up = plane[:, :, ridx][:, :, :, cidx]
    u = jnp.linspace(-1.0, 1.0, oh)[:, None] * jnp.ones((1, ow))
    v = jnp.ones((oh, 1)) * jnp.linspace(-1.0, 1.0, ow)[None, :]
    norm = jnp.sqrt(u * u + v * v + 1.0)
    denom = plane_up[:, 0] * u + plane_up[:, 1] * v + plane_up[:, 2]
    out_lpg = (plane_up[:, 3] * norm / denom)[:, None]
    r2 = _nearest_idx(oh, 2 * H)
    c2 = _nearest_idx(ow, 2 * W)
    lpg_small = out_lpg[:, :, r2][:, :, :, c2]
    cat = jnp.concatenate([x1, out_up, lpg_small], axis=1)
    w_oihw = jnp.transpose(params["w_ups"], (3, 2, 0, 1))
    out = lax.conv_general_dilated(cat, w_oihw, (1, 1), "SAME",
                                   dimension_numbers=("NCHW", "OIHW", "NCHW"),
                                   precision=lax.Precision.HIGHEST)
    out = out + params["b_ups"][0][None, :, None, None]
    return out, out_lpg


if __name__ == "__main__":
    key = jax.random.PRNGKey(0)
    kx0, kx1, kp = jax.random.split(key, 3)
    B, F, H, W = 2, 4, 8, 8
    out_shape = (32, 32)

    x0 = jax.random.normal(kx0, (B, F, H, W), jnp.float32)
    x1 = jax.random.normal(kx1, (B, F, 2 * H, 2 * W), jnp.float32)
    params = init_params(kp, F)

    out, out_lpg = lpg_feature_fusion_forward(params, x0, x1, out_shape)
    jax.block_until_ready((out, out_lpg))

    assert out.shape == (B, F, 2 * H, 2 * W)
    assert out_lpg.shape == (B, 1, out_shape[0], out_shape[1])

    ref_out, ref_lpg = reference_forward(params, x0, x1, out_shape)
    np.testing.assert_allclose(np.asarray(out), np.asarray(ref_out), rtol=2e-3, atol=2e-3)
    np.testing.assert_allclose(np.asarray(out_lpg), np.asarray(ref_lpg), rtol=2e-3, atol=2e-3)

    print("KERNEL_OK")
</pallas_src>

<mosaic_0001>
module attributes {stable_mosaic.version = 11 : i64} {
  func.func @_lpg_fusion_kernel(%arg0: i32, %arg1: memref<1x4x8x8xf32, #tpu.memory_space<vmem>>, %arg2: memref<1x4x16x16xf32, #tpu.memory_space<vmem>>, %arg3: memref<4x4xf32, #tpu.memory_space<smem>>, %arg4: memref<4xf32, #tpu.memory_space<smem>>, %arg5: memref<3x32x32xf32, #tpu.memory_space<vmem>>, %arg6: memref<32x8xf32, #tpu.memory_space<vmem>>, %arg7: memref<8x32xf32, #tpu.memory_space<vmem>>, %arg8: memref<18x32xf32, #tpu.memory_space<vmem>>, %arg9: memref<32x18xf32, #tpu.memory_space<vmem>>, %arg10: memref<18x8xf32, #tpu.memory_space<vmem>>, %arg11: memref<8x18xf32, #tpu.memory_space<vmem>>, %arg12: memref<9x4x9xf32, #tpu.memory_space<vmem>>, %arg13: memref<4x1xf32, #tpu.memory_space<vmem>>, %arg14: memref<1x4x256xf32, #tpu.memory_space<vmem>>, %arg15: memref<1x32x32xf32, #tpu.memory_space<vmem>>, %arg16: memref<9x18x18xf32, #tpu.memory_space<vmem>>) attributes {dimension_semantics = [#tpu.dimension_semantics<parallel>], iteration_bounds = array<i64: 2>, scalar_prefetch = 0 : i64, scratch_operands = 1 : i64, tpu.core_type = #tpu.core_type<tc>, window_params = [{transform_indices = @transform_0, window_bounds = array<i64: 1, 4, 8, 8>}, {transform_indices = @transform_1, window_bounds = array<i64: 1, 4, 16, 16>}, {transform_indices = @transform_2, window_bounds = array<i64: 4, 4>}, {transform_indices = @transform_3, window_bounds = array<i64: 4>}, {pipeline_mode = #tpu.pipeline_mode<synchronous>, transform_indices = @transform_4, window_bounds = array<i64: 3, 32, 32>}, {pipeline_mode = #tpu.pipeline_mode<synchronous>, transform_indices = @transform_5, window_bounds = array<i64: 32, 8>}, {pipeline_mode = #tpu.pipeline_mode<synchronous>, transform_indices = @transform_6, window_bounds = array<i64: 8, 32>}, {pipeline_mode = #tpu.pipeline_mode<synchronous>, transform_indices = @transform_7, window_bounds = array<i64: 18, 32>}, {pipeline_mode = #tpu.pipeline_mode<synchronous>, transform_indices = @transform_8, window_bounds = array<i64: 32, 18>}, {pipeline_mode = #tpu.pipeline_mode<synchronous>, transform_indices = @transform_9, window_bounds = array<i64: 18, 8>}, {pipeline_mode = #tpu.pipeline_mode<synchronous>, transform_indices = @transform_10, window_bounds = array<i64: 8, 18>}, {pipeline_mode = #tpu.pipeline_mode<synchronous>, transform_indices = @transform_11, window_bounds = array<i64: 9, 4, 9>}, {pipeline_mode = #tpu.pipeline_mode<synchronous>, transform_indices = @transform_12, window_bounds = array<i64: 4, 1>}, {transform_indices = @transform_13, window_bounds = array<i64: 1, 4, 256>}, {transform_indices = @transform_14, window_bounds = array<i64: 1, 32, 32>}]} {
    %c0 = arith.constant 0 : index
    %c0_0 = arith.constant 0 : index
    %0 = vector.load %arg6[%c0, %c0_0] : memref<32x8xf32, #tpu.memory_space<vmem>>, vector<32x8xf32>
    %c0_1 = arith.constant 0 : index
    %c0_2 = arith.constant 0 : index
    %1 = vector.load %arg7[%c0_1, %c0_2] : memref<8x32xf32, #tpu.memory_space<vmem>>, vector<8x32xf32>
    %c0_3 = arith.constant 0 : index
    %c0_4 = arith.constant 0 : index
    %2 = vector.load %arg8[%c0_3, %c0_4] : memref<18x32xf32, #tpu.memory_space<vmem>>, vector<18x32xf32>
    %c0_5 = arith.constant 0 : index
    %c0_6 = arith.constant 0 : index
    %3 = vector.load %arg9[%c0_5, %c0_6] : memref<32x18xf32, #tpu.memory_space<vmem>>, vector<32x18xf32>
    %c0_7 = arith.constant 0 : index
    %c0_8 = arith.constant 0 : index
    %4 = vector.load %arg10[%c0_7, %c0_8] : memref<18x8xf32, #tpu.memory_space<vmem>>, vector<18x8xf32>
    %c0_9 = arith.constant 0 : index
    %c0_10 = arith.constant 0 : index
    %5 = vector.load %arg11[%c0_9, %c0_10] : memref<8x18xf32, #tpu.memory_space<vmem>>, vector<8x18xf32>
    %c0_11 = arith.constant 0 : index
    %c0_12 = arith.constant 0 : index
    %c0_13 = arith.constant 0 : index
    %c0_14 = arith.constant 0 : index
    %6 = vector.load %arg1[%c0_11, %c0_12, %c0_13, %c0_14] : memref<1x4x8x8xf32, #tpu.memory_space<vmem>>, vector<1x1x8x8xf32>
    %7 = vector.shape_cast %6 : vector<1x1x8x8xf32> to vector<8x8xf32>
    %c0_15 = arith.constant 0 : index
    %c1 = arith.constant 1 : index
    %c0_16 = arith.constant 0 : index
    %c0_17 = arith.constant 0 : index
    %8 = vector.load %arg1[%c0_15, %c1, %c0_16, %c0_17] : memref<1x4x8x8xf32, #tpu.memory_space<vmem>>, vector<1x1x8x8xf32>
    %9 = vector.shape_cast %8 : vector<1x1x8x8xf32> to vector<8x8xf32>
    %c0_18 = arith.constant 0 : index
    %c2 = arith.constant 2 : index
    %c0_19 = arith.constant 0 : index
    %c0_20 = arith.constant 0 : index
    %10 = vector.load %arg1[%c0_18, %c2, %c0_19, %c0_20] : memref<1x4x8x8xf32, #tpu.memory_space<vmem>>, vector<1x1x8x8xf32>
    %11 = vector.shape_cast %10 : vector<1x1x8x8xf32> to vector<8x8xf32>
    %c0_21 = arith.constant 0 : index
    %c3 = arith.constant 3 : index
    %c0_22 = arith.constant 0 : index
    %c0_23 = arith.constant 0 : index
    %12 = vector.load %arg1[%c0_21, %c3, %c0_22, %c0_23] : memref<1x4x8x8xf32, #tpu.memory_space<vmem>>, vector<1x1x8x8xf32>
    %13 = vector.shape_cast %12 : vector<1x1x8x8xf32> to vector<8x8xf32>
    %c0_24 = arith.constant 0 : index
    %c0_25 = arith.constant 0 : index
    %14 = memref.load %arg3[%c0_24, %c0_25] : memref<4x4xf32, #tpu.memory_space<smem>>
    %15 = vector.broadcast %14 : f32 to vector<8x8xf32>
    %16 = arith.mulf %15, %7 : vector<8x8xf32>
    %c0_26 = arith.constant 0 : index
    %c1_27 = arith.constant 1 : index
    %17 = memref.load %arg3[%c0_26, %c1_27] : memref<4x4xf32, #tpu.memory_space<smem>>
    %18 = vector.broadcast %17 : f32 to vector<8x8xf32>
    %19 = arith.mulf %18, %9 : vector<8x8xf32>
    %20 = arith.addf %16, %19 : vector<8x8xf32>
    %c0_28 = arith.constant 0 : index
    %c2_29 = arith.constant 2 : index
    %21 = memref.load %arg3[%c0_28, %c2_29] : memref<4x4xf32, #tpu.memory_space<smem>>
    %22 = vector.broadcast %21 : f32 to vector<8x8xf32>
    %23 = arith.mulf %22, %11 : vector<8x8xf32>
    %24 = arith.addf %20, %23 : vector<8x8xf32>
    %c0_30 = arith.constant 0 : index
    %c3_31 = arith.constant 3 : index
    %25 = memref.load %arg3[%c0_30, %c3_31] : memref<4x4xf32, #tpu.memory_space<smem>>
    %26 = vector.broadcast %25 : f32 to vector<8x8xf32>
    %27 = arith.mulf %26, %13 : vector<8x8xf32>
    %28 = arith.addf %24, %27 : vector<8x8xf32>
    %c0_32 = arith.constant 0 : index
    %29 = memref.load %arg4[%c0_32] : memref<4xf32, #tpu.memory_space<smem>>
    %30 = vector.broadcast %29 : f32 to vector<8x8xf32>
    %31 = arith.addf %28, %30 : vector<8x8xf32>
    %c1_33 = arith.constant 1 : index
    %c0_34 = arith.constant 0 : index
    %32 = memref.load %arg3[%c1_33, %c0_34] : memref<4x4xf32, #tpu.memory_space<smem>>
    %33 = vector.broadcast %32 : f32 to vector<8x8xf32>
    %34 = arith.mulf %33, %7 : vector<8x8xf32>
    %c1_35 = arith.constant 1 : index
    %c1_36 = arith.constant 1 : index
    %35 = memref.load %arg3[%c1_35, %c1_36] : memref<4x4xf32, #tpu.memory_space<smem>>
    %36 = vector.broadcast %35 : f32 to vector<8x8xf32>
    %37 = arith.mulf %36, %9 : vector<8x8xf32>
    %38 = arith.addf %34, %37 : vector<8x8xf32>
    %c1_37 = arith.constant 1 : index
    %c2_38 = arith.constant 2 : index
    %39 = memref.load %arg3[%c1_37, %c2_38] : memref<4x4xf32, #tpu.memory_space<smem>>
    %40 = vector.broadcast %39 : f32 to vector<8x8xf32>
    %41 = arith.mulf %40, %11 : vector<8x8xf32>
    %42 = arith.addf %38, %41 : vector<8x8xf32>
    %c1_39 = arith.constant 1 : index
    %c3_40 = arith.constant 3 : index
    %43 = memref.load %arg3[%c1_39, %c3_40] : memref<4x4xf32, #tpu.memory_space<smem>>
    %44 = vector.broadcast %43 : f32 to vector<8x8xf32>
    %45 = arith.mulf %44, %13 : vector<8x8xf32>
    %46 = arith.addf %42, %45 : vector<8x8xf32>
    %c1_41 = arith.constant 1 : index
    %47 = memref.load %arg4[%c1_41] : memref<4xf32, #tpu.memory_space<smem>>
    %48 = vector.broadcast %47 : f32 to vector<8x8xf32>
    %49 = arith.addf %46, %48 : vector<8x8xf32>
    %c2_42 = arith.constant 2 : index
    %c0_43 = arith.constant 0 : index
    %50 = memref.load %arg3[%c2_42, %c0_43] : memref<4x4xf32, #tpu.memory_space<smem>>
    %51 = vector.broadcast %50 : f32 to vector<8x8xf32>
    %52 = arith.mulf %51, %7 : vector<8x8xf32>
    %c2_44 = arith.constant 2 : index
    %c1_45 = arith.constant 1 : index
    %53 = memref.load %arg3[%c2_44, %c1_45] : memref<4x4xf32, #tpu.memory_space<smem>>
    %54 = vector.broadcast %53 : f32 to vector<8x8xf32>
    %55 = arith.mulf %54, %9 : vector<8x8xf32>
    %56 = arith.addf %52, %55 : vector<8x8xf32>
    %c2_46 = arith.constant 2 : index
    %c2_47 = arith.constant 2 : index
    %57 = memref.load %arg3[%c2_46, %c2_47] : memref<4x4xf32, #tpu.memory_space<smem>>
    %58 = vector.broadcast %57 : f32 to vector<8x8xf32>
    %59 = arith.mulf %58, %11 : vector<8x8xf32>
    %60 = arith.addf %56, %59 : vector<8x8xf32>
    %c2_48 = arith.constant 2 : index
    %c3_49 = arith.constant 3 : index
    %61 = memref.load %arg3[%c2_48, %c3_49] : memref<4x4xf32, #tpu.memory_space<smem>>
    %62 = vector.broadcast %61 : f32 to vector<8x8xf32>
    %63 = arith.mulf %62, %13 : vector<8x8xf32>
    %64 = arith.addf %60, %63 : vector<8x8xf32>
    %c2_50 = arith.constant 2 : index
    %65 = memref.load %arg4[%c2_50] : memref<4xf32, #tpu.memory_space<smem>>
    %66 = vector.broadcast %65 : f32 to vector<8x8xf32>
    %67 = arith.addf %64, %66 : vector<8x8xf32>
    %c3_51 = arith.constant 3 : index
    %c0_52 = arith.constant 0 : index
    %68 = memref.load %arg3[%c3_51, %c0_52] : memref<4x4xf32, #tpu.memory_space<smem>>
    %69 = vector.broadcast %68 : f32 to vector<8x8xf32>
    %70 = arith.mulf %69, %7 : vector<8x8xf32>
    %c3_53 = arith.constant 3 : index
    %c1_54 = arith.constant 1 : index
    %71 = memref.load %arg3[%c3_53, %c1_54] : memref<4x4xf32, #tpu.memory_space<smem>>
    %72 = vector.broadcast %71 : f32 to vector<8x8xf32>
    %73 = arith.mulf %72, %9 : vector<8x8xf32>
    %74 = arith.addf %70, %73 : vector<8x8xf32>
    %c3_55 = arith.constant 3 : index
    %c2_56 = arith.constant 2 : index
    %75 = memref.load %arg3[%c3_55, %c2_56] : memref<4x4xf32, #tpu.memory_space<smem>>
    %76 = vector.broadcast %75 : f32 to vector<8x8xf32>
    %77 = arith.mulf %76, %11 : vector<8x8xf32>
    %78 = arith.addf %74, %77 : vector<8x8xf32>
    %c3_57 = arith.constant 3 : index
    %c3_58 = arith.constant 3 : index
    %79 = memref.load %arg3[%c3_57, %c3_58] : memref<4x4xf32, #tpu.memory_space<smem>>
    %80 = vector.broadcast %79 : f32 to vector<8x8xf32>
    %81 = arith.mulf %80, %13 : vector<8x8xf32>
    %82 = arith.addf %78, %81 : vector<8x8xf32>
    %c3_59 = arith.constant 3 : index
    %83 = memref.load %arg4[%c3_59] : memref<4xf32, #tpu.memory_space<smem>>
    %84 = vector.broadcast %83 : f32 to vector<8x8xf32>
    %85 = arith.addf %82, %84 : vector<8x8xf32>
    %86 = math.tanh %31 : vector<8x8xf32>
    %87 = math.tanh %49 : vector<8x8xf32>
    %88 = math.tanh %67 : vector<8x8xf32>
    %89 = arith.mulf %86, %86 : vector<8x8xf32>
    %90 = arith.mulf %87, %87 : vector<8x8xf32>
    %91 = arith.addf %89, %90 : vector<8x8xf32>
    %92 = arith.mulf %88, %88 : vector<8x8xf32>
    %93 = arith.addf %91, %92 : vector<8x8xf32>
    %94 = math.sqrt %93 : vector<8x8xf32>
    %cst = arith.constant 9.99999996E-13 : f32
    %95 = vector.broadcast %cst : f32 to vector<8x8xf32>
    %96 = arith.maximumf %94, %95 : vector<8x8xf32>
    %97 = tpu.reciprocal %96 : vector<8x8xf32> -> vector<8x8xf32>
    %98 = arith.mulf %86, %97 : vector<8x8xf32>
    %99 = arith.mulf %87, %97 : vector<8x8xf32>
    %100 = arith.mulf %88, %97 : vector<8x8xf32>
    %101 = arith.negf %85 : vector<8x8xf32>
    %102 = math.exp %101 : vector<8x8xf32>
    %cst_60 = arith.constant 1.000000e+00 : f32
    %103 = vector.broadcast %cst_60 : f32 to vector<8x8xf32>
    %104 = arith.addf %103, %102 : vector<8x8xf32>
    %105 = arith.divf %103, %104 : vector<8x8xf32>
    %cst_61 = arith.constant dense<0.000000e+00> : vector<8x32xf32>
    %106 = tpu.matmul %98, %1, %cst_61 {dimension_numbers = #tpu.dot_dimension_numbers<[1], [0], [0], [1], [0, 0, 1, 1], [], []>} : vector<8x8xf32>, vector<8x32xf32>, vector<8x32xf32> -> vector<8x32xf32>
    %cst_62 = arith.constant dense<0.000000e+00> : vector<32x32xf32>
    %107 = tpu.matmul %0, %106, %cst_62 {dimension_numbers = #tpu.dot_dimension_numbers<[1], [0], [0], [1], [0, 0, 1, 1], [], []>} : vector<32x8xf32>, vector<8x32xf32>, vector<32x32xf32> -> vector<32x32xf32>
    %cst_63 = arith.constant dense<0.000000e+00> : vector<8x32xf32>
    %108 = tpu.matmul %99, %1, %cst_63 {dimension_numbers = #tpu.dot_dimension_numbers<[1], [0], [0], [1], [0, 0, 1, 1], [], []>} : vector<8x8xf32>, vector<8x32xf32>, vector<8x32xf32> -> vector<8x32xf32>
    %cst_64 = arith.constant dense<0.000000e+00> : vector<32x32xf32>
    %109 = tpu.matmul %0, %108, %cst_64 {dimension_numbers = #tpu.dot_dimension_numbers<[1], [0], [0], [1], [0, 0, 1, 1], [], []>} : vector<32x8xf32>, vector<8x32xf32>, vector<32x32xf32> -> vector<32x32xf32>
    %cst_65 = arith.constant dense<0.000000e+00> : vector<8x32xf32>
    %110 = tpu.matmul %100, %1, %cst_65 {dimension_numbers = #tpu.dot_dimension_numbers<[1], [0], [0], [1], [0, 0, 1, 1], [], []>} : vector<8x8xf32>, vector<8x32xf32>, vector<8x32xf32> -> vector<8x32xf32>
    %cst_66 = arith.constant dense<0.000000e+00> : vector<32x32xf32>
    %111 = tpu.matmul %0, %110, %cst_66 {dimension_numbers = #tpu.dot_dimension_numbers<[1], [0], [0], [1], [0, 0, 1, 1], [], []>} : vector<32x8xf32>, vector<8x32xf32>, vector<32x32xf32> -> vector<32x32xf32>
    %cst_67 = arith.constant dense<0.000000e+00> : vector<8x32xf32>
    %112 = tpu.matmul %105, %1, %cst_67 {dimension_numbers = #tpu.dot_dimension_numbers<[1], [0], [0], [1], [0, 0, 1, 1], [], []>} : vector<8x8xf32>, vector<8x32xf32>, vector<8x32xf32> -> vector<8x32xf32>
    %cst_68 = arith.constant dense<0.000000e+00> : vector<32x32xf32>
    %113 = tpu.matmul %0, %112, %cst_68 {dimension_numbers = #tpu.dot_dimension_numbers<[1], [0], [0], [1], [0, 0, 1, 1], [], []>} : vector<32x8xf32>, vector<8x32xf32>, vector<32x32xf32> -> vector<32x32xf32>
    %c0_69 = arith.constant 0 : index
    %c0_70 = arith.constant 0 : index
    %c0_71 = arith.constant 0 : index
    %114 = vector.load %arg5[%c0_69, %c0_70, %c0_71] : memref<3x32x32xf32, #tpu.memory_space<vmem>>, vector<1x32x32xf32>
    %115 = vector.shape_cast %114 : vector<1x32x32xf32> to vector<32x32xf32>
    %c1_72 = arith.constant 1 : index
    %c0_73 = arith.constant 0 : index
    %c0_74 = arith.constant 0 : index
    %116 = vector.load %arg5[%c1_72, %c0_73, %c0_74] : memref<3x32x32xf32, #tpu.memory_space<vmem>>, vector<1x32x32xf32>
    %117 = vector.shape_cast %116 : vector<1x32x32xf32> to vector<32x32xf32>
    %c2_75 = arith.constant 2 : index
    %c0_76 = arith.constant 0 : index
    %c0_77 = arith.constant 0 : index
    %118 = vector.load %arg5[%c2_75, %c0_76, %c0_77] : memref<3x32x32xf32, #tpu.memory_space<vmem>>, vector<1x32x32xf32>
    %119 = vector.shape_cast %118 : vector<1x32x32xf32> to vector<32x32xf32>
    %120 = arith.mulf %107, %115 : vector<32x32xf32>
    %121 = arith.mulf %109, %117 : vector<32x32xf32>
    %122 = arith.addf %120, %121 : vector<32x32xf32>
    %123 = arith.addf %122, %111 : vector<32x32xf32>
    %124 = arith.mulf %113, %119 : vector<32x32xf32>
    %125 = tpu.reciprocal %123 : vector<32x32xf32> -> vector<32x32xf32>
    %126 = arith.mulf %124, %125 : vector<32x32xf32>
    %c0_78 = arith.constant 0 : index
    %c0_79 = arith.constant 0 : index
    %c0_80 = arith.constant 0 : index
    %127 = vector.load %arg15[%c0_78, %c0_79, %c0_80] : memref<1x32x32xf32, #tpu.memory_space<vmem>>, vector<1x32x32xf32>
    %128 = vector.shape_cast %127 : vector<1x32x32xf32> to vector<32x32xf32>
    %129 = vector.shape_cast %126 : vector<32x32xf32> to vector<1x32x32xf32>
    tpu.vector_store %arg15[%c0_78, %c0_79, %c0_80], %129 {strides = array<i32>} : memref<1x32x32xf32, #tpu.memory_space<vmem>>, vector<1x32x32xf32>,
    %cst_81 = arith.constant 0.000000e+00 : f32
    %130 = vector.broadcast %cst_81 : f32 to vector<4x18x18xf32>
    %c0_82 = arith.constant 0 : index
    %c0_83 = arith.constant 0 : index
    %c0_84 = arith.constant 0 : index
    %131 = vector.load %arg16[%c0_82, %c0_83, %c0_84] : memref<9x18x18xf32, #tpu.memory_space<vmem>>, vector<4x18x18xf32>
    tpu.vector_store %arg16[%c0_82, %c0_83, %c0_84], %130 {strides = array<i32>} : memref<9x18x18xf32, #tpu.memory_space<vmem>>, vector<4x18x18xf32>,
    %c0_85 = arith.constant 0 : index
    %c0_86 = arith.constant 0 : index
    %c0_87 = arith.constant 0 : index
    %c0_88 = arith.constant 0 : index
    %132 = vector.load %arg2[%c0_85, %c0_86, %c0_87, %c0_88] : memref<1x4x16x16xf32, #tpu.memory_space<vmem>>, vector<1x4x16x16xf32>
    %133 = vector.shape_cast %132 : vector<1x4x16x16xf32> to vector<4x16x16xf32>
    %c0_89 = arith.constant 0 : index
    %c1_90 = arith.constant 1 : index
    %c1_91 = arith.constant 1 : index
    %134 = vector.load %arg16[%c0_89, %c1_90, %c1_91] : memref<9x18x18xf32, #tpu.memory_space<vmem>>, vector<4x16x16xf32>
    tpu.vector_store %arg16[%c0_89, %c1_90, %c1_91], %133 {strides = array<i32>} : memref<9x18x18xf32, #tpu.memory_space<vmem>>, vector<4x16x16xf32>,
    %cst_92 = arith.constant dense<0.000000e+00> : vector<8x18xf32>
    %135 = tpu.matmul %7, %5, %cst_92 {dimension_numbers = #tpu.dot_dimension_numbers<[1], [0], [0], [1], [0, 0, 1, 1], [], []>} : vector<8x8xf32>, vector<8x18xf32>, vector<8x18xf32> -> vector<8x18xf32>
    %cst_93 = arith.constant dense<0.000000e+00> : vector<18x18xf32>
    %136 = tpu.matmul %4, %135, %cst_93 {dimension_numbers = #tpu.dot_dimension_numbers<[1], [0], [0], [1], [0, 0, 1, 1], [], []>} : vector<18x8xf32>, vector<8x18xf32>, vector<18x18xf32> -> vector<18x18xf32>
    %c4 = arith.constant 4 : index
    %c0_94 = arith.constant 0 : index
    %c0_95 = arith.constant 0 : index
    %137 = vector.load %arg16[%c4, %c0_94, %c0_95] : memref<9x18x18xf32, #tpu.memory_space<vmem>>, vector<1x18x18xf32>
    %138 = vector.shape_cast %137 : vector<1x18x18xf32> to vector<18x18xf32>
    %139 = vector.shape_cast %136 : vector<18x18xf32> to vector<1x18x18xf32>
    tpu.vector_store %arg16[%c4, %c0_94, %c0_95], %139 {strides = array<i32>} : memref<9x18x18xf32, #tpu.memory_space<vmem>>, vector<1x18x18xf32>,
    %cst_96 = arith.constant dense<0.000000e+00> : vector<8x18xf32>
    %140 = tpu.matmul %9, %5, %cst_96 {dimension_numbers = #tpu.dot_dimension_numbers<[1], [0], [0], [1], [0, 0, 1, 1], [], []>} : vector<8x8xf32>, vector<8x18xf32>, vector<8x18xf32> -> vector<8x18xf32>
    %cst_97 = arith.constant dense<0.000000e+00> : vector<18x18xf32>
    %141 = tpu.matmul %4, %140, %cst_97 {dimension_numbers = #tpu.dot_dimension_numbers<[1], [0], [0], [1], [0, 0, 1, 1], [], []>} : vector<18x8xf32>, vector<8x18xf32>, vector<18x18xf32> -> vector<18x18xf32>
    %c5 = arith.constant 5 : index
    %c0_98 = arith.constant 0 : index
    %c0_99 = arith.constant 0 : index
    %142 = vector.load %arg16[%c5, %c0_98, %c0_99] : memref<9x18x18xf32, #tpu.memory_space<vmem>>, vector<1x18x18xf32>
    %143 = vector.shape_cast %142 : vector<1x18x18xf32> to vector<18x18xf32>
    %144 = vector.shape_cast %141 : vector<18x18xf32> to vector<1x18x18xf32>
    tpu.vector_store %arg16[%c5, %c0_98, %c0_99], %144 {strides = array<i32>} : memref<9x18x18xf32, #tpu.memory_space<vmem>>, vector<1x18x18xf32>,
    %cst_100 = arith.constant dense<0.000000e+00> : vector<8x18xf32>
    %145 = tpu.matmul %11, %5, %cst_100 {dimension_numbers = #tpu.dot_dimension_numbers<[1], [0], [0], [1], [0, 0, 1, 1], [], []>} : vector<8x8xf32>, vector<8x18xf32>, vector<8x18xf32> -> vector<8x18xf32>
    %cst_101 = arith.constant dense<0.000000e+00> : vector<18x18xf32>
    %146 = tpu.matmul %4, %145, %cst_101 {dimension_numbers = #tpu.dot_dimension_numbers<[1], [0], [0], [1], [0, 0, 1, 1], [], []>} : vector<18x8xf32>, vector<8x18xf32>, vector<18x18xf32> -> vector<18x18xf32>
    %c6 = arith.constant 6 : index
    %c0_102 = arith.constant 0 : index
    %c0_103 = arith.constant 0 : index
    %147 = vector.load %arg16[%c6, %c0_102, %c0_103] : memref<9x18x18xf32, #tpu.memory_space<vmem>>, vector<1x18x18xf32>
    %148 = vector.shape_cast %147 : vector<1x18x18xf32> to vector<18x18xf32>
    %149 = vector.shape_cast %146 : vector<18x18xf32> to vector<1x18x18xf32>
    tpu.vector_store %arg16[%c6, %c0_102, %c0_103], %149 {strides = array<i32>} : memref<9x18x18xf32, #tpu.memory_space<vmem>>, vector<1x18x18xf32>,
    %cst_104 = arith.constant dense<0.000000e+00> : vector<8x18xf32>
    %150 = tpu.matmul %13, %5, %cst_104 {dimension_numbers = #tpu.dot_dimension_numbers<[1], [0], [0], [1], [0, 0, 1, 1], [], []>} : vector<8x8xf32>, vector<8x18xf32>, vector<8x18xf32> -> vector<8x18xf32>
    %cst_105 = arith.constant dense<0.000000e+00> : vector<18x18xf32>
    %151 = tpu.matmul %4, %150, %cst_105 {dimension_numbers = #tpu.dot_dimension_numbers<[1], [0], [0], [1], [0, 0, 1, 1], [], []>} : vector<18x8xf32>, vector<8x18xf32>, vector<18x18xf32> -> vector<18x18xf32>
    %c7 = arith.constant 7 : index
    %c0_106 = arith.constant 0 : index
    %c0_107 = arith.constant 0 : index
    %152 = vector.load %arg16[%c7, %c0_106, %c0_107] : memref<9x18x18xf32, #tpu.memory_space<vmem>>, vector<1x18x18xf32>
    %153 = vector.shape_cast %152 : vector<1x18x18xf32> to vector<18x18xf32>
    %154 = vector.shape_cast %151 : vector<18x18xf32> to vector<1x18x18xf32>
    tpu.vector_store %arg16[%c7, %c0_106, %c0_107], %154 {strides = array<i32>} : memref<9x18x18xf32, #tpu.memory_space<vmem>>, vector<1x18x18xf32>,
    %cst_108 = arith.constant dense<0.000000e+00> : vector<18x32xf32>
    %155 = tpu.matmul %2, %126, %cst_108 {dimension_numbers = #tpu.dot_dimension_numbers<[1], [0], [0], [1], [0, 0, 1, 1], [], []>} : vector<18x32xf32>, vector<32x32xf32>, vector<18x32xf32> -> vector<18x32xf32>
    %cst_109 = arith.constant dense<0.000000e+00> : vector<18x18xf32>
    %156 = tpu.matmul %155, %3, %cst_109 {dimension_numbers = #tpu.dot_dimension_numbers<[1], [0], [0], [1], [0, 0, 1, 1], [], []>} : vector<18x32xf32>, vector<32x18xf32>, vector<18x18xf32> -> vector<18x18xf32>
    %c8 = arith.constant 8 : index
    %c0_110 = arith.constant 0 : index
    %c0_111 = arith.constant 0 : index
    %157 = vector.load %arg16[%c8, %c0_110, %c0_111] : memref<9x18x18xf32, #tpu.memory_space<vmem>>, vector<1x18x18xf32>
    %158 = vector.shape_cast %157 : vector<1x18x18xf32> to vector<18x18xf32>
    %159 = vector.shape_cast %156 : vector<18x18xf32> to vector<1x18x18xf32>
    tpu.vector_store %arg16[%c8, %c0_110, %c0_111], %159 {strides = array<i32>} : memref<9x18x18xf32, #tpu.memory_space<vmem>>, vector<1x18x18xf32>,
    %cst_112 = arith.constant 0.000000e+00 : f32
    %160 = vector.broadcast %cst_112 : f32 to vector<4x256xf32>
    %c0_113 = arith.constant 0 : index
    %c0_114 = arith.constant 0 : index
    %c0_115 = arith.constant 0 : index
    %161 = vector.load %arg16[%c0_113, %c0_114, %c0_115] : memref<9x18x18xf32, #tpu.memory_space<vmem>>, vector<9x18x16xf32>
    %162 = vector.shape_cast %161 : vector<9x18x16xf32> to vector<9x288xf32>
    %c0_116 = arith.constant 0 : index
    %c0_117 = arith.constant 0 : index
    %c0_118 = arith.constant 0 : index
    %163 = vector.load %arg12[%c0_116, %c0_117, %c0_118] : memref<9x4x9xf32, #tpu.memory_space<vmem>>, vector<1x4x9xf32>
    %164 = vector.shape_cast %163 : vector<1x4x9xf32> to vector<4x9xf32>
    %165 = vector.extract_strided_slice %162 {offsets = [0, 0], sizes = [9, 256], strides = [1, 1]} : vector<9x288xf32> to vector<9x256xf32>
    %cst_119 = arith.constant dense<0.000000e+00> : vector<4x256xf32>
    %166 = tpu.matmul %164, %165, %cst_119 {dimension_numbers = #tpu.dot_dimension_numbers<[1], [0], [0], [1], [0, 0, 1, 1], [], []>} : vector<4x9xf32>, vector<9x256xf32>, vector<4x256xf32> -> vector<4x256xf32>
    %167 = arith.addf %160, %166 : vector<4x256xf32>
    %c3_120 = arith.constant 3 : index
    %c0_121 = arith.constant 0 : index
    %c0_122 = arith.constant 0 : index
    %168 = vector.load %arg12[%c3_120, %c0_121, %c0_122] : memref<9x4x9xf32, #tpu.memory_space<vmem>>, vector<1x4x9xf32>
    %169 = vector.shape_cast %168 : vector<1x4x9xf32> to vector<4x9xf32>
    %170 = vector.extract_strided_slice %162 {offsets = [0, 16], sizes = [9, 256], strides = [1, 1]} : vector<9x288xf32> to vector<9x256xf32>
    %cst_123 = arith.constant dense<0.000000e+00> : vector<4x256xf32>
    %171 = tpu.matmul %169, %170, %cst_123 {dimension_numbers = #tpu.dot_dimension_numbers<[1], [0], [0], [1], [0, 0, 1, 1], [], []>} : vector<4x9xf32>, vector<9x256xf32>, vector<4x256xf32> -> vector<4x256xf32>
    %172 = arith.addf %167, %171 : vector<4x256xf32>
    %c6_124 = arith.constant 6 : index
    %c0_125 = arith.constant 0 : index
    %c0_126 = arith.constant 0 : index
    %173 = vector.load %arg12[%c6_124, %c0_125, %c0_126] : memref<9x4x9xf32, #tpu.memory_space<vmem>>, vector<1x4x9xf32>
    %174 = vector.shape_cast %173 : vector<1x4x9xf32> to vector<4x9xf32>
    %175 = vector.extract_strided_slice %162 {offsets = [0, 32], sizes = [9, 256], strides = [1, 1]} : vector<9x288xf32> to vector<9x256xf32>
    %cst_127 = arith.constant dense<0.000000e+00> : vector<4x256xf32>
    %176 = tpu.matmul %174, %175, %cst_127 {dimension_numbers = #tpu.dot_dimension_numbers<[1], [0], [0], [1], [0, 0, 1, 1], [], []>} : vector<4x9xf32>, vector<9x256xf32>, vector<4x256xf32> -> vector<4x256xf32>
    %177 = arith.addf %172, %176 : vector<4x256xf32>
    %c0_128 = arith.constant 0 : index
    %c0_129 = arith.constant 0 : index
    %c1_130 = arith.constant 1 : index
    %178 = vector.load %arg16[%c0_128, %c0_129, %c1_130] : memref<9x18x18xf32, #tpu.memory_space<vmem>>, vector<9x18x16xf32>
    %179 = vector.shape_cast %178 : vector<9x18x16xf32> to vector<9x288xf32>
    %c1_131 = arith.constant 1 : index
    %c0_132 = arith.constant 0 : index
    %c0_133 = arith.constant 0 : index
    %180 = vector.load %arg12[%c1_131, %c0_132, %c0_133] : memref<9x4x9xf32, #tpu.memory_space<vmem>>, vector<1x4x9xf32>
    %181 = vector.shape_cast %180 : vector<1x4x9xf32> to vector<4x9xf32>
    %182 = vector.extract_strided_slice %179 {offsets = [0, 0], sizes = [9, 256], strides = [1, 1]} : vector<9x288xf32> to vector<9x256xf32>
    %cst_134 = arith.constant dense<0.000000e+00> : vector<4x256xf32>
    %183 = tpu.matmul %181, %182, %cst_134 {dimension_numbers = #tpu.dot_dimension_numbers<[1], [0], [0], [1], [0, 0, 1, 1], [], []>} : vector<4x9xf32>, vector<9x256xf32>, vector<4x256xf32> -> vector<4x256xf32>
    %184 = arith.addf %177, %183 : vector<4x256xf32>
    %c4_135 = arith.constant 4 : index
    %c0_136 = arith.constant 0 : index
    %c0_137 = arith.constant 0 : index
    %185 = vector.load %arg12[%c4_135, %c0_136, %c0_137] : memref<9x4x9xf32, #tpu.memory_space<vmem>>, vector<1x4x9xf32>
    %186 = vector.shape_cast %185 : vector<1x4x9xf32> to vector<4x9xf32>
    %187 = vector.extract_strided_slice %179 {offsets = [0, 16], sizes = [9, 256], strides = [1, 1]} : vector<9x288xf32> to vector<9x256xf32>
    %cst_138 = arith.constant dense<0.000000e+00> : vector<4x256xf32>
    %188 = tpu.matmul %186, %187, %cst_138 {dimension_numbers = #tpu.dot_dimension_numbers<[1], [0], [0], [1], [0, 0, 1, 1], [], []>} : vector<4x9xf32>, vector<9x256xf32>, vector<4x256xf32> -> vector<4x256xf32>
    %189 = arith.addf %184, %188 : vector<4x256xf32>
    %c7_139 = arith.constant 7 : index
    %c0_140 = arith.constant 0 : index
    %c0_141 = arith.constant 0 : index
    %190 = vector.load %arg12[%c7_139, %c0_140, %c0_141] : memref<9x4x9xf32, #tpu.memory_space<vmem>>, vector<1x4x9xf32>
    %191 = vector.shape_cast %190 : vector<1x4x9xf32> to vector<4x9xf32>
    %192 = vector.extract_strided_slice %179 {offsets = [0, 32], sizes = [9, 256], strides = [1, 1]} : vector<9x288xf32> to vector<9x256xf32>
    %cst_142 = arith.constant dense<0.000000e+00> : vector<4x256xf32>
    %193 = tpu.matmul %191, %192, %cst_142 {dimension_numbers = #tpu.dot_dimension_numbers<[1], [0], [0], [1], [0, 0, 1, 1], [], []>} : vector<4x9xf32>, vector<9x256xf32>, vector<4x256xf32> -> vector<4x256xf32>
    %194 = arith.addf %189, %193 : vector<4x256xf32>
    %c0_143 = arith.constant 0 : index
    %c0_144 = arith.constant 0 : index
    %c2_145 = arith.constant 2 : index
    %195 = vector.load %arg16[%c0_143, %c0_144, %c2_145] : memref<9x18x18xf32, #tpu.memory_space<vmem>>, vector<9x18x16xf32>
    %196 = vector.shape_cast %195 : vector<9x18x16xf32> to vector<9x288xf32>
    %c2_146 = arith.constant 2 : index
    %c0_147 = arith.constant 0 : index
    %c0_148 = arith.constant 0 : index
    %197 = vector.load %arg12[%c2_146, %c0_147, %c0_148] : memref<9x4x9xf32, #tpu.memory_space<vmem>>, vector<1x4x9xf32>
    %198 = vector.shape_cast %197 : vector<1x4x9xf32> to vector<4x9xf32>
    %199 = vector.extract_strided_slice %196 {offsets = [0, 0], sizes = [9, 256], strides = [1, 1]} : vector<9x288xf32> to vector<9x256xf32>
    %cst_149 = arith.constant dense<0.000000e+00> : vector<4x256xf32>
    %200 = tpu.matmul %198, %199, %cst_149 {dimension_numbers = #tpu.dot_dimension_numbers<[1], [0], [0], [1], [0, 0, 1, 1], [], []>} : vector<4x9xf32>, vector<9x256xf32>, vector<4x256xf32> -> vector<4x256xf32>
    %201 = arith.addf %194, %200 : vector<4x256xf32>
    %c5_150 = arith.constant 5 : index
    %c0_151 = arith.constant 0 : index
    %c0_152 = arith.constant 0 : index
    %202 = vector.load %arg12[%c5_150, %c0_151, %c0_152] : memref<9x4x9xf32, #tpu.memory_space<vmem>>, vector<1x4x9xf32>
    %203 = vector.shape_cast %202 : vector<1x4x9xf32> to vector<4x9xf32>
    %204 = vector.extract_strided_slice %196 {offsets = [0, 16], sizes = [9, 256], strides = [1, 1]} : vector<9x288xf32> to vector<9x256xf32>
    %cst_153 = arith.constant dense<0.000000e+00> : vector<4x256xf32>
    %205 = tpu.matmul %203, %204, %cst_153 {dimension_numbers = #tpu.dot_dimension_numbers<[1], [0], [0], [1], [0, 0, 1, 1], [], []>} : vector<4x9xf32>, vector<9x256xf32>, vector<4x256xf32> -> vector<4x256xf32>
    %206 = arith.addf %201, %205 : vector<4x256xf32>
    %c8_154 = arith.constant 8 : index
    %c0_155 = arith.constant 0 : index
    %c0_156 = arith.constant 0 : index
    %207 = vector.load %arg12[%c8_154, %c0_155, %c0_156] : memref<9x4x9xf32, #tpu.memory_space<vmem>>, vector<1x4x9xf32>
    %208 = vector.shape_cast %207 : vector<1x4x9xf32> to vector<4x9xf32>
    %209 = vector.extract_strided_slice %196 {offsets = [0, 32], sizes = [9, 256], strides = [1, 1]} : vector<9x288xf32> to vector<9x256xf32>
    %cst_157 = arith.constant dense<0.000000e+00> : vector<4x256xf32>
    %210 = tpu.matmul %208, %209, %cst_157 {dimension_numbers = #tpu.dot_dimension_numbers<[1], [0], [0], [1], [0, 0, 1, 1], [], []>} : vector<4x9xf32>, vector<9x256xf32>, vector<4x256xf32> -> vector<4x256xf32>
    %211 = arith.addf %206, %210 : vector<4x256xf32>
    %c0_158 = arith.constant 0 : index
    %c0_159 = arith.constant 0 : index
    %212 = vector.load %arg13[%c0_158, %c0_159] : memref<4x1xf32, #tpu.memory_space<vmem>>, vector<4x1xf32>
    %213 = vector.broadcast %212 : vector<4x1xf32> to vector<4x256xf32>
    %214 = arith.addf %211, %213 : vector<4x256xf32>
    %c0_160 = arith.constant 0 : index
    %c0_161 = arith.constant 0 : index
    %c0_162 = arith.constant 0 : index
    %215 = vector.load %arg14[%c0_160, %c0_161, %c0_162] : memref<1x4x256xf32, #tpu.memory_space<vmem>>, vector<1x4x256xf32>
    %216 = vector.shape_cast %215 : vector<1x4x256xf32> to vector<4x256xf32>
    %217 = vector.shape_cast %214 : vector<4x256xf32> to vector<1x4x256xf32>
    tpu.vector_store %arg14[%c0_160, %c0_161, %c0_162], %217 {strides = array<i32>} : memref<1x4x256xf32, #tpu.memory_space<vmem>>, vector<1x4x256xf32>,
    return
  }
  func.func @transform_0(%arg0: i32) -> (i32, i32, i32, i32) {
    %c0_i32 = arith.constant 0 : i32
    %c0_i32_0 = arith.constant 0 : i32
    %c0_i32_1 = arith.constant 0 : i32
    %c0_i32_2 = arith.constant 0 : i32
    return %arg0, %c0_i32, %c0_i32_0, %c0_i32_1 : i32, i32, i32, i32
  }
  func.func @transform_1(%arg0: i32) -> (i32, i32, i32, i32) {
    %c0_i32 = arith.constant 0 : i32
    %c0_i32_0 = arith.constant 0 : i32
    %c0_i32_1 = arith.constant 0 : i32
    %c0_i32_2 = arith.constant 0 : i32
    return %arg0, %c0_i32, %c0_i32_0, %c0_i32_1 : i32, i32, i32, i32
  }
  func.func @transform_2(%arg0: i32) -> (i32, i32) {
    %c0_i32 = arith.constant 0 : i32
    %c0_i32_0 = arith.constant 0 : i32
    %c0_i32_1 = arith.constant 0 : i32
    return %c0_i32, %c0_i32_0 : i32, i32
  }
  func.func @transform_3(%arg0: i32) -> i32 {
    %c0_i32 = arith.constant 0 : i32
    %c0_i32_0 = arith.constant 0 : i32
    return %c0_i32 : i32
  }
  func.func @transform_4(%arg0: i32) -> (i32, i32, i32) {
    %c0_i32 = arith.constant 0 : i32
    %c0_i32_0 = arith.constant 0 : i32
    %c0_i32_1 = arith.constant 0 : i32
    %c0_i32_2 = arith.constant 0 : i32
    return %c0_i32, %c0_i32_0, %c0_i32_1 : i32, i32, i32
  }
  func.func @transform_5(%arg0: i32) -> (i32, i32) {
    %c0_i32 = arith.constant 0 : i32
    %c0_i32_0 = arith.constant 0 : i32
    %c0_i32_1 = arith.constant 0 : i32
    return %c0_i32, %c0_i32_0 : i32, i32
  }
  func.func @transform_6(%arg0: i32) -> (i32, i32) {
    %c0_i32 = arith.constant 0 : i32
    %c0_i32_0 = arith.constant 0 : i32
    %c0_i32_1 = arith.constant 0 : i32
    return %c0_i32, %c0_i32_0 : i32, i32
  }
  func.func @transform_7(%arg0: i32) -> (i32, i32) {
    %c0_i32 = arith.constant 0 : i32
    %c0_i32_0 = arith.constant 0 : i32
    %c0_i32_1 = arith.constant 0 : i32
    return %c0_i32, %c0_i32_0 : i32, i32
  }
  func.func @transform_8(%arg0: i32) -> (i32, i32) {
    %c0_i32 = arith.constant 0 : i32
    %c0_i32_0 = arith.constant 0 : i32
    %c0_i32_1 = arith.constant 0 : i32
    return %c0_i32, %c0_i32_0 : i32, i32
  }
  func.func @transform_9(%arg0: i32) -> (i32, i32) {
    %c0_i32 = arith.constant 0 : i32
    %c0_i32_0 = arith.constant 0 : i32
    %c0_i32_1 = arith.constant 0 : i32
    return %c0_i32, %c0_i32_0 : i32, i32
  }
  func.func @transform_10(%arg0: i32) -> (i32, i32) {
    %c0_i32 = arith.constant 0 : i32
    %c0_i32_0 = arith.constant 0 : i32
    %c0_i32_1 = arith.constant 0 : i32
    return %c0_i32, %c0_i32_0 : i32, i32
  }
  func.func @transform_11(%arg0: i32) -> (i32, i32, i32) {
    %c0_i32 = arith.constant 0 : i32
    %c0_i32_0 = arith.constant 0 : i32
    %c0_i32_1 = arith.constant 0 : i32
    %c0_i32_2 = arith.constant 0 : i32
    return %c0_i32, %c0_i32_0, %c0_i32_1 : i32, i32, i32
  }
  func.func @transform_12(%arg0: i32) -> (i32, i32) {
    %c0_i32 = arith.constant 0 : i32
    %c0_i32_0 = arith.constant 0 : i32
    %c0_i32_1 = arith.constant 0 : i32
    return %c0_i32, %c0_i32_0 : i32, i32
  }
  func.func @transform_13(%arg0: i32) -> (i32, i32, i32) {
    %c0_i32 = arith.constant 0 : i32
    %c0_i32_0 = arith.constant 0 : i32
    %c0_i32_1 = arith.constant 0 : i32
    return %arg0, %c0_i32, %c0_i32_0 : i32, i32, i32
  }
  func.func @transform_14(%arg0: i32) -> (i32, i32, i32) {
    %c0_i32 = arith.constant 0 : i32
    %c0_i32_0 = arith.constant 0 : i32
    %c0_i32_1 = arith.constant 0 : i32
    return %arg0, %c0_i32, %c0_i32_0 : i32, i32, i32
  }
}

</mosaic_0001>

<bundles_post_ra>
// kernel: tpu_custom_call.1
= control target key start
LH: loop header
LB: loop body
LE: loop exit
PB: predicated region body
PF: predicated region fallthrough
CT: control target
= control target key end

     0   :  { %s8124_s0 = inlined_call_operand.hbm [shape: f32[2,4,8,8], index: 0, kind: input, shape index: {}]   ;;  %s8125_s1 = inlined_call_operand.vmem [shape: f32[2,4,16,16], index: 1, kind: input, shape index: {}]   ;;  %s8126_s2 = inlined_call_operand.hbm [shape: f32[4,4], index: 2, kind: input, shape index: {}]   ;;  %s8127_s3 = inlined_call_operand.vmem [shape: f32[4], index: 3, kind: input, shape index: {}]   ;;  %s8128_s4 = inlined_call_operand.hbm [shape: f32[3,32,32], index: 4, kind: input, shape index: {}]   ;;  %s8129_s5 = inlined_call_operand.vmem [shape: f32[32,8], index: 5, kind: input, shape index: {}]   ;;  %s8130_s6 = inlined_call_operand.hbm [shape: f32[8,32], index: 6, kind: input, shape index: {}]   ;;  %s8131_s7 = inlined_call_operand.hbm [shape: f32[18,32], index: 7, kind: input, shape index: {}]   ;;  %s8132_s8 = inlined_call_operand.vmem [shape: f32[32,18], index: 8, kind: input, shape index: {}]   ;;  %s8133_s9 = inlined_call_operand.vmem [shape: f32[18,8], index: 9, kind: input, shape index: {}]   ;;  %s8134_s10 = inlined_call_operand.vmem [shape: f32[8,18], index: 10, kind: input, shape index: {}]   ;;  %s8135_s11 = inlined_call_operand.hbm [shape: f32[9,4,9], index: 11, kind: input, shape index: {}]   ;;  %s8136_s12 = inlined_call_operand.vmem [shape: f32[4,1], index: 12, kind: input, shape index: {}]   ;;  %s8137_s13 = inlined_call_operand.hbm [shape: f32[2,4,256], index: 13, kind: output, shape index: {0}]   ;;  %s8138_s14 = inlined_call_operand.hbm [shape: f32[2,32,32], index: 14, kind: output, shape index: {1}]  }
   0x1   :  { %8161 = sst [smem:[#allocation39_spill]] %s8126_s2 }
   0x2   :  { %8162 = sst [smem:[#allocation40_spill]] %s8127_s3 }
   0x3   :  { %8163 = sst [smem:[#allocation41_spill]] %s8128_s4 }
   0x4   :  { %8164 = sst [smem:[#allocation42_spill]] %s8130_s6 }
   0x5   :  { %8165 = sst [smem:[#allocation43_spill]] %s8131_s7 }
   0x6   :  { %8166 = sst [smem:[#allocation44_spill]] %s8135_s11 }
   0x7   :  { %8167 = sst [smem:[#allocation45_spill]] %s8137_s13 }
   0x8   :  { %20 = vsyncpa [#allocation4], 0 }
   0x9   :  { %22 = vsyncpa [#allocation4 + $0x1], 0 }
   0xa   :  { %23 = vsyncpa [#allocation6], 0 }
   0xb   :  { %24 = vsyncpa [#allocation7], 0 }
   0xc   :  { %25 = vsyncpa [#allocation11], 0 }
   0xd   :  { %26 = vsyncpa [#allocation14], 0 }
   0xe   :  { %27 = vsyncpa [#allocation5], 0 }
   0xf   :  { %29 = vsyncpa [#allocation5 + $0x1], 0 }
  0x10   :  { %30 = vsyncpa [#allocation18], 0 }
  0x11   :  { %32 = vsyncpa [#allocation18 + $0x1], 0  ;;  %s6295_s29 = smov 0   ;;  %s6297_s30 = smov 0  }
  0x12   :  { %s6299_s15 = smov 0   ;;  %s6301_s16 = smov 0  }
  0x13 LB: > { %s6190_s17 = smov [#allocation10]   ;;  %s6316_s19 = sadd.s32 4294967295, %s6188_s16   ;;  %s6188_s16 = sphi %s6301_s16, %s8241_s16   ;;  %s6184_s15 = sphi %s6299_s15, %s8240_s15   ;;  %s6180_s30 = sphi %s6297_s30, %s8239_s30   ;;  %s6176_s29 = sphi %s6295_s29, %s8238_s29  }
  0x14   : > { %s410_s18 = sshll.u32 %s6190_s17, 4  ;;  %p5417_p0 = scmp.ge.s32.totalorder %s6188_s16, 1  ;;  %s411_s18 = int_to_ptr.vmem [resolvable:$true] %s410_s18 }
  0x15   : > { %p8140_p1 = scmp.eq.s32.totalorder %s6316_s19, 0  ;;  %p378_p2 = scmp.lt.s32.totalorder %s6188_s16, 3 }
  0x16   : > { %s6191_s21 = smov [#allocation13]   ;;  %s8170_s3 = sld [smem:[#allocation40_spill]] }
  0x17   : > { %p6321_p3 = pnand %p5417_p0, %p378_p2  ;;  %s437_s22 = sshll.u32 %s6191_s21, 4  ;;  %s438_s22 = int_to_ptr.vmem [resolvable:$true] %s437_s22 }
  0x18   : > { %s5931_s28 = scalar_lea.vmem %s411_s18, 1536  ;;  %p5939_p11 = scmp.lt.s32.totalorder %s411_s18, %s411_s18 }
  0x19   : > { %s8168_s20 = scalar_select %p6321_p3, 1, 0 }
  0x1a   : > { %p5790_p5 = pneg %p6321_p3  ;;  %p5932_p8 = scmp.ne.s32.totalorder %s411_s18, %s5931_s28 }
  0x1b   : > { %p5940_p12 = scmp.lt.s32.totalorder %s5931_s28, %s5931_s28 }
  0x1c   : > { %p6330_p6 = pnand %p5790_p5, %p8140_p1  ;;  %s400_s26 = sshll.u32 %s8170_s3, 4  ;;  %s6337_s26 = int_to_ptr.vmem [resolvable:$true] %s400_s26 }
  0x1d   : > { %p5941_p13 = por %p5940_p12, %p5939_p11 }
  0x1e   : > { %p6341_p7 = pneg %p6330_p6 }
  0x20   : > { %p5934_p9 = pnand %p5932_p8, %p6341_p7 }
  0x22   : > { %p5935_p10 = pneg %p5934_p9 }
  0x24   : > { %p5942_p0 = pnand %p5941_p13, %p5935_p10 }
  0x26   : > { %5945 = shalt.err (!%p5942_p0)
}
  0x27   : > { %s8142_s17 = smov 128   ;;  %s8143_s21 = smov 8  }
  0x28   : > { %s8172_s4 = sld [smem:[#allocation41_spill]]  ;;  %s5957_s3 = scalar_lea.vmem %s438_s22, 384 }
  0x29   : > { %p5958_p2 = scmp.ne.s32.totalorder %s438_s22, %s5957_s3  ;;  %p5965_p9 = scmp.lt.s32.totalorder %s438_s22, %s438_s22 }
  0x2a   : > { %p5966_p10 = scmp.lt.s32.totalorder %s5957_s3, %s5957_s3 }
  0x2b   : > { %p5960_p5 = pnand %p5958_p2, %p6341_p7 }
  0x2c   : > { %p5967_p11 = por %p5966_p10, %p5965_p9 }
  0x2d   : > { %p5961_p8 = pneg %p5960_p5 }
  0x2e   : > { %5799 = dma.hbm_to_vmem [thread:$0]  (!%p6330_p6), %s8172_s4, 1536, %s411_s18, [#allocation11], %s8142_s17, %s8142_s17, %s8143_s21  }
  0x2f   : > { %p5968_p12 = pnand %p5967_p11, %p5961_p8 }
  0x31   : > { %5971 = shalt.err (!%p5968_p12)
}
  0x32   : > { %s8173_s7 = sld [smem:[#allocation43_spill]]  ;;  %s6194_s18 = smov [#allocation8]  }
  0x33   : > { %s8174_s2 = sld [smem:[#allocation39_spill]]  ;;  %s5983_s25 = scalar_lea.vmem %s6337_s26, 16 }
  0x34   : > { %p5984_p13 = scmp.ne.s32.totalorder %s6337_s26, %s5983_s25  ;;  %p5991_p5 = scmp.lt.s32.totalorder %s6337_s26, %s6337_s26 }
  0x35   : > { %p5992_p8 = scmp.lt.s32.totalorder %s5983_s25, %s5983_s25 }
  0x36   : > { %p5986_p0 = pnand %p5984_p13, %p6341_p7 }
  0x37   : > { %p5993_p9 = por %p5992_p8, %p5991_p5 }
  0x38   : > { %5805 = dma.hbm_to_vmem [thread:$0]  (!%p6330_p6), %s8173_s7, 384, %s438_s22, [#allocation14], %s8142_s17, %s8142_s17, %s8143_s21  }
  0x39   : > { %5793 = dma.hbm_to_smem (!%p6330_p6), %s8174_s2, 64, %s6194_s18, [#allocation6]  }
  0x3a   : > { %p5987_p2 = pneg %p5986_p0 }
  0x3c   : > { %p5994_p10 = pnand %p5993_p9, %p5987_p2 }
  0x3e   : > { %5997 = shalt.err (!%p5994_p10)
}
  0x3f   : > { %s6195_s13 = smov [#allocation9]   ;;  %s6196_s22 = smov [#allocation12]  }
  0x40   : > { %5796 = dma.vmem_to_smem (!%p6330_p6), %s6337_s26, 16, %s6195_s13, [#allocation7]  }
  0x41   : > { %s427_s28 = sshll.u32 %s6196_s22, 4  ;;  %s6197_s18 = smov [#allocation15]   ;;  %s428_s28 = int_to_ptr.vmem [resolvable:$true] %s427_s28 }
  0x42   : > { %s459_s3 = sshll.u32 %s6197_s18, 4  ;;  %s6009_s24 = scalar_lea.vmem %s428_s28, 128  ;;  %s460_s3 = int_to_ptr.vmem [resolvable:$true] %s459_s3 }
  0x43   : > { %p6010_p11 = scmp.ne.s32.totalorder %s428_s28, %s6009_s24  ;;  %p6017_p0 = scmp.lt.s32.totalorder %s428_s28, %s428_s28 }
  0x44   : > { %p6018_p2 = scmp.lt.s32.totalorder %s6009_s24, %s6009_s24 }
  0x45   : > { %p6012_p12 = pnand %p6010_p11, %p6341_p7 }
  0x46   : > { %p6019_p5 = por %p6018_p2, %p6017_p0 }
  0x47   : > { %p6013_p13 = pneg %p6012_p12 }
  0x49   : > { %p6020_p8 = pnand %p6019_p5, %p6013_p13 }
  0x4b   : > { %6023 = shalt.err (!%p6020_p8)
}
  0x4c   : > { %s8175_s6 = sld [smem:[#allocation42_spill]]  ;;  %s6035_s13 = scalar_lea.vmem %s460_s3, 576 }
  0x4d   : > { %p6036_p9 = scmp.ne.s32.totalorder %s460_s3, %s6035_s13  ;;  %p6043_p1 = scmp.lt.s32.totalorder %s460_s3, %s460_s3 }
  0x4e   : > { %p6044_p11 = scmp.lt.s32.totalorder %s6035_s13, %s6035_s13 }
  0x4f   : > { %p6038_p10 = pnand %p6036_p9, %p6341_p7 }
  0x50   : > { %p6045_p12 = por %p6044_p11, %p6043_p1 }
  0x51   : > { %p6039_p4 = pneg %p6038_p10 }
  0x52   : > { %5802 = dma.hbm_to_vmem [thread:$0]  (!%p6330_p6), %s8175_s6, 128, %s428_s28, [#allocation11]  }
  0x53   : > { %p6046_p3 = pnand %p6045_p12, %p6039_p4 }
  0x55   : > { %6049 = shalt.err (!%p6046_p3)
}
  0x56   : > { %s6198_s22 = smov 64   ;;  %s6199_s27 = smov 4  }
  0x57   : > { %s8176_s11 = sld [smem:[#allocation44_spill]]  ;;  %s5416_s24 = sadd.s32 4294967294, %s6188_s16  }
  0x58   : > { %s6395_s25 = sadd.s32 1, %s6188_s16   ;;  %s45_s13 = sadd.s32 1, %s6184_s15 }
  0x59   : > { %s42_s26 = ssub.s32 %s6188_s16, %s6395_s25  ;;  %p52_p3 = scmp.ne.s32.totalorder %s6184_s15, %s6180_s30 }
  0x5a   : > { %p43_p1 = scmp.eq.s32.totalorder %s42_s26, 0  ;;  %p53_p4 = scmp.eq.s32.totalorder %s6188_s16, 0 }
  0x5b   : > { %p58_p7 = scmp.ne.s32.totalorder %s6180_s30, %s6176_s29  ;;  %p8179_p0 = scmp.eq.s32.totalorder %s6316_s19, 0 }
  0x5c   : > { %s6406_s17 = scalar_select %p43_p1, %s6184_s15, %s45_s13  }
  0x5d   : > { %5808 = dma.hbm_to_vmem [thread:$0]  (!%p6330_p6), %s8176_s11, 576, %s460_s3, [#allocation14], %s6198_s22, %s6198_s22, %s6199_s27  }
  0x5e   : > { %8177 = sst [smem:[#allocation26_spill]] %s6406_s17  ;;  %p6408_p13 = por %p53_p4, %p52_p3 }
  0x5f   : > { %p6414_p6 = por %p8179_p0, %p58_p7  ;;  %p339_p2 = scmp.eq.s32.totalorder %s6316_s19, 1 }
  0x60   : > { %p345_p5 = scmp.eq.s32.totalorder %s5416_s24, 1  ;;  %p5826_p8 = scmp.lt.s32.totalorder %s6188_s16, 2 }
  0x61   : > { %s8180_s3 = scalar_select %p6414_p6, 1, 0 }
  0x62   : > { %s476_s22 = sand.u32 1, %s6184_s15   ;;  %p6421_p9 = por %p339_p2, %p52_p3 }
  0x63   : > { %p6425_p10 = por %p345_p5, %p58_p7  ;;  %s5425_s18 = sshll.u32 %s476_s22, 5 }
  0x64   : > { %s8181_s27 = scalar_select %p6421_p9, 1, 0 }
  0x65   : > { %s8182_s28 = scalar_select %p6425_p10, 1, 0 }
  0x66   : > { %s5540_s26 = sshll.u32 %s6188_s16, 9  ;;  %s480_s24 = scalar_lea.vmem [#allocation3], %s5425_s18 }
  0x67   : > { %s6433_s2 = scalar_lea.hbm %s8124_s0, %s5540_s26  ;;  %s487_s4 = sshll.u32 %s480_s24, 4  ;;  %s6435_s4 = int_to_ptr.vmem [resolvable:$true] %s487_s4 }
  0x68   : > { %p6439_p11 = pnand %p5826_p8, %p6408_p13  ;;  %s6443_s7 = scalar_lea.sflag [#allocation4], %s476_s22 }
  0x69   : > { %s6050_s11 = scalar_lea.hbm %s6433_s2, 512  ;;  %s6055_s18 = scalar_lea.hbm %s8124_s0, 1024 }
  0x6a   : > { %p6051_p12 = scmp.ne.s32.totalorder %s6433_s2, %s6050_s11  ;;  %p6052_p1 = pneg %p6439_p11 }
  0x6b   : > { %p6056_p7 = scmp.lt.s32.totalorder %s6433_s2, %s8124_s0  ;;  %p6057_p13 = scmp.lt.s32.totalorder %s6055_s18, %s6050_s11 }
  0x6c   : > { %p6053_p3 = pnand %p6052_p1, %p6051_p12 }
  0x6d   : > { %p6058_p0 = por %p6057_p13, %p6056_p7 }
  0x6e   : > { %p6054_p4 = pneg %p6053_p3 }
  0x70   : > { %p6059_p2 = pnand %p6058_p0, %p6054_p4 }
  0x72   : > { %6062 = shalt.err (!%p6059_p2)
}
  0x73   : > { %s6063_s23 = scalar_lea.vmem %s6435_s4, 512  ;;  %s6200_s22 = smov [#allocation3]  }
  0x74   : > { %p6064_p5 = scmp.ne.s32.totalorder %s6435_s4, %s6063_s23  ;;  %s6068_s17 = sshll.u32 %s6200_s22, 4  ;;  %s6069_s17 = int_to_ptr.vmem [resolvable:$false] %s6068_s17 }
  0x75   : > { %s6070_s21 = scalar_lea.vmem %s6069_s17, 1024  ;;  %p6071_p3 = scmp.lt.s32.totalorder %s6435_s4, %s6069_s17 }
  0x76   : > { %p6066_p8 = pnand %p6064_p5, %p6052_p1  ;;  %p6072_p10 = scmp.lt.s32.totalorder %s6070_s21, %s6063_s23 }
  0x78   : > { %p6067_p12 = pneg %p6066_p8  ;;  %p6073_p9 = por %p6072_p10, %p6071_p3 }
  0x7a   : > { %p6074_p6 = pnand %p6073_p9, %p6067_p12 }
  0x7c   : > { %6077 = shalt.err (!%p6074_p6)
}
  0x7d   : > { %s8184_s11 = smov 8   ;;  %s8185_s26 = smov 128  }
  0x7e   : > { %5812 = dma.hbm_to_vmem [thread:$0]  (!%p6439_p11), %s6433_s2, 512, %s6435_s4, %s6443_s7, %s8185_s26, %s8185_s26, %s8184_s11  }
  0x7f   : > { %p8186_p1 = scmp.ne.s32.totalorder %s8168_s20, 0 }
  0x81   : > { %507 = sbr.rel (%p8186_p1) target bundleno = 2115 (0x843), region = 72 }
  0x86   : > { %s6470_s18 = sand.u32 1, %s6180_s30   ;;  %p8187_p6 = scmp.ne.s32.totalorder %s8180_s3, 0 }
  0x87   : > { %s5429_s17 = sshll.u32 %s6470_s18, 5  ;;  %s510_s13 = scalar_lea.sflag [#allocation4], %s6470_s18 }
  0x88   : > { %s513_s6 = scalar_lea.vmem [#allocation3], %s5429_s17 }
  0x89   : > { %6147 = dma.done.wait (%p8187_p6), %s510_s13, 512  }
  0x8a   : > { %6149 = vsyncadd (%p8187_p6), %s510_s13, 4294966784  ;;  %p8188_p9 = scmp.eq.s32.totalorder %s6316_s19, 0 }
  0x8c   : > { %6151 = dma.done.wait (%p8188_p9), [#allocation6], 64   ;;  %p8189_p10 = pmov %p8188_p9 }
  0x8d   : > { %p8190_p11 = pmov %p8188_p9 }
  0x8e   : > { %6153 = vsyncadd (%p8189_p10), [#allocation6], 4294967232 }
  0x8f   : > { %6155 = dma.done.wait (%p8190_p11), [#allocation7], 16   ;;  %p8191_p4 = pmov %p8188_p9 }
  0x91   : > { %6157 = vsyncadd (%p8191_p4), [#allocation7], 4294967280  ;;  %p8192_p7 = pmov %p8191_p4 }
  0x92   : > { %p8193_p13 = pmov %p8191_p4 }
  0x93   : > { %6159 = dma.done.wait (%p8192_p7), [#allocation11], 1664  }
  0x94   : > { %6161 = vsyncadd (%p8193_p13), [#allocation11], 4294965632  ;;  %p8194_p0 = pmov %p8191_p4 }
  0x96   : > { %6163 = dma.done.wait (%p8194_p0), [#allocation14], 960   ;;  %p8195_p2 = pmov %p8194_p0 }
  0x98   : > { %6165 = vsyncadd (%p8195_p2), [#allocation14], 4294966336 }
  0x99   : > { %542 = sfence }
  0x9a   : > { %v6496_v0 = vld [vmem:[#allocation12] sm:$0xff]  ;;  %v8146_v1 = vmov 0.0   ;;  %vm6202_vm0 = vmmov 0   ;;  %s621_s2 = sld [smem:[#allocation8]]  ;;  %v6507_v3 = vld [vmem:[%s513_s6 + $0x8] sm:$0xff]  ;;  %v6509_v4 = vld [vmem:[%s513_s6 + $0x10] sm:$0xff] }
  0x9b   : > { %5610 = vmatprep.subr.mxu0 %v8146_v1  ;;  %5612 = vmatprep.mubr.msk.f32.mxu0 %vm6202_vm0, %v8146_v1  ;;  %s5443_s4 = sld [smem:[#allocation8 + $0x1]]  ;;  %v6503_v2 = vld [vmem:[%s513_s6] sm:$0xff]  ;;  %v6511_v6 = vld [vmem:[%s513_s6 + $0x18] sm:$0xff]  ;;  %vm719_vm3 = vcmask 64512   ;;  %v598_v62 = vld [vmem:[%s8129_s5] sm:$0xff]  ;;  %p593_p5 = scmp.lt.s32.totalorder %s6316_s19, 1 }
  0x9c   : > { %5611 = vmatpush3.msra.mxu0 %v6496_v0  ;;  %s5444_s7 = sld [smem:[#allocation8 + $0x2]]  ;;  %5617 = vmatprep.mubr.msk.f32.mxu1 %vm719_vm3, %v598_v62  ;;  %vm1411_vm4 = vcmask 146432   ;;  %vm1414_vm5 = vcmask 140288   ;;  %vm1406_vm6 = vcmask 261120   ;;  %vm1465_vm7 = vcmask 138248   ;;  %p8233_p12 = scmp.ne.s32.totalorder %s8181_s27, 0 }
  0x9d   : > { %5623 = vmatprep.subr.mxu0 %v8146_v1  ;;  %s5445_s20 = sld [smem:[#allocation8 + $0x3]]  ;;  %1416 = vst.msk [vmem:[#allocation2 + $0x18] sm:$0xff] %vm1411_vm4, %v8146_v1  ;;  %1417 = vst.msk [vmem:[#allocation2 + $0x20] sm:$0xff] %vm1411_vm4, %v8146_v1  ;;  %vm2868_vm8 = vcmask 130048   ;;  %vm2873_vm9 = vcmask 392192   ;;  %vm2876_vm10 = vcmask 523264  }
  0x9e   : > { %s6505_s3 = sld [smem:[#allocation9]]  ;;  %1412 = vst.msk [vmem:[#allocation2] sm:$0xff] %vm1411_vm4, %v8146_v1  ;;  %1413 = vst.msk [vmem:[#allocation2 + $0x8] sm:$0xff] %vm1411_vm4, %v8146_v1  ;;  %vm2879_vm11 = vcmask 654336   ;;  %vm2882_vm12 = vcmask 785408   ;;  %vm2885_vm13 = vcmask 916480  }
  0x9f   : > { %s5446_s24 = sld [smem:[#allocation8 + $0x80]]  ;;  %1419 = vst.msk [vmem:[#allocation2 + $0x30] sm:$0xff] %vm1411_vm4, %v8146_v1  ;;  %1420 = vst.msk [vmem:[#allocation2 + $0x38] sm:$0xff] %vm1411_vm4, %v8146_v1  ;;  %vm2935_vm14 = vcmask 1040384   ;;  %vm2931_vm15 = vcmask 72704  }
  0xa0   : > { %v622_v5 = vstv %s621_s2  ;;  %s5447_s23 = sld [smem:[#allocation8 + $0x81]]  ;;  %1422 = vst.msk [vmem:[#allocation2 + $0x48] sm:$0xff] %vm1411_vm4, %v8146_v1  ;;  %1423 = vst.msk [vmem:[#allocation2 + $0x50] sm:$0xff] %vm1411_vm4, %v8146_v1 }
  0xa1   : > { %v623_v7 = vmul.f32 %v622_v5, %v6503_v2  ;;  %v625_v8 = vstv %s5443_s4  ;;  %s5448_s22 = sld [smem:[#allocation8 + $0x82]]  ;;  %1418 = vst.msk [vmem:[#allocation2 + $0x28] sm:$0x3] %vm1414_vm5, %v8146_v1  ;;  %1415 = vst.msk [vmem:[#allocation2 + $0x10] sm:$0x3] %vm1414_vm5, %v8146_v1 }
  0xa2   : > { %v626_v9 = vmul.f32 %v6507_v3, %v625_v8  ;;  %v629_v10 = vstv %s5444_s7  ;;  %s5449_s21 = sld [smem:[#allocation8 + $0x83]]  ;;  %1421 = vst.msk [vmem:[#allocation2 + $0x40] sm:$0x3] %vm1414_vm5, %v8146_v1  ;;  %1424 = vst.msk [vmem:[#allocation2 + $0x58] sm:$0x3] %vm1414_vm5, %v8146_v1  ;;  %s6210_s7 = smov 80  }
  0xa3   : > { %v630_v11 = vmul.f32 %v6509_v4, %v629_v10  ;;  %v633_v12 = vstv %s5445_s20  ;;  %s6516_s11 = sld [smem:[#allocation9 + $0x1]]  ;;  %s6705_s20 = scalar_lea.vmem [#allocation17], %s5429_s17 }
  0xa4   : > { %v627_v13 = vadd.f32 %v626_v9, %v623_v7  ;;  %v634_v14 = vmul.f32 %v6511_v6, %v633_v12  ;;  %s5451_s26 = sld [smem:[#allocation8 + $0x100]]  ;;  %v637_v19 = vstv %s6505_s3  ;;  %s6204_s17 = smov 127  }
  0xa5   : > { %v640_v15 = vstv %s5446_s24  ;;  %s5452_s13 = sld [smem:[#allocation8 + $0x101]] }
  0xa6   : > { %v631_v16 = vadd.f32 %v630_v11, %v627_v13  ;;  %v641_v17 = vmul.f32 %v640_v15, %v6503_v2  ;;  %v643_v18 = vstv %s5447_s23  ;;  %s5453_s6 = sld [smem:[#allocation8 + $0x102]] }
  0xa7   : > { %v644_v20 = vmul.f32 %v6507_v3, %v643_v18  ;;  %v647_v21 = vstv %s5448_s22  ;;  %s5454_s2 = sld [smem:[#allocation8 + $0x103]] }
  0xa8   : > { %v635_v22 = vadd.f32 %v634_v14, %v631_v16  ;;  %v648_v23 = vmul.f32 %v6509_v4, %v647_v21  ;;  %v651_v24 = vstv %s5449_s21  ;;  %s5455_s4 = sld [smem:[#allocation9 + $0x2]] }
  0xa9   : > { %v645_v25 = vadd.f32 %v644_v20, %v641_v17  ;;  %v652_v26 = vmul.f32 %v6511_v6, %v651_v24  ;;  %v655_v32 = vstv %s6516_s11  ;;  %s5456_s3 = sld [smem:[#allocation8 + $0x180]]  ;;  %s6203_s11 = smov 1  }
  0xaa   : > { %v638_v27 = vadd.f32 %v637_v19, %v635_v22  ;;  %v658_v28 = vstv %s5451_s26  ;;  %s5457_s24 = sld [smem:[#allocation8 + $0x181]]  ;;  %v6550_v22 = vld [vmem:[%s8129_s5 + $0x8] sm:$0xff]  ;;  %s5543_s26 = sshll.u32 %s6316_s19, 9 }
  0xab   : > { %v649_v29 = vadd.f32 %v648_v23, %v645_v25  ;;  %v659_v30 = vmul.f32 %v658_v28, %v6503_v2  ;;  %v661_v31 = vstv %s5452_s13  ;;  %s5458_s23 = sld [smem:[#allocation8 + $0x182]]  ;;  %v6555_v23 = vld [vmem:[%s8129_s5 + $0x10] sm:$0xff] }
  0xac   : > { %v662_v33 = vmul.f32 %v6507_v3, %v661_v31  ;;  %v665_v34 = vstv %s5453_s6  ;;  %5898 = vtanh.f32 %v638_v27  ;;  %s5459_s22 = sld [smem:[#allocation8 + $0x183]]  ;;  %v1365_v31 = vld [vmem:[#allocation10 + $0x8] sm:$0xff] }
  0xad   : > { %v653_v35 = vadd.f32 %v652_v26, %v649_v29  ;;  %v666_v36 = vmul.f32 %v6509_v4, %v665_v34  ;;  %v669_v37 = vstv %s5454_s2  ;;  %s5460_s21 = sld [smem:[#allocation9 + $0x3]]  ;;  %v6566_v26 = vld [vmem:[%s8129_s5 + $0x18] sm:$0xff]  ;;  %s6208_s2 = smov 16  }
  0xae   : > { %v663_v38 = vadd.f32 %v662_v33, %v659_v30  ;;  %v670_v39 = vmul.f32 %v6511_v6, %v669_v37  ;;  %v673_v42 = vstv %s5455_s4  ;;  %v1370_v33 = vld [vmem:[#allocation10 + $0x28] sm:$0xff]  ;;  %s6209_s4 = smov 32  }
  0xaf   : > { %v656_v40 = vadd.f32 %v655_v32, %v653_v35  ;;  %v676_v63 = vstv %s5456_s3  ;;  %s594_s3 = scalar_select %p593_p5, %s6316_s19, 1 }
  0xb0   : > { %v667_v41 = vadd.f32 %v666_v36, %v663_v38  ;;  %v679_v5 = vstv %s5457_s24  ;;  %v677_v7 = vmul.f32 %v676_v63, %v6503_v2  ;;  %v1369_v36 = vld [vmem:[#allocation10 + $0x20] sm:$0xff] }
  0xb1   : > { %5900 = vtanh.f32 %v656_v40  ;;  %v680_v8 = vmul.f32 %v6507_v3, %v679_v5  ;;  %v683_v9 = vstv %s5458_s23  ;;  %s5541_s24 = sshll.u32 %s594_s3, 6  ;;  %s6205_s3 = smov 126  }
  0xb2   : > { %v671_v43 = vadd.f32 %v670_v39, %v667_v41  ;;  %v684_v11 = vmul.f32 %v6509_v4, %v683_v9  ;;  %v687_v12 = vstv %s5459_s22  ;;  %v1367_v39 = vld [vmem:[#allocation10 + $0x18] sm:$0xff]  ;;  %s6212_s23 = smov 112   ;;  %s6213_s22 = smov 64  }
  0xb3   : > { %v681_v10 = vadd.f32 %v680_v8, %v677_v7  ;;  %v688_v14 = vmul.f32 %v6511_v6, %v687_v12  ;;  %v691_v16 = vstv %s5460_s21  ;;  %s597_s21 = scalar_lea.vmem %s8125_s1, %s5541_s24  ;;  %s6211_s24 = smov 48  }
  0xb4   : > { %v674_v44 = vadd.f32 %v673_v42, %v671_v43  ;;  %v1372_v42 = vld [vmem:[#allocation10 + $0x38] sm:$0xff]  ;;  %v1426_v63 = vld [vmem:[%s597_s21 + $0x8] sm:$0xff]  ;;  %v1429_v7 = vld [vmem:[%s597_s21 + $0x20] sm:$0xff] }
  0xb5   : > { %v685_v13 = vadd.f32 %v684_v11, %v681_v10  ;;  %v1430_v5 = vld [vmem:[%s597_s21 + $0x28] sm:$0xff]  ;;  %v1432_v8 = vld [vmem:[%s597_s21 + $0x38] sm:$0xff]  ;;  %v1431_v9 = vld [vmem:[%s597_s21 + $0x30] sm:$0xff] }
  0xb6   : > { %5902 = vtanh.f32 %v674_v44 }
  0xb7   : > { %v689_v15 = vadd.f32 %v688_v14, %v685_v13 }
  0xb9   : > { %v5899_v45 = vpop.eup %5898  ;;  %v692_v17 = vadd.f32 %v691_v16, %v689_v15 }
  0xba   : > { %v696_v47 = vmul.f32 %v5899_v45, %v5899_v45 }
  0xbb   : > { %v5461_v18 = vmul.f32 -1.442695, %v692_v17 }
  0xbe   : > { %v5901_v46 = vpop.eup %5900 }
  0xbf   : > { %v697_v48 = vmul.f32 %v5901_v46, %v5901_v46 }
  0xc1   : > { %v698_v49 = vadd.f32 %v697_v48, %v696_v47 }
  0xc3   : > { %v6529_v50 = vpop.eup %5902 }
  0xc4   : > { %v699_v51 = vmul.f32 %v6529_v50, %v6529_v50 }
  0xc6   : > { %v700_v52 = vadd.f32 %v699_v51, %v698_v49  ;;  %v1371_v49 = vld [vmem:[#allocation10 + $0x30] sm:$0xff] }
  0xc8   : > { %5904 = vrsqrt.f32 %v700_v52  ;;  %vm703_vm1 = vcmp.eq.f32.partialorder %v700_v52, inf  ;;  %v706_v54 = vand.u32 2147483648, %v700_v52  ;;  %vm705_vm2 = vcmp.eq.f32.partialorder %v700_v52, 0.0 }
  0xd5   : > { %v5905_v53 = vpop.eup %5904 }
  0xd6   : > { %v702_v55 = vmul.f32 %v5905_v53, %v700_v52 }
  0xd8   : > { %v704_v56 = vsel %vm703_vm1, %v700_v52, %v702_v55  ;;  %v6592_v52 = vld [vmem:[%s8134_s10] sm:$0xff] }
  0xd9   : > { %v707_v57 = vsel %vm705_vm2, %v706_v54, %v704_v56 }
  0xda   : > { %v708_v58 = vmax.f32 %v707_v57, 1e-12 }
  0xdc   : > { %5906 = vrcp.f32 %v708_v58 }
  0xdd   : > { %5908 = vpow2.f32 %v5461_v18 }
  0xe9   : > { %v5907_v59 = vpop.eup %5906 }
  0xea   : > { %v710_v60 = vmul.f32 %v5907_v59, %v5899_v45  ;;  %v711_v61 = vmul.f32 %v5907_v59, %v5901_v46  ;;  %v5909_v19 = vpop.eup %5908  ;;  %v712_v28 = vmul.f32 %v5907_v59, %v6529_v50  ;;  %v1366_v46 = vld [vmem:[#allocation10 + $0x10] sm:$0xff] }
  0xeb   : > { %v716_v20 = vadd.f32 1.0, %v5909_v19 }
  0xec   : > { %5613 = vmatmul.mubr.msk.f32.vlgmr.msra.gmra.mxu0 %vm719_vm3, %v710_v60 }
  0xed   : > { %5624 = vmatpush3.msra.mxu0 %v6496_v0  ;;  %5625 = vmatprep.mubr.msk.f32.mxu0 %vm6202_vm0, %v8146_v1  ;;  %5910 = vrcp.f32 %v716_v20  ;;  %v6668_v20 = vld [vmem:[%s8133_s9] sm:$0xff] }
  0xf0   : > { %5626 = vmatmul.mubr.msk.f32.vlgmr.msra.gmra.mxu0 %vm719_vm3, %v711_v61 }
  0xf1   : > { %5630 = vmatprep.mubr.msk.f32.mxu0 %vm719_vm3, %v598_v62 }
  0xfa   : > { %v5911_v29 = vpop.eup %5910 }
 0x1ac   : > { %v789_v21 = vpop.f32.mrf.mxu0 }
 0x1ad   : > { %5615 = vmatprep.subr.mxu1 %v789_v21 }
 0x1ae   : > { %v5614_v24 = vpop.f32.mrf.mxu0  ;;  %5616 = vmatpush3.msra.mxu1 %v789_v21 }
 0x1af   : > { %5618 = vmatmul.mubr.msk.f32.vlgmr.msra.gmra.mxu1 %vm719_vm3, %v6550_v22  ;;  %5636 = vmatprep.subr.mxu1 %v8146_v1 }
 0x1b0   : > { %v959_v25 = vpop.f32.mrf.mxu0  ;;  %5620 = vmatprep.mubr.msk.f32.mxu1 %vm719_vm3, %v6555_v23  ;;  %5637 = vmatpush3.msra.mxu1 %v6496_v0 }
 0x1b1   : > { %5628 = vmatprep.subr.mxu0 %v959_v25 }
 0x1b2   : > { %5629 = vmatpush3.msra.mxu0 %v959_v25  ;;  %v5627_v27 = vpop.f32.mrf.mxu0 }
 0x1b3   : > { %5621 = vmatmul.mubr.msk.f32.gmra.mxu1 %vm719_vm3, %v6566_v26  ;;  %5631 = vmatmul.mubr.msk.f32.vlgmr.msra.gmra.mxu0 %vm719_vm3, %v6550_v22  ;;  %v1374_v27 = vld [vmem:[#allocation10 + $0x40] sm:$0xff] }
 0x1b4   : > { %5633 = vmatprep.mubr.msk.f32.mxu0 %vm719_vm3, %v6555_v23  ;;  %5638 = vmatprep.mubr.msk.f32.mxu1 %vm6202_vm0, %v8146_v1 }
 0x1b5   : > { %5649 = vmatprep.subr.mxu0 %v8146_v1 }
 0x1b6   : > { %5650 = vmatpush3.msra.mxu0 %v6496_v0  ;;  %v1364_v0 = vld [vmem:[#allocation10] sm:$0xff] }
 0x1b7   : > { %5634 = vmatmul.mubr.msk.f32.gmra.mxu0 %vm719_vm3, %v6566_v26  ;;  %5639 = vmatmul.mubr.msk.f32.vlgmr.msra.gmra.mxu1 %vm719_vm3, %v712_v28 }
 0x1b8   : > { %5651 = vmatprep.mubr.msk.f32.mxu0 %vm6202_vm0, %v8146_v1  ;;  %5643 = vmatprep.mubr.msk.f32.mxu1 %vm719_vm3, %v598_v62 }
 0x1bb   : > { %5652 = vmatmul.mubr.msk.f32.vlgmr.msra.gmra.mxu0 %vm719_vm3, %v5911_v29 }
 0x1bc   : > { %5656 = vmatprep.mubr.msk.f32.mxu0 %vm719_vm3, %v598_v62  ;;  %v1428_v62 = vld [vmem:[%s597_s21 + $0x18] sm:$0xff] }
 0x26f   : > { %v5619_v30 = vpop.f32.mrf.mxu1 }
 0x270   : > { %v1379_v37 = vmul.f32 %v5619_v30, %v1365_v31  ;;  %v1377_v30 = vld [vmem:[#allocation10 + $0x58] sm:$0xff] }
 0x271   : > { %v871_v32 = vpop.f32.mrf.mxu1 }
 0x272   : > { %v1378_v43 = vmul.f32 %v1364_v0, %v871_v32 }
 0x273   : > { %v5622_v34 = vpop.f32.mrf.mxu1  ;;  %v5632_v35 = vpop.f32.mrf.mxu0 }
 0x274   : > { %v1383_v38 = vmul.f32 %v5632_v35, %v1370_v33  ;;  %v1381_v50 = vmul.f32 %v5622_v34, %v1367_v39  ;;  %v6693_v33 = vld [vmem:[%s8133_s9 + $0x10] sm:$0x3]  ;;  %v1376_v34 = vld [vmem:[#allocation10 + $0x50] sm:$0xff] }
 0x275   : > { %v881_v40 = vpop.f32.mrf.mxu1  ;;  %v1029_v41 = vpop.f32.mrf.mxu0 }
 0x276   : > { %v1382_v44 = vmul.f32 %v1369_v36, %v1029_v41  ;;  %v6587_v45 = vadd.f32 %v1383_v38, %v1379_v37  ;;  %v1380_v56 = vmul.f32 %v1366_v46, %v881_v40 }
 0x277   : > { %v5635_v47 = vpop.f32.mrf.mxu0  ;;  %v1117_v48 = vpop.f32.mrf.mxu1 }
 0x278   : > { %v1385_v51 = vmul.f32 %v5635_v47, %v1372_v42  ;;  %5641 = vmatprep.subr.mxu1 %v1117_v48  ;;  %v6594_v53 = vadd.f32 %v1382_v44, %v1378_v43 }
 0x279   : > { %v1039_v54 = vpop.f32.mrf.mxu0  ;;  %v5640_v55 = vpop.f32.mrf.mxu1  ;;  %5642 = vmatpush3.msra.mxu1 %v1117_v48 }
 0x27a   : > { %v1384_v57 = vmul.f32 %v1371_v49, %v1039_v54  ;;  %5644 = vmatmul.mubr.msk.f32.vlgmr.msra.gmra.mxu1 %vm719_vm3, %v6550_v22  ;;  %5662 = vmatprep.subr.mxu1 %v8146_v1  ;;  %v6599_v58 = vadd.f32 %v1385_v51, %v1381_v50 }
 0x27b   : > { %v1275_v59 = vpop.f32.mrf.mxu0  ;;  %5646 = vmatprep.mubr.msk.f32.mxu1 %vm719_vm3, %v6555_v23  ;;  %5663 = vmatpush3.msra.mxu1 %v6592_v52 }
 0x27c   : > { %5654 = vmatprep.subr.mxu0 %v1275_v59  ;;  %v6604_v60 = vadd.f32 %v1384_v57, %v1380_v56  ;;  %5667 = vmatprep.subr.mxu1 %v8146_v1 }
 0x27d   : > { %5655 = vmatpush3.msra.mxu0 %v1275_v59  ;;  %v5653_v61 = vpop.f32.mrf.mxu0 }
 0x27e   : > { %5647 = vmatmul.mubr.msk.f32.gmra.mxu1 %vm719_vm3, %v6566_v26  ;;  %5657 = vmatmul.mubr.msk.f32.vlgmr.msra.gmra.mxu0 %vm719_vm3, %v6550_v22 }
 0x27f   : > { %5659 = vmatprep.mubr.msk.f32.mxu0 %vm719_vm3, %v6555_v23  ;;  %5664 = vmatprep.mubr.msk.f32.mxu1 %vm6202_vm0, %v8146_v1  ;;  %v1375_v23 = vld [vmem:[#allocation10 + $0x48] sm:$0xff] }
 0x280   : > { %5678 = vmatprep.subr.mxu0 %v8146_v1 }
 0x281   : > { %5679 = vmatpush3.msra.mxu0 %v6592_v52 }
 0x282   : > { %5660 = vmatmul.mubr.msk.f32.gmra.mxu0 %vm719_vm3, %v6566_v26  ;;  %5665 = vmatmul.mubr.msk.f32.vlgmr.msra.gmra.mxu1 %vm719_vm3, %v6503_v2  ;;  %v1427_v2 = vld [vmem:[%s597_s21 + $0x10] sm:$0xff]  ;;  %v6679_v26 = vld [vmem:[%s8133_s9 + $0x8] sm:$0xff] }
 0x283   : > { %5680 = vmatprep.mubr.msk.f32.mxu0 %vm6202_vm0, %v8146_v1  ;;  %5669 = vmatprep.mubr.msk.f32.mxu1 %vm6202_vm0, %v8146_v1 }
 0x284   : > { %5683 = vmatprep.subr.mxu0 %v8146_v1  ;;  %1445 = vrot.lane.b32.xlu1 %v1427_v2, %s6203_s11 }
 0x286   : > { %5681 = vmatmul.mubr.msk.f32.vlgmr.msra.gmra.mxu0 %vm719_vm3, %v6507_v3  ;;  %v1425_v3 = vld [vmem:[%s597_s21] sm:$0xff]  ;;  %s6214_s21 = smov 96  }
 0x287   : > { %5685 = vmatprep.mubr.msk.f32.mxu0 %vm6202_vm0, %v8146_v1  ;;  %1441 = vrot.lane.b32.xlu0 %v1425_v3, %s6203_s11 }
 0x288   : > { %1447 = vrot.lane.b32.xlu1 %v1428_v62, %s6203_s11 }
 0x28b   : > { %1443 = vrot.lane.b32.xlu0 %v1426_v63, %s6203_s11 }
 0x28c   : > { %1451 = vrot.lane.b32.xlu1 %v1430_v5, %s6203_s11 }
 0x28f   : > { %1449 = vrot.lane.b32.xlu0 %v1429_v7, %s6203_s11 }
 0x290   : > { %1455 = vrot.lane.b32.xlu1 %v1432_v8, %s6203_s11 }
 0x293   : > { %1453 = vrot.lane.b32.xlu0 %v1431_v9, %s6203_s11  ;;  %s5237_s11 = sshll.u32 %s6705_s20, 4  ;;  %s8058_s11 = int_to_ptr.vmem [resolvable:$true] %s5237_s11 }
 0x2f6   : > { %v1446_v40 = vpop.permute.xlu1 %1445 }
 0x2f7   : > { %1468 = vst.msk [vmem:[#allocation2 + $0x19] sm:$0xff] %vm1465_vm7, %v1446_v40  ;;  %v2324_v40 = vlaneseq }
 0x2f9   : > { %v1442_v41 = vpop.permute.xlu0 %1441 }
 0x2fa   : > { %1466 = vst.msk [vmem:[#allocation2 + $0x1] sm:$0xff] %vm1465_vm7, %v1442_v41  ;;  %v1448_v46 = vpop.permute.xlu1 %1447 }
 0x2fb   : > { %1469 = vst.msk [vmem:[#allocation2 + $0x21] sm:$0xff] %vm1465_vm7, %v1448_v46 }
 0x2fd   : > { %v1444_v47 = vpop.permute.xlu0 %1443 }
 0x2fe   : > { %1467 = vst.msk [vmem:[#allocation2 + $0x9] sm:$0xff] %vm1465_vm7, %v1444_v47  ;;  %v6772_v56 = vld [vmem:[#allocation2 + $0x18] sm:$0xff] }
 0x301   : > { %v1450_v48 = vpop.permute.xlu0 %1449 }
 0x302   : > { %1470 = vst.msk [vmem:[#allocation2 + $0x31] sm:$0xff] %vm1465_vm7, %v1450_v48  ;;  %v4195_v2 = vld [vmem:[#allocation2 + $0x28] sm:$0x3]  ;;  %v6207_v48 = vmov 1934713408  }
 0x305   : > { %v1454_v50 = vpop.permute.xlu0 %1453  ;;  %v6748_v51 = vld [vmem:[#allocation2 + $0x8] sm:$0xff]  ;;  %v3191_v57 = vld [vmem:[#allocation2 + $0x10] sm:$0x3] }
 0x306   : > { %1472 = vst.msk [vmem:[#allocation2 + $0x49] sm:$0xff] %vm1465_vm7, %v1454_v50  ;;  %3245 = vrot.lane.b32.xlu0 %v6748_v51, %s6204_s17  ;;  %v4192_v62 = vld [vmem:[#allocation2 + $0x10] sm:$0x3] }
 0x309   : > { %v6770_v55 = vld [vmem:[#allocation2 + $0x30] sm:$0xff] }
 0x33a   : > { %v5645_v10 = vpop.f32.mrf.mxu1 }
 0x33b   : > { %v1391_v11 = vadd.f32 %v5645_v10, %v6587_v45 }
 0x33c   : > { %v1187_v12 = vpop.f32.mrf.mxu1 }
 0x33d   : > { %5912 = vrcp.f32 %v1391_v11  ;;  %v1390_v13 = vadd.f32 %v6594_v53, %v1187_v12  ;;  %v6762_v53 = vld [vmem:[#allocation2] sm:$0xff] }
 0x33e   : > { %v5648_v14 = vpop.f32.mrf.mxu1  ;;  %v5658_v15 = vpop.f32.mrf.mxu0 }
 0x33f   : > { %5914 = vrcp.f32 %v1390_v13  ;;  %v1393_v16 = vadd.f32 %v5648_v14, %v6599_v58  ;;  %v1395_v29 = vmul.f32 %v5658_v15, %v1375_v23  ;;  %v6778_v58 = vld [vmem:[#allocation2 + $0x48] sm:$0xff] }
 0x340   : > { %v1197_v17 = vpop.f32.mrf.mxu1  ;;  %v1345_v18 = vpop.f32.mrf.mxu0 }
 0x341   : > { %5916 = vrcp.f32 %v1393_v16  ;;  %v1392_v19 = vadd.f32 %v6604_v60, %v1197_v17  ;;  %v1394_v32 = vmul.f32 %v1374_v27, %v1345_v18  ;;  %v3194_v60 = vld [vmem:[#allocation2 + $0x28] sm:$0x3] }
 0x342   : > { %v5661_v21 = vpop.f32.mrf.mxu0  ;;  %v1543_v22 = vpop.f32.mrf.mxu1 }
 0x343   : > { %5918 = vrcp.f32 %v1392_v19  ;;  %5668 = vmatpush3.msra.mxu1 %v1543_v22  ;;  %v1397_v36 = vmul.f32 %v5661_v21, %v1377_v30 }
 0x344   : > { %v1355_v24 = vpop.f32.mrf.mxu0  ;;  %v5666_v25 = vpop.f32.mrf.mxu1  ;;  %5670 = vmatmul.mubr.msk.f32.vlgmr.msra.gmra.mxu1 %vm719_vm3, %v6668_v20  ;;  %5694 = vmatprep.subr.mxu1 %v8146_v1 }
 0x345   : > { %5672 = vmatprep.mubr.msk.f32.mxu1 %vm6202_vm0, %v8146_v1  ;;  %5695 = vmatpush3.msra.mxu1 %v6592_v52  ;;  %v1396_v39 = vmul.f32 %v1376_v34, %v1355_v24  ;;  %v607_v34 = vld [vmem:[%s8132_s8 + $0x8] sm:$0xff] }
 0x346   : > { %v1709_v28 = vpop.f32.mrf.mxu0  ;;  %5699 = vmatprep.subr.mxu1 %v8146_v1 }
 0x347   : > { %5684 = vmatpush3.msra.mxu0 %v1709_v28 }
 0x348   : > { %5673 = vmatmul.mubr.msk.f32.gmra.mxu1 %vm719_vm3, %v6679_v26  ;;  %5686 = vmatmul.mubr.msk.f32.vlgmr.msra.gmra.mxu0 %vm719_vm3, %v6668_v20  ;;  %v5682_v31 = vpop.f32.mrf.mxu0 }
 0x349   : > { %5675 = vmatprep.mubr.msk.f32.mxu1 %vm6202_vm0, %v8146_v1  ;;  %5688 = vmatprep.mubr.msk.f32.mxu0 %vm6202_vm0, %v8146_v1  ;;  %v605_v31 = vld [vmem:[#allocation13 + $0x10] sm:$0x3] }
 0x34a   : > { %v5913_v0 = vpop.eup %5912  ;;  %5710 = vmatprep.subr.mxu0 %v8146_v1 }
 0x34b   : > { %v6696_v35 = vmul.f32 %v5913_v0, %v1395_v29  ;;  %5711 = vmatpush3.msra.mxu0 %v6592_v52  ;;  %v6750_v52 = vld [vmem:[#allocation2 + $0x20] sm:$0xff]  ;;  %v608_v0 = vld [vmem:[%s8132_s8 + $0x10] sm:$0xff] }
 0x34c   : > { %v5915_v37 = vpop.eup %5914  ;;  %5676 = vmatmul.mubr.msk.f32.gmra.mxu1 %vm719_vm3, %v6693_v33  ;;  %5689 = vmatmul.mubr.msk.f32.gmra.mxu0 %vm719_vm3, %v6679_v26 }
 0x34d   : > { %1408 = vst.msk [vmem:[%s6705_s20 + $0x8] sm:$0xff] %vm1406_vm6, %v6696_v35  ;;  %v6710_v38 = vmul.f32 %v5915_v37, %v1394_v32  ;;  %5691 = vmatprep.mubr.msk.f32.mxu0 %vm6202_vm0, %v8146_v1  ;;  %5696 = vmatprep.mubr.msk.f32.mxu1 %vm6202_vm0, %v8146_v1 }
 0x34e   : > { %v5917_v42 = vpop.eup %5916  ;;  %5715 = vmatprep.subr.mxu0 %v8146_v1  ;;  %3251 = vrot.lane.b32.xlu1 %v6750_v52, %s6204_s17 }
 0x34f   : > { %1407 = vst.msk [vmem:[%s6705_s20] sm:$0xff] %vm1406_vm6, %v6710_v38  ;;  %v6722_v43 = vmul.f32 %v5917_v42, %v1397_v36 }
 0x350   : > { %v5919_v44 = vpop.eup %5918  ;;  %5692 = vmatmul.mubr.msk.f32.gmra.mxu0 %vm719_vm3, %v6693_v33  ;;  %5697 = vmatmul.mubr.msk.f32.vlgmr.msra.gmra.mxu1 %vm719_vm3, %v6509_v4  ;;  %v1452_v4 = vpop.permute.xlu1 %1451 }
 0x351   : > { %1410 = vst.msk [vmem:[%s6705_s20 + $0x18] sm:$0xff] %vm1406_vm6, %v6722_v43  ;;  %v6731_v45 = vmul.f32 %v5919_v44, %v1396_v39  ;;  %5712 = vmatprep.mubr.msk.f32.mxu0 %vm6202_vm0, %v8146_v1  ;;  %5701 = vmatprep.mubr.msk.f32.mxu1 %vm6202_vm0, %v8146_v1 }
 0x352   : > { %1471 = vst.msk [vmem:[#allocation2 + $0x39] sm:$0xff] %vm1465_vm7, %v1452_v4 }
 0x353   : > { %1409 = vst.msk [vmem:[%s6705_s20 + $0x10] sm:$0xff] %vm1406_vm6, %v6731_v45 }
 0x354   : > { %5713 = vmatmul.mubr.msk.f32.vlgmr.msra.gmra.mxu0 %vm719_vm3, %v6511_v6  ;;  %v1456_v49 = vpop.permute.xlu1 %1455 }
 0x355   : > { %5717 = vmatprep.mubr.msk.f32.mxu0 %vm6202_vm0, %v8146_v1  ;;  %1473 = vst.msk [vmem:[#allocation2 + $0x51] sm:$0xff] %vm1465_vm7, %v1456_v49  ;;  %v2386_v49 = vunpack.c.l.s4 %v6207_v48 }
 0x359   : > { %v6758_v6 = vld [vmem:[#allocation2 + $0x38] sm:$0xff]  ;;  %v3197_v59 = vld [vmem:[#allocation2 + $0x40] sm:$0x3] }
 0x35a   : > { %3257 = vrot.lane.b32.xlu0 %v6758_v6, %s6204_s17  ;;  %v4198_v63 = vld [vmem:[#allocation2 + $0x40] sm:$0x3] }
 0x35c   : > { %v6764_v54 = vld [vmem:[#allocation2 + $0x50] sm:$0xff]  ;;  %v3200_v61 = vld [vmem:[#allocation2 + $0x58] sm:$0x3] }
 0x35d   : > { %3263 = vrot.lane.b32.xlu1 %v6764_v54, %s6204_s17  ;;  %v4201_v3 = vld [vmem:[#allocation2 + $0x58] sm:$0x3] }
 0x35e   : > { %3243 = vrot.lane.b32.xlu0 %v6762_v53, %s6204_s17 }
 0x361   : > { %3249 = vrot.lane.b32.xlu1 %v6772_v56, %s6204_s17 }
 0x362   : > { %3255 = vrot.lane.b32.xlu0 %v6770_v55, %s6204_s17 }
 0x365   : > { %3261 = vrot.lane.b32.xlu1 %v6778_v58, %s6204_s17 }
 0x366   : > { %3247 = vrot.lane.b32.xlu0 %v3191_v57, %s6204_s17 }
 0x369   : > { %3253 = vrot.lane.b32.xlu1 %v3194_v60, %s6204_s17  ;;  %v2319_v60 = vcombine.low %v6762_v53, %v6770_v55 }
 0x36a   : > { %3259 = vrot.lane.b32.xlu0 %v3197_v59, %s6204_s17 }
 0x36d   : > { %3265 = vrot.lane.b32.xlu1 %v3200_v61, %s6204_s17  ;;  %v2335_v61 = vcombine.low %v6772_v56, %v6778_v58 }
 0x36e   : > { %4246 = vrot.lane.b32.xlu0 %v6748_v51, %s6205_s3 }
 0x371   : > { %4252 = vrot.lane.b32.xlu1 %v6750_v52, %s6205_s3 }
 0x372   : > { %4258 = vrot.lane.b32.xlu0 %v6758_v6, %s6205_s3 }
 0x375   : > { %4264 = vrot.lane.b32.xlu1 %v6764_v54, %s6205_s3 }
 0x376   : > { %4244 = vrot.lane.b32.xlu0 %v6762_v53, %s6205_s3 }
 0x379   : > { %4250 = vrot.lane.b32.xlu1 %v6772_v56, %s6205_s3 }
 0x37a   : > { %4256 = vrot.lane.b32.xlu0 %v6770_v55, %s6205_s3 }
 0x37d   : > { %4262 = vrot.lane.b32.xlu1 %v6778_v58, %s6205_s3 }
 0x37e   : > { %4254 = vrot.lane.b32.xlu0 %v4195_v2, %s6205_s3 }
 0x381   : > { %4248 = vrot.lane.b32.xlu1 %v4192_v62, %s6205_s3 }
 0x382   : > { %4266 = vrot.lane.b32.xlu0 %v4201_v3, %s6205_s3 }
 0x385   : > { %4260 = vrot.lane.b32.xlu1 %v4198_v63, %s6205_s3 }
 0x404   : > { %v1622_v5 = vpop.f32.mrf.mxu1 }
 0x405   : > { %1637 = vst.msk [vmem:[#allocation2 + $0x60] sm:$0xff] %vm1411_vm4, %v1622_v5  ;;  %v2387_v5 = vunpack.c.0.s8 %v2386_v49 }
 0x406   : > { %v5671_v7 = vpop.f32.mrf.mxu1 }
 0x408   : > { %v1627_v8 = vpop.f32.mrf.mxu1  ;;  %v1779_v9 = vpop.f32.mrf.mxu0 }
 0x409   : > { %1638 = vst.msk [vmem:[#allocation2 + $0x68] sm:$0xff] %vm1411_vm4, %v1627_v8  ;;  %1794 = vst.msk [vmem:[#allocation2 + $0x78] sm:$0xff] %vm1411_vm4, %v1779_v9 }
 0x40a   : > { %v5674_v10 = vpop.f32.mrf.mxu1  ;;  %v5687_v11 = vpop.f32.mrf.mxu0 }
 0x40c   : > { %v1632_v12 = vpop.f32.mrf.mxu1  ;;  %v1784_v13 = vpop.f32.mrf.mxu0  ;;  %v6809_v14 = vld [vmem:[#allocation2 + $0x60] sm:$0xff] }
 0x40d   : > { %1639 = vst.msk [vmem:[#allocation2 + $0x70] sm:$0x3] %vm1414_vm5, %v1632_v12  ;;  %3267 = vrot.lane.b32.xlu0 %v6809_v14, %s6204_s17 }
 0x40e   : > { %1795 = vst.msk [vmem:[#allocation2 + $0x80] sm:$0xff] %vm1411_vm4, %v1784_v13  ;;  %v5677_v15 = vpop.f32.mrf.mxu1  ;;  %v5690_v16 = vpop.f32.mrf.mxu0  ;;  %v2504_v13 = vcombine.low %v6748_v51, %v6758_v6 }
 0x40f   : > { %v2520_v15 = vcombine.low %v6750_v52, %v6764_v54 }
 0x410   : > { %v1789_v17 = vpop.f32.mrf.mxu0  ;;  %v1866_v18 = vpop.f32.mrf.mxu1  ;;  %v6815_v19 = vld [vmem:[#allocation2 + $0x78] sm:$0xff]  ;;  %v6829_v24 = vld [vmem:[#allocation2 + $0x68] sm:$0xff] }
 0x411   : > { %1796 = vst.msk [vmem:[#allocation2 + $0x88] sm:$0x3] %vm1414_vm5, %v1789_v17  ;;  %5700 = vmatpush3.msra.mxu1 %v1866_v18  ;;  %4268 = vrot.lane.b32.xlu0 %v6809_v14, %s6205_s3  ;;  %v5894_v18 = vld [vmem:[#allocation2 + $0x10] ss:$48 sps:$4 sm:$0x33]  }
 0x412   : > { %3273 = vrot.lane.b32.xlu1 %v6815_v19, %s6204_s17  ;;  %v5693_v21 = vpop.f32.mrf.mxu0  ;;  %v5698_v22 = vpop.f32.mrf.mxu1  ;;  %5702 = vmatmul.mubr.msk.f32.vlgmr.msra.gmra.mxu1 %vm719_vm3, %v6668_v20 }
 0x413   : > { %5726 = vmatprep.subr.mxu1 %v8146_v1  ;;  %5704 = vmatprep.mubr.msk.f32.mxu1 %vm6202_vm0, %v8146_v1 }
 0x414   : > { %5727 = vmatpush3.msra.mxu1 %v6722_v43  ;;  %v2023_v23 = vpop.f32.mrf.mxu0  ;;  %v3203_v28 = vld [vmem:[#allocation2 + $0x70] sm:$0x3] }
 0x415   : > { %5728 = vmatprep.subr.mxu1 %v8146_v1  ;;  %5716 = vmatpush3.msra.mxu0 %v2023_v23  ;;  %v6844_v27 = vld [vmem:[#allocation2 + $0x80] sm:$0xff]  ;;  %v4204_v30 = vld [vmem:[#allocation2 + $0x70] sm:$0x3]  ;;  %v5895_v23 = vld [vmem:[#allocation2 + $0x28] ss:$48 sps:$4 sm:$0x33]  }
 0x416   : > { %5729 = vmatpush3.msra.mxu1 %v6731_v45  ;;  %3269 = vrot.lane.b32.xlu0 %v6829_v24, %s6204_s17  ;;  %v5714_v25 = vpop.f32.mrf.mxu0  ;;  %v2325_v45 = vshrl.u32 %v2324_v40, 7 }
 0x417   : > { %4274 = vrot.lane.b32.xlu1 %v6815_v19, %s6205_s3  ;;  %5705 = vmatmul.mubr.msk.f32.gmra.mxu1 %vm719_vm3, %v6679_v26  ;;  %v6941_v25 = vpop.permute.xlu0 %3245 }
 0x418   : > { %5718 = vmatmul.mubr.msk.f32.vlgmr.msra.gmra.mxu0 %vm719_vm3, %v6668_v20  ;;  %5730 = vmatprep.subr.mxu1 %v8146_v1  ;;  %v603_v20 = vld [vmem:[#allocation13] sm:$0xff]  ;;  %v4207_v29 = vld [vmem:[#allocation2 + $0x88] sm:$0x3] }
 0x419   : > { %5731 = vmatpush3.msra.mxu1 %v6696_v35  ;;  %5707 = vmatprep.mubr.msk.f32.mxu1 %vm6202_vm0, %v8146_v1  ;;  %v3206_v32 = vld [vmem:[#allocation2 + $0x88] sm:$0x3]  ;;  %v606_v35 = vld [vmem:[%s8132_s8] sm:$0xff] }
 0x41a   : > { %5732 = vmatprep.subr.mxu1 %v8146_v1  ;;  %5720 = vmatprep.mubr.msk.f32.mxu0 %vm6202_vm0, %v8146_v1 }
 0x41b   : > { %5733 = vmatpush3.msra.mxu1 %v6710_v38  ;;  %4270 = vrot.lane.b32.xlu0 %v6829_v24, %s6205_s3  ;;  %v6206_v38 = vmov 1983009808  }
 0x41c   : > { %3275 = vrot.lane.b32.xlu1 %v6844_v27, %s6204_s17  ;;  %5708 = vmatmul.mubr.msk.f32.gmra.mxu1 %vm719_vm3, %v6693_v33  ;;  %v2322_v39 = vunpack.c.l.s4 %v6206_v38 }
 0x41d   : > { %5721 = vmatmul.mubr.msk.f32.gmra.mxu0 %vm719_vm3, %v6679_v26  ;;  %5734 = vmatprep.mubr.msk.f32.mxu1 %vm6202_vm0, %v8146_v1  ;;  %v604_v26 = vld [vmem:[#allocation13 + $0x8] sm:$0xff] }
 0x41e   : > { %5723 = vmatprep.mubr.msk.f32.mxu0 %vm6202_vm0, %v8146_v1  ;;  %5743 = vmatprep.subr.mxu0 %v8146_v1  ;;  %v2323_v44 = vunpack.c.0.s8 %v2322_v39 }
 0x41f   : > { %3271 = vrot.lane.b32.xlu0 %v3203_v28, %s6204_s17 }
 0x420   : > { %4276 = vrot.lane.b32.xlu1 %v6844_v27, %s6205_s3  ;;  %5735 = vmatmul.mubr.msk.f32.vlgmr.msra.gmra.mxu1 %vm1406_vm6, %v603_v20  ;;  %v6904_v57 = vsub.s32 %v2323_v44, %v2325_v45  ;;  %v6943_v20 = vsub.s32 %v2387_v5, %v2325_v45 }
 0x421   : > { %5724 = vmatmul.mubr.msk.f32.gmra.mxu0 %vm719_vm3, %v6693_v33  ;;  %5737 = vmatprep.mubr.msk.f32.mxu1 %vm6202_vm0, %v8146_v1  ;;  %v609_v33 = vld [vmem:[%s8132_s8 + $0x18] sm:$0xff] }
 0x422   : > { %5751 = vmatprep.mubr.msk.f32.mxu0 %vm6202_vm0, %v8146_v1  ;;  %5744 = vmatpush3.msra.mxu0 %v609_v33  ;;  %v6924_v11 = vrot.slane %v2319_v60, %v6904_v57  ;;  %v6927_v12 = vrot.slane %v2335_v61, %v6904_v57  ;;  %v6961_v33 = vrot.slane %v2520_v15, %v6904_v57 }
 0x423   : > { %4278 = vrot.lane.b32.xlu0 %v4207_v29, %s6205_s3  ;;  %5745 = vmatprep.subr.mxu0 %v8146_v1  ;;  %v2696_v39 = vrot.slane %v5894_v18, %v6904_v57  ;;  %v2704_v40 = vrot.slane %v5895_v23, %v6904_v57 }
 0x424   : > { %4272 = vrot.lane.b32.xlu1 %v4204_v30, %s6205_s3  ;;  %5738 = vmatmul.mubr.msk.f32.gmra.mxu1 %vm1406_vm6, %v604_v26 }
 0x425   : > { %5740 = vmatprep.mubr.msk.f32.mxu1 %vm6202_vm0, %v8146_v1  ;;  %5746 = vmatpush3.msra.mxu0 %v608_v0 }
 0x426   : > { %5747 = vmatprep.subr.mxu0 %v8146_v1 }
 0x427   : > { %5748 = vmatpush3.msra.mxu0 %v607_v34  ;;  %v2320_v34 = vcombine.high %v6762_v53, %v6770_v55  ;;  %v2336_v53 = vcombine.high %v6772_v56, %v6778_v58  ;;  %v6996_v56 = vpop.permute.xlu0 %3257 }
 0x428   : > { %5741 = vmatmul.mubr.msk.f32.gmra.mxu1 %vm1406_vm6, %v605_v31  ;;  %3277 = vrot.lane.b32.xlu1 %v3206_v32, %s6204_s17  ;;  %v2383_v31 = vcombine.low %v6924_v11, %v6927_v12  ;;  %v6958_v32 = vrot.slane %v2504_v13, %v6904_v57 }
 0x429   : > { %3004 = vmatprep.mubr.f32.mxu1 %v8146_v1  ;;  %5749 = vmatprep.subr.mxu0 %v8146_v1  ;;  %v2334_v58 = vrot.slane %v2320_v34, %v6904_v57  ;;  %v2350_v61 = vrot.slane %v2336_v53, %v6904_v57 }
 0x42a   : > { %5750 = vmatpush3.msra.mxu0 %v606_v35  ;;  %v2568_v44 = vcombine.low %v6958_v32, %v6961_v33 }
 0x4d2   : > { %v1936_v36 = vpop.f32.mrf.mxu1 }
 0x4d3   : > { %1951 = vst.msk [vmem:[#allocation2 + $0x90] sm:$0xff] %vm1411_vm4, %v1936_v36 }
 0x4d4   : > { %v5703_v37 = vpop.f32.mrf.mxu1 }
 0x4d7   : > { %v1941_v41 = vpop.f32.mrf.mxu1 }
 0x4d8   : > { %1952 = vst.msk [vmem:[#allocation2 + $0x98] sm:$0xff] %vm1411_vm4, %v1941_v41  ;;  %v2093_v42 = vpop.f32.mrf.mxu0 }
 0x4d9   : > { %2108 = vst.msk [vmem:[#allocation2 + $0xa8] sm:$0xff] %vm1411_vm4, %v2093_v42  ;;  %v5706_v43 = vpop.f32.mrf.mxu1 }
 0x4da   : > { %v5719_v46 = vpop.f32.mrf.mxu0  ;;  %v6899_v47 = vld [vmem:[#allocation2 + $0x90] sm:$0xff]  ;;  %v6989_v43 = vrot.slane %v2383_v31, %v6943_v20 }
 0x4db   : > { %3279 = vrot.lane.b32.xlu0 %v6899_v47, %s6204_s17  ;;  %v2351_v3 = vcombine.low %v6809_v14, %v6899_v47  ;;  %v2352_v55 = vcombine.high %v6809_v14, %v6899_v47 }
 0x4dc   : > { %v1946_v4 = vpop.f32.mrf.mxu1  ;;  %8197 = vst [vmem:[#allocation28_spill] sm:$0xff] %v6989_v43 }
 0x4dd   : > { %1953 = vst.msk [vmem:[#allocation2 + $0xa0] sm:$0x3] %vm1414_vm5, %v1946_v4  ;;  %v2098_v50 = vpop.f32.mrf.mxu0  ;;  %v6936_v16 = vrot.slane %v2351_v3, %v6904_v57  ;;  %v6994_v4 = vpop.permute.xlu1 %3251 }
 0x4de   : > { %2109 = vst.msk [vmem:[#allocation2 + $0xb0] sm:$0xff] %vm1411_vm4, %v2098_v50  ;;  %v5709_v59 = vpop.f32.mrf.mxu1 }
 0x4df   : > { %v5722_v2 = vpop.f32.mrf.mxu0  ;;  %4280 = vrot.lane.b32.xlu0 %v6899_v47, %s6205_s3  ;;  %v6921_v10 = vld [vmem:[#allocation2 + $0x98] sm:$0xff]  ;;  %v2721_v59 = vcombine.low %v2696_v39, %v2704_v40 }
 0x4e0   : > { %v2186_v62 = vpop.f32.mrf.mxu1  ;;  %v3210_v63 = vld [vmem:[#allocation2 + $0xa8] sm:$0xff]  ;;  %v2536_v26 = vcombine.low %v6829_v24, %v6921_v10  ;;  %v2366_v2 = vrot.slane %v2352_v55, %v6904_v57 }
 0x4e1   : > { %v2103_v7 = vpop.f32.mrf.mxu0  ;;  %5752 = vmatmul.mubr.msk.f32.vlgmr.msra.gmra.mxu0 %vm1406_vm6, %v2186_v62  ;;  %3285 = vrot.lane.b32.xlu1 %v3210_v63, %s6204_s17  ;;  %v2367_v8 = vcombine.low %v6815_v19, %v3210_v63  ;;  %v2368_v35 = vcombine.high %v6815_v19, %v3210_v63 }
 0x4e2   : > { %2110 = vst.msk [vmem:[#allocation2 + $0xb8] sm:$0x3] %vm1414_vm5, %v2103_v7  ;;  %v5736_v9 = vpop.f32.mrf.mxu1  ;;  %5754 = vmatprep.mubr.msk.f32.mxu0 %vm6202_vm0, %v8146_v1  ;;  %v6986_v19 = vrot.slane %v2536_v26, %v6904_v57 }
 0x4e3   : > { %3281 = vrot.lane.b32.xlu0 %v6921_v10, %s6204_s17  ;;  %v6939_v17 = vrot.slane %v2367_v8, %v6904_v57  ;;  %v5725_v21 = vpop.f32.mrf.mxu0  ;;  %v2382_v14 = vrot.slane %v2368_v35, %v6904_v57  ;;  %v2384_v8 = vcombine.high %v6924_v11, %v6927_v12  ;;  %v2505_v9 = vcombine.high %v6748_v51, %v6758_v6  ;;  %v7036_v11 = vpop.permute.xlu1 %3263 }
 0x4e4   : > { %v2191_v22 = vpop.f32.mrf.mxu1  ;;  %v5896_v41 = vld [vmem:[#allocation2 + $0x70] ss:$48 sps:$4 sm:$0x33]   ;;  %v7038_v12 = vpop.permute.xlu0 %3243  ;;  %v2399_v6 = vcombine.low %v2334_v58, %v2350_v61 }
 0x4e5   : > { %5755 = vmatmul.mubr.msk.f32.gmra.mxu0 %vm1406_vm6, %v2191_v22  ;;  %4286 = vrot.lane.b32.xlu1 %v3210_v63, %s6205_s3  ;;  %v6947_v28 = vld [vmem:[#allocation2 + $0xb0] sm:$0xff]  ;;  %v2415_v29 = vcombine.low %v6936_v16, %v6939_v17  ;;  %v3209_v42 = vld [vmem:[#allocation2 + $0xa0] sm:$0x3]  ;;  %v2712_v49 = vrot.slane %v5896_v41, %v6904_v57  ;;  %v2416_v3 = vcombine.high %v6936_v16, %v6939_v17 }
 0x4e6   : > { %v5739_v30 = vpop.f32.mrf.mxu1  ;;  %5757 = vmatprep.mubr.msk.f32.mxu0 %vm6202_vm0, %v8146_v1  ;;  %v2552_v0 = vcombine.low %v6844_v27, %v6947_v28  ;;  %v7017_v63 = vrot.slane %v2568_v44, %v6943_v20  ;;  %v2431_v7 = vcombine.low %v2366_v2, %v2382_v14  ;;  %v2553_v13 = vcombine.high %v6844_v27, %v6947_v28  ;;  %v4210_v15 = vld [vmem:[#allocation2 + $0xa0] sm:$0x3] }
 0x4e7   : > { %4282 = vrot.lane.b32.xlu0 %v6921_v10, %s6205_s3  ;;  %v6971_v37 = vrot.slane %v2415_v29, %v6943_v20  ;;  %v2521_v16 = vcombine.high %v6750_v52, %v6764_v54  ;;  %v7029_v17 = vrot.slane %v2721_v59, %v6943_v20  ;;  %v2430_v52 = vrot.slane %v2416_v3, %v6943_v20  ;;  %v7057_v35 = vpop.permute.xlu1 %3249 }
 0x4e8   : > { %v2196_v36 = vpop.f32.mrf.mxu1  ;;  %v6974_v38 = vrot.slane %v2552_v0, %v6904_v57  ;;  %8199 = vst [vmem:[#allocation30_spill] sm:$0xff] %v7017_v63  ;;  %v2537_v54 = vcombine.high %v6829_v24, %v6921_v10  ;;  %v2439_v23 = vrot.slane %v2431_v7, %v6943_v20  ;;  %v2432_v29 = vcombine.high %v2366_v2, %v2382_v14 }
 0x4e9   : > { %8196 = vst [vmem:[#allocation27_spill] sm:$0xff] %v6971_v37  ;;  %3287 = vrot.lane.b32.xlu1 %v6947_v28, %s6204_s17  ;;  %5758 = vmatmul.mubr.msk.f32.gmra.mxu0 %vm1406_vm6, %v2196_v36  ;;  %v5897_v46 = vld [vmem:[#allocation2 + $0x88] ss:$48 sps:$4 sm:$0x33]   ;;  %8200 = vst [vmem:[#allocation31_spill] sm:$0xff] %v7029_v17  ;;  %v2448_v51 = vcombine.high %v6989_v43, %v6971_v37  ;;  %v2567_v26 = vrot.slane %v2553_v13, %v6904_v57  ;;  %v7059_v36 = vpop.permute.xlu0 %3255 }
 0x4ea   : > { %v5742_v45 = vpop.f32.mrf.mxu1  ;;  %3180 = vmatprep.mubr.f32.mxu0 %v8146_v1  ;;  %v2600_v47 = vcombine.low %v6986_v19, %v6974_v38  ;;  %v4213_v48 = vld [vmem:[#allocation2 + $0xb8] sm:$0x3]  ;;  %v2720_v50 = vrot.slane %v5897_v46, %v6904_v57  ;;  %v2519_v30 = vrot.slane %v2505_v9, %v6904_v57  ;;  %v2535_v31 = vrot.slane %v2521_v16, %v6904_v57 }
 0x4eb   : > { %3283 = vrot.lane.b32.xlu0 %v3209_v42, %s6204_s17  ;;  %v3212_v27 = vld [vmem:[#allocation2 + $0xb8] sm:$0x3]  ;;  %v2407_v24 = vrot.slane %v2399_v6, %v6943_v20  ;;  %v2400_v0 = vcombine.high %v2334_v58, %v2350_v61  ;;  %v2551_v34 = vrot.slane %v2537_v54, %v6904_v57  ;;  %v2446_v40 = vrot.slane %v2432_v29, %v6943_v20  ;;  %v7067_v46 = vpop.permute.xlu1 %3261 }
 0x4ec   : > { %v7014_v62 = vrot.slane %v2600_v47, %v6943_v20  ;;  %v2729_v5 = vcombine.low %v2712_v49, %v2720_v50  ;;  %v2585_v42 = vcombine.high %v2519_v30, %v2535_v31  ;;  %v2601_v50 = vcombine.high %v6986_v19, %v6974_v38 }
 0x4ed   : > { %4288 = vrot.lane.b32.xlu1 %v6947_v28, %s6205_s3  ;;  %v2398_v28 = vrot.slane %v2384_v8, %v6943_v20  ;;  %v2452_v39 = vcombine.high %v2407_v24, %v2439_v23  ;;  %v2617_v41 = vcombine.high %v2551_v34, %v2567_v26  ;;  %v2414_v53 = vrot.slane %v2400_v0, %v6943_v20  ;;  %v7069_v58 = vpop.permute.xlu0 %3247 }
 0x4ee   : > { %8198 = vst [vmem:[#allocation29_spill] sm:$0xff] %v7014_v62  ;;  %v7032_v18 = vrot.slane %v2729_v5, %v6943_v20  ;;  %v2599_v14 = vrot.slane %v2585_v42, %v6943_v20  ;;  %v2451_v47 = vcombine.low %v2407_v24, %v2439_v23  ;;  %v2569_v3 = vcombine.high %v6958_v32, %v6961_v33 }
 0x4ef   : > { %4290 = vrot.lane.b32.xlu0 %v4213_v48, %s6205_s3  ;;  %v2449_v10 = vcombine.low %v2398_v28, %v2430_v52  ;;  %v2450_v55 = vcombine.high %v2398_v28, %v2430_v52  ;;  %v2454_v44 = vcombine.high %v2414_v53, %v2446_v40  ;;  %v2631_v45 = vrot.slane %v2617_v41, %v6943_v20  ;;  %v7077_v59 = vpop.permute.xlu1 %3253 }
 0x4f0   : > { %8201 = vst [vmem:[#allocation32_spill] sm:$0xff] %v7032_v18  ;;  %v2453_v49 = vcombine.low %v2414_v53, %v2446_v40  ;;  %v2633_v5 = vcombine.high %v7017_v63, %v7014_v62  ;;  %v2615_v7 = vrot.slane %v2601_v50, %v6943_v20  ;;  %v2583_v38 = vrot.slane %v2569_v3, %v6943_v20 }
 0x4f1   : > { %4284 = vrot.lane.b32.xlu1 %v4210_v15, %s6205_s3  ;;  %v2638_v48 = vcombine.low %v2599_v14, %v2631_v45  ;;  %v7079_v61 = vpop.permute.xlu0 %3259  ;;  %v2639_v2 = vcombine.high %v2599_v14, %v2631_v45  ;;  %v2616_v13 = vcombine.low %v2551_v34, %v2567_v26  ;;  %v2584_v32 = vcombine.low %v2519_v30, %v2535_v31 }
 0x4f2   : > { %v2634_v9 = vcombine.low %v2583_v38, %v2615_v7  ;;  %v2635_v33 = vcombine.high %v2583_v38, %v2615_v7  ;;  %v2738_v28 = vcombine.high %v7029_v17, %v7032_v18  ;;  %v3324_v50 = vcombine.high %v7038_v12, %v7059_v36 }
 0x4f3   : > { %2750 = vrot.lane.b32.xlu0 %v2448_v51, %s6208_s2  ;;  %v7090_v19 = vpop.permute.xlu1 %3265  ;;  %v2624_v15 = vrot.slane %v2616_v13, %v6943_v20  ;;  %v2592_v6 = vrot.slane %v2584_v32, %v6943_v20  ;;  %v3339_v3 = vcombine.low %v7057_v35, %v7067_v46 }
 0x4f4   : > { %v7157_v32 = vrot.slane %v3324_v50, %v6904_v57  ;;  %v3701_v21 = vcombine.low %v7077_v59, %v7090_v19 }
 0x4f5   : > { %3289 = vrot.lane.b32.xlu1 %v3212_v27, %s6204_s17  ;;  %v7092_v8 = vpop.permute.xlu0 %4246  ;;  %v2636_v52 = vcombine.low %v2592_v6, %v2624_v15  ;;  %v2637_v23 = vcombine.high %v2592_v6, %v2624_v15 }
 0x4f7   : > { %2758 = vrot.lane.b32.xlu0 %v2449_v10, %s6209_s4  ;;  %v7096_v16 = vpop.permute.xlu1 %4252 }
 0x4f9   : > { %2782 = vrot.lane.b32.xlu1 %v2452_v39, %s6210_s7  ;;  %v7098_v51 = vpop.permute.xlu0 %4258 }
 0x4fb   : > { %2766 = vrot.lane.b32.xlu0 %v2450_v55, %s6211_s24  ;;  %v7103_v54 = vpop.permute.xlu1 %4264 }
 0x4fd   : > { %2798 = vrot.lane.b32.xlu1 %v2454_v44, %s6212_s23  ;;  %v7105_v27 = vpop.permute.xlu0 %4244 }
 0x4ff   : > { %2774 = vrot.lane.b32.xlu0 %v2451_v47, %s6213_s22  ;;  %v7110_v29 = vpop.permute.xlu1 %4250 }
 0x501   : > { %2846 = vrot.lane.b32.xlu1 %v2638_v48, %s6214_s21  ;;  %v7112_v26 = vpop.permute.xlu0 %4256 }
 0x503   : > { %2790 = vrot.lane.b32.xlu0 %v2453_v49, %s6214_s21  ;;  %v7115_v30 = vpop.permute.xlu1 %4262  ;;  %v3323_v49 = vcombine.low %v7038_v12, %v7059_v36  ;;  %v3347_v12 = vrot.slane %v3339_v3, %v6904_v57 }
 0x505   : > { %2854 = vrot.lane.b32.xlu1 %v2639_v2, %s6212_s23  ;;  %v7117_v31 = vpop.permute.xlu0 %4254  ;;  %v3331_v13 = vrot.slane %v3323_v49, %v6904_v57 }
 0x507   : > { %2806 = vrot.lane.b32.xlu0 %v2633_v5, %s6208_s2  ;;  %v7119_v24 = vpop.permute.xlu1 %4248  ;;  %v3340_v5 = vcombine.high %v7057_v35, %v7067_v46  ;;  %v3388_v19 = vcombine.high %v3331_v13, %v3347_v12 }
 0x509   : > { %v7121_v10 = vpop.permute.xlu0 %4266  ;;  %v7161_v36 = vrot.slane %v3340_v5, %v6904_v57  ;;  %v3402_v63 = vrot.slane %v3388_v19, %v6943_v20 }
 0x50a   : > { %v4702_v62 = vcombine.low %v7117_v31, %v7121_v10 }
 0x50b   : > { %2814 = vrot.lane.b32.xlu0 %v2634_v9, %s6209_s4  ;;  %v7123_v0 = vpop.permute.xlu1 %4260  ;;  %v3404_v50 = vcombine.high %v7157_v32, %v7161_v36 }
 0x50d   : > { %v3268_v34 = vpop.permute.xlu0 %3267 }
 0x50f   : > { %2822 = vrot.lane.b32.xlu0 %v2635_v33, %s6211_s24  ;;  %v3274_v39 = vpop.permute.xlu1 %3273 }
 0x511   : > { %v7125_v40 = vpop.permute.xlu0 %4268 }
 0x513   : > { %2830 = vrot.lane.b32.xlu0 %v2636_v52, %s6213_s22  ;;  %v7127_v41 = vpop.permute.xlu1 %4274 }
 0x515   : > { %v7129_v53 = vpop.permute.xlu0 %3269 }
 0x517   : > { %2838 = vrot.lane.b32.xlu0 %v2637_v23, %s6210_s7  ;;  %v7131_v55 = vpop.permute.xlu1 %3275 }
 0x519   : > { %v7133_v42 = vpop.permute.xlu0 %4270 }
 0x51a   : > { %8202 = vst [vmem:[#allocation33_spill] sm:$0xff] %v7133_v42 }
 0x51b   : > { %2862 = vrot.lane.b32.xlu0 %v2738_v28, %s6208_s2  ;;  %v7135_v44 = vpop.permute.xlu1 %4276 }
 0x51d   : > { %v7137_v45 = vpop.permute.xlu0 %3271 }
 0x51f   : > { %v7141_v47 = vpop.permute.xlu1 %4272 }
 0x521   : > { %v7139_v14 = vpop.permute.xlu0 %4278 }
 0x523   : > { %v7147_v2 = vpop.permute.xlu1 %3277 }
 0x54d   : > { %v3280_v48 = vpop.permute.xlu0 %3279 }
 0x54e   : > { %v3355_v38 = vcombine.low %v3268_v34, %v3280_v48  ;;  %v3356_v9 = vcombine.high %v3268_v34, %v3280_v48  ;;  %v4509_v34 = vcombine.low %v7092_v8, %v7098_v51  ;;  %v4525_v48 = vcombine.low %v7096_v16, %v7103_v54 }
 0x550   : > { %v3363_v35 = vrot.slane %v3355_v38, %v6904_v57  ;;  %v7167_v46 = vrot.slane %v3356_v9, %v6904_v57  ;;  %v3508_v38 = vcombine.low %v6941_v25, %v6996_v56  ;;  %v3524_v9 = vcombine.low %v6994_v4, %v7036_v11 }
 0x551   : > { %v7153_v7 = vpop.permute.xlu0 %4280  ;;  %v7198_v22 = vrot.slane %v4509_v34, %v6904_v57  ;;  %v7201_v1 = vrot.slane %v4525_v48, %v6904_v57 }
 0x552   : > { %v7215_v59 = vrot.slane %v3524_v9, %v6904_v57  ;;  %v4340_v9 = vcombine.low %v7110_v29, %v7115_v30  ;;  %v4356_v17 = vcombine.low %v7125_v40, %v7153_v7 }
 0x553   : > { %v3286_v33 = vpop.permute.xlu1 %3285  ;;  %8204 = vst [vmem:[#allocation35_spill] sm:$0xff] %v7198_v22 }
 0x554   : > { %v3371_v15 = vcombine.low %v3274_v39, %v3286_v33  ;;  %v3372_v6 = vcombine.high %v3274_v39, %v3286_v33  ;;  %v3387_v39 = vcombine.low %v3331_v13, %v3347_v12 }
 0x555   : > { %v7163_v52 = vpop.permute.xlu0 %3281 }
 0x556   : > { %v3379_v23 = vrot.slane %v3371_v15, %v6904_v57  ;;  %v7171_v28 = vrot.slane %v3372_v6, %v6904_v57  ;;  %v3693_v15 = vcombine.low %v7069_v58, %v7079_v61  ;;  %v4324_v58 = vcombine.low %v7105_v27, %v7112_v26 }
 0x557   : > { %v7177_v49 = vpop.permute.xlu1 %4286  ;;  %v3418_v61 = vrot.slane %v3404_v50, %v6943_v20 }
 0x558   : > { %v3419_v3 = vcombine.low %v3363_v35, %v3379_v23  ;;  %v3436_v5 = vcombine.high %v7167_v46, %v7171_v28  ;;  %v3420_v37 = vcombine.high %v3363_v35, %v3379_v23  ;;  %v3403_v35 = vcombine.low %v7157_v32, %v7161_v36 }
 0x559   : > { %v7187_v33 = vpop.permute.xlu0 %4282  ;;  %v7220_v23 = vrot.slane %v3693_v15, %v6904_v57  ;;  %v7235_v36 = vrot.slane %v4324_v58, %v6904_v57 }
 0x55a   : > { %8203 = vst [vmem:[#allocation34_spill] sm:$0xff] %v7187_v33  ;;  %v3450_v6 = vrot.slane %v3436_v5, %v6943_v20  ;;  %v7193_v60 = vrot.slane %v3419_v3, %v6943_v20  ;;  %v7209_v3 = vrot.slane %v3387_v39, %v6943_v20  ;;  %v7212_v5 = vrot.slane %v3508_v38, %v6904_v57 }
 0x55b   : > { %v7203_v43 = vpop.permute.xlu1 %3287  ;;  %v7225_v39 = vrot.slane %v3701_v21, %v6904_v57  ;;  %v4573_v38 = vcombine.low %v7198_v22, %v7201_v1  ;;  %v4541_v13 = vcombine.low %v7133_v42, %v7187_v33  ;;  %v3434_v32 = vrot.slane %v3420_v37, %v6943_v20 }
 0x55c   : > { %v3457_v48 = vcombine.low %v3418_v61, %v3450_v6  ;;  %v3452_v50 = vcombine.high %v7209_v3, %v7193_v60  ;;  %v4372_v21 = vcombine.low %v7127_v41, %v7177_v49  ;;  %v3556_v15 = vcombine.low %v7131_v55, %v7203_v43 }
 0x55d   : > { %v3284_v34 = vpop.permute.xlu0 %3283  ;;  %v4694_v37 = vcombine.low %v7119_v24, %v7123_v0  ;;  %v3458_v42 = vcombine.high %v3418_v61, %v3450_v6  ;;  %v3435_v24 = vcombine.low %v7167_v46, %v7171_v28  ;;  %v7260_v10 = vrot.slane %v4541_v13, %v6904_v57 }
 0x55e   : > { %3794 = vrot.lane.b32.xlu1 %v3457_v48, %s6214_s21  ;;  %3754 = vrot.lane.b32.xlu0 %v3452_v50, %s6208_s2  ;;  %v3540_v48 = vcombine.low %v7129_v53, %v7163_v52  ;;  %v3453_v19 = vcombine.low %v3402_v63, %v3434_v32  ;;  %v7266_v33 = vrot.slane %v4340_v9, %v6904_v57 }
 0x55f   : > { %v7231_v12 = vpop.permute.xlu1 %4288  ;;  %v4380_v22 = vrot.slane %v4372_v21, %v6904_v57  ;;  %v7270_v6 = vrot.slane %v3556_v15, %v6904_v57  ;;  %v4701_v46 = vrot.slane %v4694_v37, %v6904_v57  ;;  %v4364_v13 = vrot.slane %v4356_v17, %v6904_v57 }
 0x560   : > { %v4557_v58 = vcombine.low %v7135_v44, %v7231_v12  ;;  %v7282_v9 = vrot.slane %v3540_v48, %v6904_v57  ;;  %v3454_v21 = vcombine.high %v3402_v63, %v3434_v32  ;;  %v3443_v15 = vrot.slane %v3435_v24, %v6943_v20 }
 0x561   : > { %v4291_v18 = vpop.permute.xlu0 %4290  ;;  %v7288_v37 = vrot.slane %v4573_v38, %v6943_v20  ;;  %v3411_v63 = vrot.slane %v3403_v35, %v6943_v20  ;;  %v3725_v32 = vcombine.low %v7220_v23, %v7225_v39  ;;  %v4388_v24 = vcombine.low %v7235_v36, %v7266_v33 }
 0x562   : > { %v4718_v31 = vcombine.low %v7139_v14, %v4291_v18  ;;  %v7263_v0 = vrot.slane %v4557_v58, %v6904_v57  ;;  %3802 = vrot.lane.b32.xlu1 %v3458_v42, %s6212_s23  ;;  %v4709_v14 = vrot.slane %v4702_v62, %v6904_v57  ;;  %3762 = vrot.lane.b32.xlu0 %v3453_v19, %s6209_s4 }
 0x563   : > { %v4285_v50 = vpop.permute.xlu1 %4284  ;;  %v3709_v42 = vcombine.low %v7137_v45, %v3284_v34  ;;  %v3604_v17 = vcombine.low %v7282_v9, %v7270_v6  ;;  %v3572_v45 = vcombine.low %v7212_v5, %v7215_v59  ;;  %v4325_v23 = vcombine.high %v7105_v27, %v7112_v26 }
 0x564   : > { %v4710_v18 = vcombine.low %v7141_v47, %v4285_v50  ;;  %v4605_v28 = vcombine.low %v7260_v10, %v7263_v0  ;;  %v4725_v61 = vrot.slane %v4718_v31, %v6904_v57  ;;  %v4420_v31 = vcombine.low %v4364_v13, %v4380_v22 }
 0x565   : > { %v3716_v19 = vrot.slane %v3709_v42, %v6904_v57  ;;  %v4726_v50 = vcombine.low %v4701_v46, %v4709_v14  ;;  %v7326_v42 = vrot.slane %v4388_v24, %v6943_v20  ;;  %v7335_v27 = vrot.slane %v3572_v45, %v6943_v20 }
 0x566   : > { %v4717_v47 = vrot.slane %v4710_v18, %v6904_v57  ;;  %v7291_v58 = vrot.slane %v4605_v28, %v6943_v20  ;;  %3770 = vrot.lane.b32.xlu0 %v3454_v21, %s6211_s24  ;;  %v3455_v18 = vcombine.low %v3411_v63, %v3443_v15  ;;  %v7310_v35 = vrot.slane %v4420_v31, %v6943_v20 }
 0x567   : > { %v3290_v62 = vpop.permute.xlu1 %3289  ;;  %v7338_v26 = vrot.slane %v4726_v50, %v6943_v20  ;;  %v4421_v31 = vcombine.high %v4364_v13, %v4380_v22  ;;  %v4357_v22 = vcombine.high %v7125_v40, %v7153_v7 }
 0x568   : > { %v3717_v48 = vcombine.low %v7147_v2, %v3290_v62  ;;  %v4734_v34 = vcombine.low %v4717_v47, %v4725_v61  ;;  %v4638_v38 = vcombine.high %v7288_v37, %v7291_v58  ;;  %v7313_v61 = vrot.slane %v3604_v17, %v6943_v20 }
 0x569   : > { %v4637_v46 = vcombine.low %v7288_v37, %v7291_v58  ;;  %v7329_v47 = vrot.slane %v3725_v32, %v6943_v20  ;;  %v4373_v62 = vcombine.high %v7127_v41, %v7177_v49  ;;  %v3456_v17 = vcombine.high %v3411_v63, %v3443_v15 }
 0x56a   : > { %v3724_v2 = vrot.slane %v3717_v48, %v6904_v57  ;;  %4811 = vrot.lane.b32.xlu1 %v4638_v38, %s6208_s2  ;;  %v7318_v39 = vrot.slane %v4734_v34, %v6943_v20  ;;  %3778 = vrot.lane.b32.xlu0 %v3455_v18, %s6213_s22  ;;  %v4452_v38 = vcombine.low %v7326_v42, %v7310_v35 }
 0x56b   : > { %v3636_v45 = vcombine.low %v7335_v27, %v7313_v61  ;;  %v4341_v32 = vcombine.high %v7110_v29, %v7115_v30  ;;  %v4389_v41 = vcombine.high %v7235_v36, %v7266_v33  ;;  %v7361_v13 = vrot.slane %v4373_v62, %v6904_v57 }
 0x56c   : > { %v3733_v28 = vcombine.low %v3716_v19, %v3724_v2  ;;  %v4453_v15 = vcombine.high %v7326_v42, %v7310_v35  ;;  %v4435_v29 = vrot.slane %v4421_v31, %v6943_v20  ;;  %v7367_v30 = vrot.slane %v4325_v23, %v6904_v57 }
 0x56d   : > { %v7370_v40 = vrot.slane %v4341_v32, %v6904_v57  ;;  %v7373_v7 = vrot.slane %v4357_v22, %v6904_v57  ;;  %v4403_v33 = vrot.slane %v4389_v41, %v6943_v20  ;;  %v3557_v18 = vcombine.high %v7131_v55, %v7203_v43 }
 0x56e   : > { %v7332_v21 = vrot.slane %v3733_v28, %v6943_v20  ;;  %3786 = vrot.lane.b32.xlu0 %v3456_v17, %s6210_s7  ;;  %v3605_v28 = vcombine.high %v7282_v9, %v7270_v6  ;;  %v3509_v62 = vcombine.high %v6941_v25, %v6996_v56  ;;  %v3525_v31 = vcombine.high %v6994_v4, %v7036_v11 }
 0x56f   : > { %v4436_v36 = vcombine.low %v7373_v7, %v7361_v13  ;;  %v4454_v63 = vcombine.low %v4403_v33, %v4435_v29  ;;  %v4404_v24 = vcombine.low %v7367_v30, %v7370_v40  ;;  %v4455_v19 = vcombine.high %v4403_v33, %v4435_v29  ;;  %v7418_v29 = vpop.permute.xlu0 %2750 }
 0x570   : > { %v3742_v48 = vcombine.high %v7329_v47, %v7332_v21  ;;  %v3573_v17 = vcombine.high %v7212_v5, %v7215_v59  ;;  %v3571_v43 = vrot.slane %v3557_v18, %v6904_v57  ;;  %v3637_v55 = vcombine.high %v7335_v27, %v7313_v61 }
 0x571   : > { %v7383_v2 = vrot.slane %v4436_v36, %v6943_v20  ;;  %v7387_v50 = vrot.slane %v4404_v24, %v6943_v20  ;;  %v3619_v6 = vrot.slane %v3605_v28, %v6943_v20  ;;  %v3523_v25 = vrot.slane %v3509_v62, %v6904_v57  ;;  %v8205_v62 = vld [vmem:[#allocation35_spill] sm:$0xff] }
 0x572   : > { %3866 = vrot.lane.b32.xlu1 %v3742_v48, %s6208_s2  ;;  %4755 = vrot.lane.b32.xlu0 %v4453_v15, %s6208_s2  ;;  %v3541_v48 = vcombine.high %v7129_v53, %v7163_v52  ;;  %v3539_v56 = vrot.slane %v3525_v31, %v6904_v57  ;;  %v3587_v11 = vrot.slane %v3573_v17, %v6943_v20  ;;  %v8206_v17 = vld [vmem:[#allocation34_spill] sm:$0xff] }
 0x573   : > { %v4456_v23 = vcombine.low %v7387_v50, %v7383_v2  ;;  %v4558_v24 = vcombine.high %v7135_v44, %v7231_v12  ;;  %v4510_v28 = vcombine.high %v7092_v8, %v7098_v51  ;;  %v4574_v31 = vcombine.high %v8205_v62, %v7201_v1 }
 0x574   : > { %v3555_v4 = vrot.slane %v3541_v48, %v6904_v57  ;;  %v3638_v52 = vcombine.low %v3587_v11, %v3619_v6  ;;  %v3588_v5 = vcombine.low %v3523_v25, %v3539_v56  ;;  %v3639_v59 = vcombine.high %v3587_v11, %v3619_v6  ;;  %v8207_v48 = vld [vmem:[#allocation33_spill] sm:$0xff] }
 0x575   : > { %v3589_v15 = vcombine.high %v3523_v25, %v3539_v56  ;;  %v7439_v44 = vrot.slane %v4558_v24, %v6904_v57  ;;  %v7443_v8 = vrot.slane %v4510_v28, %v6904_v57  ;;  %v4588_v51 = vrot.slane %v4574_v31, %v6943_v20 }
 0x576   : > { %4763 = vrot.lane.b32.xlu0 %v4454_v63, %s6209_s4  ;;  %v3620_v53 = vcombine.low %v3555_v4, %v3571_v43  ;;  %v3596_v32 = vrot.slane %v3588_v5, %v6943_v20  ;;  %v3621_v41 = vcombine.high %v3555_v4, %v3571_v43  ;;  %v4542_v43 = vcombine.high %v8207_v48, %v8206_v17 }
 0x577   : > { %v3603_v63 = vrot.slane %v3589_v15, %v6943_v20  ;;  %v4437_v17 = vcombine.high %v7373_v7, %v7361_v13 }
 0x578   : > { %v3628_v9 = vrot.slane %v3620_v53, %v6943_v20  ;;  %v3635_v36 = vrot.slane %v3621_v41, %v6943_v20  ;;  %v4556_v1 = vrot.slane %v4542_v43, %v6904_v57 }
 0x579   : > { %v4451_v13 = vrot.slane %v4437_v17, %v6943_v20 }
 0x57a   : > { %4771 = vrot.lane.b32.xlu0 %v4455_v19, %s6211_s24  ;;  %v3640_v22 = vcombine.low %v3596_v32, %v3628_v9  ;;  %v3641_v33 = vcombine.high %v3596_v32, %v3628_v9  ;;  %v4606_v19 = vcombine.high %v7260_v10, %v7263_v0  ;;  %v3642_v18 = vcombine.low %v3603_v63, %v3635_v36 }
 0x57b   : > { %v3643_v12 = vcombine.high %v3603_v63, %v3635_v36 }
 0x57c   : > { %v4620_v10 = vrot.slane %v4606_v19, %v6943_v20  ;;  %v8208_v19 = vmov 0.0  }
 0x57e   : > { %4779 = vrot.lane.b32.xlu0 %v4456_v23, %s6213_s22  ;;  %v4526_v23 = vcombine.high %v7096_v16, %v7103_v54  ;;  %v4621_v54 = vcombine.low %v4556_v1, %v7439_v44  ;;  %v4639_v6 = vcombine.low %v4588_v51, %v4620_v10  ;;  %v4640_v4 = vcombine.high %v4588_v51, %v4620_v10 }
 0x57f   : > { %v4622_v51 = vcombine.high %v4556_v1, %v7439_v44  ;;  %v4457_v44 = vcombine.high %v7387_v50, %v7383_v2 }
 0x580   : > { %v7446_v16 = vrot.slane %v4526_v23, %v6904_v57  ;;  %v4629_v53 = vrot.slane %v4621_v54, %v6943_v20 }
 0x581   : > { %v4636_v1 = vrot.slane %v4622_v51, %v6943_v20 }
 0x582   : > { %3810 = vrot.lane.b32.xlu0 %v3637_v55, %s6208_s2  ;;  %v7435_v55 = vpop.permute.xlu0 %2758  ;;  %v4589_v25 = vcombine.low %v7443_v8, %v7446_v16  ;;  %v4590_v7 = vcombine.high %v7443_v8, %v7446_v16 }
 0x584   : > { %v4604_v8 = vrot.slane %v4590_v7, %v6943_v20 }
 0x586   : > { %3818 = vrot.lane.b32.xlu0 %v3638_v52, %s6209_s4  ;;  %v7452_v0 = vpop.permute.xlu0 %2766 }
 0x58a   : > { %3826 = vrot.lane.b32.xlu0 %v3639_v59, %s6211_s24  ;;  %v7459_v52 = vpop.permute.xlu0 %2774  ;;  %v4597_v59 = vrot.slane %v4589_v25, %v6943_v20 }
 0x58c   : > { %v4641_v9 = vcombine.low %v4597_v59, %v4629_v53  ;;  %v4642_v54 = vcombine.high %v4597_v59, %v4629_v53 }
 0x58e   : > { %3834 = vrot.lane.b32.xlu0 %v3640_v22, %s6213_s22 }
 0x592   : > { %3842 = vrot.lane.b32.xlu0 %v3641_v33, %s6210_s7  ;;  %v7468_v33 = vpop.permute.xlu0 %2790 }
 0x596   : > { %3850 = vrot.lane.b32.xlu0 %v3642_v18, %s6214_s21  ;;  %v7482_v62 = vpop.permute.xlu0 %2806 }
 0x59a   : > { %3858 = vrot.lane.b32.xlu0 %v3643_v12, %s6212_s23  ;;  %v4405_v12 = vcombine.high %v7367_v30, %v7370_v40  ;;  %v7495_v10 = vpop.permute.xlu0 %2814 }
 0x59c   : > { %v4419_v30 = vrot.slane %v4405_v12, %v6943_v20 }
 0x59e   : > { %4819 = vrot.lane.b32.xlu0 %v4639_v6, %s6209_s4  ;;  %v4458_v25 = vcombine.low %v4419_v30, %v4451_v13 }
 0x5a1   : > { %v2275_v56 = vpop.f32.mrf.mxu0 }
 0x5a2   : > { %2290 = vst.msk [vmem:[#allocation2 + $0xc0] sm:$0xff] %vm1411_vm4, %v2275_v56  ;;  %4827 = vrot.lane.b32.xlu0 %v4640_v4, %s6211_s24  ;;  %v7510_v56 = vpop.permute.xlu0 %2822  ;;  %v4643_v4 = vcombine.low %v4604_v8, %v4636_v1 }
 0x5a3   : > { %v5753_v11 = vpop.f32.mrf.mxu0 }
 0x5a4   : > { %v4743_v11 = vcombine.high %v7338_v26, %v7318_v39 }
 0x5a5   : > { %v2280_v5 = vpop.f32.mrf.mxu0 }
 0x5a6   : > { %2291 = vst.msk [vmem:[#allocation2 + $0xc8] sm:$0xff] %vm1411_vm4, %v2280_v5  ;;  %4835 = vrot.lane.b32.xlu0 %v4641_v9, %s6213_s22  ;;  %v7525_v53 = vpop.permute.xlu0 %2830  ;;  %v4644_v5 = vcombine.high %v4604_v8, %v4636_v1 }
 0x5a7   : > { %v5756_v32 = vpop.f32.mrf.mxu0 }
 0x5a9   : > { %v3213_v41 = vld [vmem:[#allocation2 + $0xc0] sm:$0xff]  ;;  %v2285_v22 = vpop.f32.mrf.mxu0 }
 0x5aa   : > { %3291 = vrot.lane.b32.xlu1 %v3213_v41, %s6204_s17  ;;  %2292 = vst.msk [vmem:[#allocation2 + $0xd0] sm:$0x3] %vm1414_vm5, %v2285_v22  ;;  %v2462_v15 = vrot.slane %v3213_v41, %v6904_v57  ;;  %v2455_v23 = vcombine.high %v3213_v41, %v8208_v19  ;;  %v7533_v22 = vpop.permute.xlu0 %2838 }
 0x5ab   : > { %v5759_v36 = vpop.f32.mrf.mxu0 }
 0x5ac   : > { %v7471_v63 = vrot.slane %v2462_v15, %v6943_v20  ;;  %v2470_v28 = vcombine.high %v2462_v15, %v8208_v19  ;;  %v2469_v43 = vrot.slane %v2455_v23, %v6904_v57 }
 0x5ad   : > { %v7473_v24 = vld [vmem:[#allocation2 + $0xc8] sm:$0xff] }
 0x5ae   : > { %3293 = vrot.lane.b32.xlu0 %v7473_v24, %s6204_s17  ;;  %4292 = vrot.lane.b32.xlu1 %v3213_v41, %s6205_s3  ;;  %v2500_v18 = vcombine.high %v7471_v63, %v8208_v19  ;;  %v2484_v48 = vrot.slane %v2470_v28, %v6943_v20  ;;  %v2492_v6 = vrot.slane %v2469_v43, %v6943_v20  ;;  %v7542_v28 = vpop.permute.xlu0 %2862 }
 0x5af   : > { %v2647_v40 = vrot.slane %v7473_v24, %v6904_v57  ;;  %v2485_v32 = vcombine.high %v2469_v43, %v8208_v19  ;;  %v4459_v41 = vcombine.high %v4419_v30, %v4451_v13  ;;  %v2640_v12 = vcombine.high %v7473_v24, %v8208_v19 }
 0x5b0   : > { %v2501_v23 = vcombine.high %v2484_v48, %v8208_v19  ;;  %v2502_v43 = vcombine.high %v2492_v6, %v8208_v19 }
 0x5b1   : > { %v3215_v31 = vld [vmem:[#allocation2 + $0xd0] sm:$0x3]  ;;  %v7516_v16 = vrot.slane %v2647_v40, %v6943_v20  ;;  %v2655_v50 = vcombine.high %v2647_v40, %v8208_v19 }
 0x5b2   : > { %4294 = vrot.lane.b32.xlu0 %v7473_v24, %s6205_s3  ;;  %2752 = vrot.lane.b32.xlu1 %v2500_v18, %s6208_s2  ;;  %v7530_v9 = vld.sshfl [vmem:[#allocation2 + $0xd0] sm:$0x11 pattern:$0x73516240]  ;;  %v2499_v18 = vrot.slane %v2485_v32, %v6943_v20 }
 0x5b3   : > { %v2685_v2 = vcombine.high %v7516_v16, %v8208_v19  ;;  %v2669_v59 = vrot.slane %v2655_v50, %v6943_v20  ;;  %v2747_v15 = vcombine.high %v7530_v9, %v8208_v19  ;;  %v4216_v36 = vld [vmem:[#allocation2 + $0xd0] sm:$0x3]  ;;  %v7580_v50 = vpop.permute.xlu1 %2782 }
 0x5b6   : > { %3295 = vrot.lane.b32.xlu0 %v3215_v31, %s6204_s17  ;;  %2760 = vrot.lane.b32.xlu1 %v2484_v48, %s6209_s4  ;;  %v2503_v31 = vcombine.high %v2499_v18, %v8208_v19 }
 0x5ba   : > { %4843 = vrot.lane.b32.xlu0 %v4642_v54, %s6210_s7  ;;  %2776 = vrot.lane.b32.xlu1 %v2492_v6, %s6213_s22  ;;  %v2654_v54 = vrot.slane %v2640_v12, %v6904_v57  ;;  %v2686_v6 = vcombine.high %v2669_v59, %v8208_v19 }
 0x5bc   : > { %v2677_v13 = vrot.slane %v2654_v54, %v6943_v20  ;;  %v2670_v40 = vcombine.high %v2654_v54, %v8208_v19 }
 0x5be   : > { %4795 = vrot.lane.b32.xlu0 %v4458_v25, %s6214_s21  ;;  %4787 = vrot.lane.b32.xlu1 %v4457_v44, %s6210_s7  ;;  %v2687_v30 = vcombine.high %v2677_v13, %v8208_v19  ;;  %v2684_v44 = vrot.slane %v2670_v40, %v6943_v20 }
 0x5c0   : > { %v2688_v8 = vcombine.high %v2684_v44, %v8208_v19 }
 0x5c2   : > { %4851 = vrot.lane.b32.xlu1 %v4643_v4, %s6214_s21  ;;  %4867 = vrot.lane.b32.xlu0 %v4743_v11, %s6208_s2 }
 0x5c6   : > { %4859 = vrot.lane.b32.xlu1 %v4644_v5, %s6212_s23  ;;  %2808 = vrot.lane.b32.xlu0 %v2685_v2, %s6208_s2 }
 0x5ca   : > { %4803 = vrot.lane.b32.xlu1 %v4459_v41, %s6212_s23  ;;  %2816 = vrot.lane.b32.xlu0 %v2669_v59, %s6209_s4  ;;  %v7586_v41 = vpop.permute.xlu1 %2798 }
 0x5ce   : > { %4296 = vrot.lane.b32.xlu1 %v4216_v36, %s6205_s3  ;;  %2864 = vrot.lane.b32.xlu0 %v2747_v15, %s6208_s2  ;;  %v7592_v15 = vpop.permute.xlu1 %2846 }
 0x5d0   : > { %v7548_v17 = vpop.permute.xlu0 %3754 }
 0x5d2   : > { %2768 = vrot.lane.b32.xlu1 %v2501_v23, %s6211_s24  ;;  %2800 = vrot.lane.b32.xlu0 %v2503_v31, %s6212_s23  ;;  %v7596_v31 = vpop.permute.xlu1 %2854 }
 0x5d4   : > { %v7554_v51 = vpop.permute.xlu0 %3762 }
 0x5d6   : > { %2784 = vrot.lane.b32.xlu1 %v2502_v43, %s6210_s7  ;;  %v7599_v54 = vpop.permute.xlu1 %3794 }
 0x5d8   : > { %v7558_v48 = vpop.permute.xlu0 %3770 }
 0x5da   : > { %2792 = vrot.lane.b32.xlu1 %v2499_v18, %s6214_s21 }
 0x5dc   : > { %v7562_v7 = vpop.permute.xlu0 %3778 }
 0x5de   : > { %2832 = vrot.lane.b32.xlu1 %v2677_v13, %s6213_s22 }
 0x5e0   : > { %v7566_v24 = vpop.permute.xlu0 %3786 }
 0x5e2   : > { %2824 = vrot.lane.b32.xlu1 %v2686_v6, %s6211_s24 }
 0x5e4   : > { %v4756_v25 = vpop.permute.xlu0 %4755 }
 0x5e5   : > { %v4873_v4 = vsel %vm2868_vm8, %v4452_v38, %v4756_v25 }
 0x5e6   : > { %2840 = vrot.lane.b32.xlu1 %v2687_v30, %s6210_s7 }
 0x5e8   : > { %v4764_v1 = vpop.permute.xlu0 %4763 }
 0x5e9   : > { %v4875_v11 = vsel %vm1406_vm6, %v4873_v4, %v4764_v1 }
 0x5ea   : > { %2848 = vrot.lane.b32.xlu1 %v2684_v44, %s6214_s21 }
 0x5ec   : > { %v4772_v2 = vpop.permute.xlu0 %4771 }
 0x5ed   : > { %v4877_v5 = vsel %vm2873_vm9, %v4875_v11, %v4772_v2 }
 0x5ee   : > { %2856 = vrot.lane.b32.xlu1 %v2688_v8, %s6212_s23 }
 0x5f0   : > { %v4780_v59 = vpop.permute.xlu0 %4779 }
 0x5f1   : > { %v7584_v32 = vsel %vm2876_vm10, %v4877_v5, %v4780_v59 }
 0x5f4   : > { %v3811_v35 = vpop.permute.xlu0 %3810 }
 0x5f5   : > { %v3886_v42 = vsel %vm2868_vm8, %v3636_v45, %v3811_v35  ;;  %v7602_v45 = vpop.permute.xlu1 %3802 }
 0x5f8   : > { %v3819_v38 = vpop.permute.xlu0 %3818 }
 0x5f9   : > { %v3888_v36 = vsel %vm1406_vm6, %v3886_v42, %v3819_v38  ;;  %v4812_v40 = vpop.permute.xlu1 %4811 }
 0x5fa   : > { %v4887_v44 = vsel %vm2868_vm8, %v4637_v46, %v4812_v40 }
 0x5fc   : > { %v3827_v18 = vpop.permute.xlu0 %3826 }
 0x5fd   : > { %v3890_v23 = vsel %vm2873_vm9, %v3888_v36, %v3827_v18  ;;  %v7613_v11 = vpop.permute.xlu1 %3866 }
 0x600   : > { %v3835_v43 = vpop.permute.xlu0 %3834 }
 0x601   : > { %v3892_v12 = vsel %vm2876_vm10, %v3890_v23, %v3835_v43 }
 0x604   : > { %v3843_v13 = vpop.permute.xlu0 %3842 }
 0x605   : > { %v3894_v61 = vsel %vm2879_vm11, %v3892_v12, %v3843_v13 }
 0x608   : > { %v3851_v27 = vpop.permute.xlu0 %3850 }
 0x609   : > { %v3896_v6 = vsel %vm2882_vm12, %v3894_v61, %v3851_v27 }
 0x60c   : > { %v3859_v30 = vpop.permute.xlu0 %3858 }
 0x60d   : > { %v7606_v25 = vsel %vm2885_vm13, %v3896_v6, %v3859_v30 }
 0x610   : > { %v4820_v1 = vpop.permute.xlu0 %4819 }
 0x611   : > { %v4889_v8 = vsel %vm1406_vm6, %v4887_v44, %v4820_v1 }
 0x614   : > { %v4828_v4 = vpop.permute.xlu0 %4827 }
 0x615   : > { %v4891_v2 = vsel %vm2873_vm9, %v4889_v8, %v4828_v4 }
 0x618   : > { %v4836_v5 = vpop.permute.xlu0 %4835 }
 0x619   : > { %v4893_v59 = vsel %vm2876_vm10, %v4891_v2, %v4836_v5 }
 0x61c   : > { %v3292_v35 = vpop.permute.xlu1 %3291 }
 0x61d   : > { %v3466_v42 = vrot.slane %v3292_v35, %v6904_v57  ;;  %v3459_v36 = vcombine.high %v3292_v35, %v8208_v19 }
 0x61f   : > { %v7619_v38 = vrot.slane %v3466_v42, %v6943_v20  ;;  %v3474_v18 = vcombine.high %v3466_v42, %v8208_v19  ;;  %v3473_v6 = vrot.slane %v3459_v36, %v6904_v57 }
 0x620   : > { %v4293_v37 = vpop.permute.xlu1 %4292  ;;  %v7621_v58 = vpop.permute.xlu0 %3293 }
 0x621   : > { %8209 = vst [vmem:[#allocation35_spill] sm:$0xff] %v7619_v38  ;;  %v4467_v46 = vrot.slane %v4293_v37, %v6904_v57  ;;  %v3651_v23 = vrot.slane %v7621_v58, %v6904_v57  ;;  %v3504_v43 = vcombine.high %v7619_v38, %v8208_v19  ;;  %v3488_v30 = vrot.slane %v3474_v18, %v6943_v20 }
 0x622   : > { %v4460_v40 = vcombine.high %v4293_v37, %v8208_v19  ;;  %v3496_v42 = vrot.slane %v3473_v6, %v6943_v20 }
 0x623   : > { %v4475_v12 = vcombine.high %v4467_v46, %v8208_v19  ;;  %3756 = vrot.lane.b32.xlu1 %v3504_v43, %s6208_s2  ;;  %v7637_v27 = vrot.slane %v3651_v23, %v6943_v20  ;;  %v3659_v4 = vcombine.high %v3651_v23, %v8208_v19  ;;  %v7653_v35 = vrot.slane %v4467_v46, %v6943_v20 }
 0x624   : > { %v7632_v13 = vpop.permute.xlu1 %2752  ;;  %v7634_v61 = vpop.permute.xlu0 %4294  ;;  %v4474_v37 = vrot.slane %v4460_v40, %v6904_v57 }
 0x625   : > { %v4489_v44 = vrot.slane %v4475_v12, %v6943_v20  ;;  %v3689_v2 = vcombine.high %v7637_v27, %v8208_v19  ;;  %v7649_v5 = vrot.slane %v7634_v61, %v6904_v57  ;;  %8210 = vst [vmem:[#allocation34_spill] sm:$0xff] %v7653_v35  ;;  %v7659_v23 = vrot.slane %v3659_v4, %v6943_v20 }
 0x626   : > { %v4505_v46 = vcombine.high %v7653_v35, %v8208_v19  ;;  %v4490_v40 = vcombine.high %v4474_v37, %v8208_v19 }
 0x627   : > { %3764 = vrot.lane.b32.xlu1 %v3488_v30, %s6209_s4  ;;  %4765 = vrot.lane.b32.xlu0 %v4489_v44, %s6209_s4  ;;  %v4660_v43 = vcombine.high %v7649_v5, %v8208_v19 }
 0x628   : > { %v2761_v1 = vpop.permute.xlu1 %2760  ;;  %v3296_v8 = vpop.permute.xlu0 %3295  ;;  %v4504_v34 = vrot.slane %v4490_v40, %v6943_v20  ;;  %v3506_v40 = vcombine.high %v3496_v42, %v8208_v19 }
 0x629   : > { %v4674_v4 = vrot.slane %v4660_v43, %v6943_v20  ;;  %v7685_v35 = vrot.slane %v3296_v8, %v6943_v20  ;;  %v3489_v8 = vcombine.high %v3473_v6, %v8208_v19  ;;  %v4506_v6 = vcombine.high %v4489_v44, %v8208_v19 }
 0x62b   : > { %3780 = vrot.lane.b32.xlu1 %v3496_v42, %s6213_s22  ;;  %3812 = vrot.lane.b32.xlu0 %v3689_v2, %s6208_s2  ;;  %8212 = vst [vmem:[#allocation36_spill] sm:$0xff] %v7685_v35 }
 0x62c   : > { %v2777_v36 = vpop.permute.xlu1 %2776  ;;  %v4844_v18 = vpop.permute.xlu0 %4843 }
 0x62d   : > { %v7665_v12 = vsel %vm2879_vm11, %v4893_v59, %v4844_v18  ;;  %v4497_v18 = vrot.slane %v4474_v37, %v6943_v20  ;;  %v3751_v37 = vcombine.high %v7685_v35, %v8208_v19 }
 0x62f   : > { %4757 = vrot.lane.b32.xlu1 %v4505_v46, %s6208_s2  ;;  %3820 = vrot.lane.b32.xlu0 %v7659_v23, %s6209_s4 }
 0x630   : > { %v4788_v14 = vpop.permute.xlu1 %4787  ;;  %v4796_v49 = vpop.permute.xlu0 %4795 }
 0x631   : > { %v4881_v2 = vsel %vm2879_vm11, %v7584_v32, %v4788_v14  ;;  %v3505_v14 = vcombine.high %v3488_v30, %v8208_v19  ;;  %v4691_v30 = vcombine.high %v4674_v4, %v8208_v19 }
 0x632   : > { %v7677_v59 = vsel %vm2882_vm12, %v4881_v2, %v4796_v49  ;;  %v4508_v49 = vcombine.high %v4504_v34, %v8208_v19 }
 0x633   : > { %8211 = vst [vmem:[#allocation33_spill] sm:$0xff] %v7677_v59  ;;  %4781 = vrot.lane.b32.xlu1 %v4497_v18, %s6213_s22  ;;  %4821 = vrot.lane.b32.xlu0 %v4674_v4, %s6209_s4  ;;  %v3644_v4 = vcombine.high %v7621_v58, %v8208_v19  ;;  %s5210_s4 = scalar_lea.sflag [#allocation18], %s6470_s18 }
 0x634   : > { %v7682_v46 = vpop.permute.xlu1 %4851  ;;  %v7688_v43 = vpop.permute.xlu0 %4867 }
 0x637   : > { %3772 = vrot.lane.b32.xlu1 %v3505_v14, %s6211_s24  ;;  %4805 = vrot.lane.b32.xlu0 %v4508_v49, %s6212_s23  ;;  %v3503_v14 = vrot.slane %v3489_v8, %v6943_v20  ;;  %v4507_v8 = vcombine.high %v4497_v18, %v8208_v19  ;;  %v7733_v18 = vrot.slane %v7649_v5, %v6943_v20 }
 0x638   : > { %v7693_v32 = vpop.permute.xlu1 %4859  ;;  %v2809_v2 = vpop.permute.xlu0 %2808 }
 0x639   : > { %v4690_v5 = vcombine.high %v7733_v18, %v8208_v19 }
 0x63b   : > { %3788 = vrot.lane.b32.xlu1 %v3506_v40, %s6210_s7  ;;  %3868 = vrot.lane.b32.xlu0 %v3751_v37, %s6208_s2 }
 0x63c   : > { %v7701_v38 = vpop.permute.xlu1 %4803  ;;  %v2817_v59 = vpop.permute.xlu0 %2816 }
 0x63d   : > { %8213 = vst [vmem:[#allocation37_spill] sm:$0xff] %v7701_v38 }
 0x63f   : > { %3796 = vrot.lane.b32.xlu1 %v3503_v14, %s6214_s21  ;;  %4829 = vrot.lane.b32.xlu0 %v4691_v30, %s6211_s24 }
 0x640   : > { %v4297_v35 = vpop.permute.xlu1 %4296  ;;  %v2865_v44 = vpop.permute.xlu0 %2864 }
 0x641   : > { %v7708_v49 = vrot.slane %v4297_v35, %v6943_v20  ;;  %v2870_v35 = vsel %vm2868_vm8, %v7471_v63, %v7632_v13 }
 0x642   : > { %v2872_v40 = vsel %vm1406_vm6, %v2870_v35, %v2761_v1 }
 0x643   : > { %8214 = vst [vmem:[#allocation38_spill] sm:$0xff] %v7708_v49  ;;  %v4752_v42 = vcombine.high %v7708_v49, %v8208_v19  ;;  %4773 = vrot.lane.b32.xlu1 %v4506_v6, %s6211_s24  ;;  %v3658_v49 = vrot.slane %v3644_v4, %v6904_v57  ;;  %v8216_v4 = vld [vmem:[#allocation32_spill] sm:$0xff] }
 0x644   : > { %v2769_v37 = vpop.permute.xlu1 %2768  ;;  %v2801_v63 = vpop.permute.xlu0 %2800 }
 0x645   : > { %4869 = vrot.lane.b32.xlu0 %v4752_v42, %s6208_s2  ;;  %v2875_v30 = vsel %vm2873_vm9, %v2872_v40, %v2769_v37  ;;  %v3681_v1 = vrot.slane %v3658_v49, %v6943_v20 }
 0x646   : > { %v2878_v42 = vsel %vm2876_vm10, %v2875_v30, %v2777_v36 }
 0x647   : > { %4789 = vrot.lane.b32.xlu1 %v4507_v8, %s6210_s7  ;;  %v4645_v8 = vcombine.high %v7634_v61, %v8208_v19 }
 0x648   : > { %v2785_v6 = vpop.permute.xlu1 %2784 }
 0x649   : > { %v2881_v58 = vsel %vm2879_vm11, %v2878_v42, %v2785_v6  ;;  %v4659_v30 = vrot.slane %v4645_v8, %v6904_v57  ;;  %v3507_v6 = vcombine.high %v3503_v14, %v8208_v19  ;;  %v8218_v42 = vcombine.low %v7329_v47, %v7332_v21 }
 0x64a   : > { %v2903_v14 = vsel %vm2868_vm8, %v7530_v9, %v2865_v44  ;;  %v3674_v21 = vcombine.high %v3658_v49, %v8208_v19  ;;  %v8219_v9 = vcombine.low %v7338_v26, %v7318_v39 }
 0x64b   : > { %4797 = vrot.lane.b32.xlu1 %v4504_v34, %s6214_s21  ;;  %v8215_v34 = vld [vmem:[#allocation31_spill] sm:$0xff]  ;;  %v3900_v57 = vsel %vm2868_vm8, %v8218_v42, %v7613_v11  ;;  %v4675_v26 = vcombine.high %v4659_v30, %v8208_v19 }
 0x64c   : > { %v2793_v38 = vpop.permute.xlu1 %2792  ;;  %v8217_v35 = vcombine.low %v8215_v34, %v8216_v4  ;;  %v7783_v11 = vsel %vm2868_vm8, %v8219_v9, %v7688_v43  ;;  %v3688_v39 = vrot.slane %v3674_v21, %v6943_v20  ;;  %v8228_v21 = vld [vmem:[#allocation33_spill] sm:$0xff] }
 0x64d   : > { %v2884_v13 = vsel %vm2882_vm12, %v2881_v58, %v2793_v38  ;;  %v4689_v8 = vrot.slane %v4675_v26, %v6943_v20 }
 0x64e   : > { %v7736_v37 = vsel %vm2885_vm13, %v2884_v13, %v2801_v63  ;;  %v2902_v38 = vsel %vm2868_vm8, %v8217_v35, %v7542_v28  ;;  %v4682_v28 = vrot.slane %v4659_v30, %v6943_v20  ;;  %v2889_v63 = vsel %vm2868_vm8, %v7516_v16, %v2809_v2  ;;  %v8223_v20 = vld [vmem:[#allocation28_spill] sm:$0xff] }
 0x64f   : > { %2919 = vrot.lane.b32.xlu0 %v7736_v37, %s6212_s23  ;;  %3836 = vrot.lane.b32.xlu1 %v3681_v1, %s6213_s22  ;;  %v3690_v13 = vcombine.high %v7659_v23, %v8208_v19  ;;  %v2891_v34 = vsel %vm1406_vm6, %v2889_v63, %v2817_v59  ;;  %v3691_v16 = vcombine.high %v3681_v1, %v8208_v19  ;;  %v8220_v1 = vld [vmem:[#allocation30_spill] sm:$0xff] }
 0x650   : > { %v2833_v36 = vpop.permute.xlu1 %2832  ;;  %v4692_v43 = vcombine.high %v4682_v28, %v8208_v19  ;;  %v4693_v42 = vcombine.high %v4689_v8, %v8208_v19 }
 0x653   : > { %2917 = vrot.lane.b32.xlu0 %v2902_v38, %s6212_s23  ;;  %4813 = vrot.lane.b32.xlu1 %v4690_v5, %s6208_s2  ;;  %s8063_s2 = scalar_lea.hbm %s8138_s14, %s5543_s26 }
 0x654   : > { %v2825_v40 = vpop.permute.xlu1 %2824 }
 0x655   : > { %v2893_v47 = vsel %vm2873_vm9, %v2891_v34, %v2825_v40 }
 0x656   : > { %v2895_v23 = vsel %vm2876_vm10, %v2893_v47, %v2833_v36  ;;  %v8221_v36 = vld [vmem:[#allocation29_spill] sm:$0xff] }
 0x657   : > { %3097 = vrot.lane.b32.xlu0 %v7736_v37, %s6214_s21  ;;  %3804 = vrot.lane.b32.xlu1 %v3507_v6, %s6212_s23  ;;  %v8222_v4 = vcombine.low %v8220_v1, %v8221_v36  ;;  %v3692_v6 = vcombine.high %v3688_v39, %v8208_v19  ;;  %v8227_v47 = vld [vmem:[#allocation37_spill] sm:$0xff] }
 0x658   : > { %v2841_v61 = vpop.permute.xlu1 %2840  ;;  %v7899_v9 = vsel %vm2885_vm13, %v8228_v21, %v8227_v47 }
 0x659   : > { %v2897_v2 = vsel %vm2879_vm11, %v2895_v23, %v2841_v61  ;;  %v2888_v35 = vsel %vm2868_vm8, %v8222_v4, %v7482_v62  ;;  %v8229_v23 = vld [vmem:[#allocation36_spill] sm:$0xff] }
 0x65b   : > { %3095 = vrot.lane.b32.xlu0 %v2902_v38, %s6214_s21  ;;  %4837 = vrot.lane.b32.xlu1 %v4682_v28, %s6213_s22  ;;  %v2890_v38 = vsel %vm1406_vm6, %v2888_v35, %v7495_v10  ;;  %v8224_v10 = vld [vmem:[#allocation27_spill] sm:$0xff] }
 0x65c   : > { %v2849_v58 = vpop.permute.xlu1 %2848  ;;  %v2892_v5 = vsel %vm2873_vm9, %v2890_v38, %v7510_v56  ;;  %v8225_v28 = vcombine.low %v8223_v20, %v8224_v10 }
 0x65d   : > { %v2899_v49 = vsel %vm2882_vm12, %v2897_v2, %v2849_v58  ;;  %v2894_v40 = vsel %vm2876_vm10, %v2892_v5, %v7525_v53 }
 0x65e   : > { %v2896_v30 = vsel %vm2879_vm11, %v2894_v40, %v7533_v22  ;;  %v2869_v56 = vsel %vm2868_vm8, %v8225_v28, %v7418_v29 }
 0x65f   : > { %3996 = vrot.lane.b32.xlu0 %v3900_v57, %s6212_s23  ;;  %2923 = vrot.lane.b32.xlu1 %v2903_v14, %s6212_s23  ;;  %v2898_v62 = vsel %vm2882_vm12, %v2896_v30, %v7592_v15  ;;  %v2871_v53 = vsel %vm1406_vm6, %v2869_v56, %v7435_v55 }
 0x660   : > { %v2857_v59 = vpop.permute.xlu1 %2856  ;;  %v2874_v61 = vsel %vm2873_vm9, %v2871_v53, %v7452_v0  ;;  %v7834_v22 = vsel %vm2885_vm13, %v2898_v62, %v7596_v31 }
 0x661   : > { %v7793_v44 = vsel %vm2885_vm13, %v2899_v49, %v2857_v59  ;;  %v2877_v15 = vsel %vm2876_vm10, %v2874_v61, %v7459_v52  ;;  %v8226_v52 = vcombine.low %v7209_v3, %v7193_v60  ;;  %v8232_v61 = vld [vmem:[#allocation34_spill] sm:$0xff] }
 0x662   : > { %v2880_v29 = vsel %vm2879_vm11, %v2877_v15, %v7580_v50 }
 0x663   : > { %4096 = vrot.lane.b32.xlu0 %v3900_v57, %s6214_s21  ;;  %3828 = vrot.lane.b32.xlu1 %v3690_v13, %s6211_s24  ;;  %v2883_v55 = vsel %vm2882_vm12, %v2880_v29, %v7468_v33  ;;  %v3872_v33 = vsel %vm2868_vm8, %v8226_v52, %v7548_v17  ;;  %s6216_s24 = smov [#allocation17]  }
 0x664   : > { %v7848_v0 = vsel %vm2885_vm13, %v2883_v55, %v7586_v41  ;;  %v3874_v50 = vsel %vm1406_vm6, %v3872_v33, %v7554_v51 }
 0x665   : > { %v3876_v41 = vsel %vm2873_vm9, %v3874_v50, %v7558_v48 }
 0x666   : > { %v3878_v31 = vsel %vm2876_vm10, %v3876_v41, %v7562_v7 }
 0x667   : > { %4997 = vrot.lane.b32.xlu0 %v7783_v11, %s6212_s23  ;;  %3844 = vrot.lane.b32.xlu1 %v3691_v16, %s6210_s7  ;;  %v3880_v57 = vsel %vm2879_vm11, %v3878_v31, %v7566_v24 }
 0x668   : > { %v3882_v60 = vsel %vm2882_vm12, %v3880_v57, %v7599_v54  ;;  %v4897_v54 = vsel %vm2882_vm12, %v7665_v12, %v7682_v46 }
 0x669   : > { %v7876_v17 = vsel %vm2885_vm13, %v3882_v60, %v7602_v45  ;;  %v7889_v45 = vsel %vm2885_vm13, %v4897_v54, %v7693_v32 }
 0x66b   : > { %2921 = vrot.lane.b32.xlu0 %v7793_v44, %s6212_s23  ;;  %3852 = vrot.lane.b32.xlu1 %v3688_v39, %s6214_s21 }
 0x66f   : > { %3099 = vrot.lane.b32.xlu0 %v7793_v44, %s6214_s21  ;;  %4845 = vrot.lane.b32.xlu1 %v4692_v43, %s6210_s7  ;;  %v8230_v43 = vld [vmem:[#allocation38_spill] sm:$0xff]  ;;  %s6078_s7 = scalar_lea.vmem %s8058_s11, 512 }
 0x670   : > { %p6079_p8 = scmp.ne.s32.totalorder %s8058_s11, %s6078_s7 }
 0x672   : > { %p6080_p3 = pnand %p6079_p8, %p8233_p12 }
 0x673   : > { %4853 = vrot.lane.b32.xlu1 %v4689_v8, %s6214_s21  ;;  %v8231_v8 = vld [vmem:[#allocation35_spill] sm:$0xff] }
 0x674   : > { %p6081_p1 = pneg %p6080_p3 }
 0x677   : > { %3860 = vrot.lane.b32.xlu1 %v3692_v6, %s6212_s23 }
 0x67b   : > { %2915 = vrot.lane.b32.xlu1 %v7834_v22, %s6212_s23 }
 0x67f   : > { %4861 = vrot.lane.b32.xlu1 %v4693_v42, %s6212_s23 }
 0x683   : > { %2913 = vrot.lane.b32.xlu1 %v7848_v0, %s6212_s23 }
 0x687   : > { %3101 = vrot.lane.b32.xlu1 %v2903_v14, %s6214_s21 }
 0x68b   : > { %3093 = vrot.lane.b32.xlu1 %v7834_v22, %s6214_s21 }
 0x68f   : > { %3091 = vrot.lane.b32.xlu1 %v7848_v0, %s6214_s21 }
 0x693   : > { %3994 = vrot.lane.b32.xlu1 %v7606_v25, %s6212_s23 }
 0x695   : > { %v3757_v3 = vpop.permute.xlu1 %3756 }
 0x696   : > { %v3873_v5 = vsel %vm2868_vm8, %v8231_v8, %v3757_v3 }
 0x697   : > { %3992 = vrot.lane.b32.xlu1 %v7876_v17, %s6212_s23 }
 0x699   : > { %v3765_v51 = vpop.permute.xlu1 %3764  ;;  %v4766_v48 = vpop.permute.xlu0 %4765 }
 0x69a   : > { %v3875_v40 = vsel %vm1406_vm6, %v3873_v5, %v3765_v51 }
 0x69b   : > { %4094 = vrot.lane.b32.xlu1 %v7606_v25, %s6214_s21 }
 0x69d   : > { %v3781_v7 = vpop.permute.xlu1 %3780  ;;  %v3813_v24 = vpop.permute.xlu0 %3812 }
 0x69e   : > { %v3887_v58 = vsel %vm2868_vm8, %v7637_v27, %v3813_v24 }
 0x69f   : > { %4092 = vrot.lane.b32.xlu1 %v7876_v17, %s6214_s21 }
 0x6a1   : > { %v4758_v14 = vpop.permute.xlu1 %4757  ;;  %v3821_v63 = vpop.permute.xlu0 %3820 }
 0x6a2   : > { %v3889_v13 = vsel %vm1406_vm6, %v3887_v58, %v3821_v63  ;;  %v4874_v15 = vsel %vm2868_vm8, %v8232_v61, %v4758_v14 }
 0x6a3   : > { %4995 = vrot.lane.b32.xlu1 %v7889_v45, %s6212_s23  ;;  %v4876_v55 = vsel %vm1406_vm6, %v4874_v15, %v4766_v48 }
 0x6a5   : > { %v4782_v34 = vpop.permute.xlu1 %4781  ;;  %v7901_v12 = vpop.permute.xlu0 %4821 }
 0x6a7   : > { %4993 = vrot.lane.b32.xlu1 %v7899_v9, %s6212_s23 }
 0x6a9   : > { %v3773_v46 = vpop.permute.xlu1 %3772  ;;  %v4806_v32 = vpop.permute.xlu0 %4805 }
 0x6aa   : > { %v3877_v30 = vsel %vm2873_vm9, %v3875_v40, %v3773_v46 }
 0x6ab   : > { %v3879_v20 = vsel %vm2876_vm10, %v3877_v30, %v3781_v7  ;;  %v2904_v30 = vld [vmem:[#allocation15] sm:$0xf] }
 0x6ad   : > { %v3789_v27 = vpop.permute.xlu1 %3788  ;;  %v3869_v16 = vpop.permute.xlu0 %3868 }
 0x6ae   : > { %v3901_v59 = vsel %vm2868_vm8, %v8229_v23, %v3869_v16  ;;  %v3881_v10 = vsel %vm2879_vm11, %v3879_v20, %v3789_v27 }
 0x6af   : > { %4002 = vrot.lane.b32.xlu1 %v3901_v59, %s6212_s23 }
 0x6b1   : > { %v3797_v2 = vpop.permute.xlu1 %3796  ;;  %v4830_v49 = vpop.permute.xlu0 %4829 }
 0x6b2   : > { %v3883_v56 = vsel %vm2882_vm12, %v3881_v10, %v3797_v2 }
 0x6b5   : > { %v4774_v39 = vpop.permute.xlu1 %4773 }
 0x6b6   : > { %v4878_v33 = vsel %vm2873_vm9, %v4876_v55, %v4774_v39 }
 0x6b7   : > { %v4870_v26 = vpop.permute.xlu0 %4869  ;;  %v4880_v41 = vsel %vm2876_vm10, %v4878_v33, %v4782_v34 }
 0x6b8   : > { %v4902_v1 = vsel %vm2868_vm8, %v8230_v43, %v4870_v26 }
 0x6b9   : > { %5003 = vrot.lane.b32.xlu1 %v4902_v1, %s6212_s23  ;;  %v4790_v36 = vpop.permute.xlu1 %4789 }
 0x6ba   : > { %v4882_v57 = vsel %vm2879_vm11, %v4880_v41, %v4790_v36 }
 0x6bd   : > { %v4798_v4 = vpop.permute.xlu1 %4797 }
 0x6be   : > { %v4884_v60 = vsel %vm2882_vm12, %v4882_v57, %v4798_v4 }
 0x6bf   : > { %v7942_v48 = vsel %vm2885_vm13, %v4884_v60, %v4806_v32 }
 0x6c1   : > { %v2920_v35 = vpop.permute.xlu0 %2919  ;;  %v3837_v38 = vpop.permute.xlu1 %3836 }
 0x6c5   : > { %v2918_v6 = vpop.permute.xlu0 %2917  ;;  %v4814_v62 = vpop.permute.xlu1 %4813 }
 0x6c6   : > { %v4888_v32 = vsel %vm2868_vm8, %v7733_v18, %v4814_v62  ;;  %v6215_v18 = vmov 0   ;;  %v3090_v62 = vld [vmem:[#allocation15 + $0x18] sm:$0xf] }
 0x6c7   : > { %v4890_v2 = vsel %vm1406_vm6, %v4888_v32, %v7901_v12  ;;  %5893 = vset.pattern.permute.xlu0 %v6215_v18 }
 0x6c8   : > { %v4892_v39 = vsel %vm2873_vm9, %v4890_v2, %v4830_v49 }
 0x6c9   : > { %v7917_v28 = vpop.permute.xlu0 %3097  ;;  %v3805_v53 = vpop.permute.xlu1 %3804 }
 0x6ca   : > { %v7923_v42 = vsel %vm2885_vm13, %v3883_v56, %v3805_v53 }
 0x6cb   : > { %3998 = vrot.lane.b32.xlu0 %v7923_v42, %s6212_s23 }
 0x6cd   : > { %v7927_v29 = vpop.permute.xlu0 %3095  ;;  %v4838_v52 = vpop.permute.xlu1 %4837 }
 0x6ce   : > { %v4894_v43 = vsel %vm2876_vm10, %v4892_v39, %v4838_v52 }
 0x6cf   : > { %4102 = vrot.lane.b32.xlu0 %v3901_v59, %s6214_s21 }
 0x6d1   : > { %v7932_v50 = vpop.permute.xlu0 %3996  ;;  %v2924_v31 = vpop.permute.xlu1 %2923 }
 0x6d3   : > { %4098 = vrot.lane.b32.xlu0 %v7923_v42, %s6214_s21 }
 0x6d5   : > { %v7939_v3 = vpop.permute.xlu0 %4096  ;;  %v3829_v51 = vpop.permute.xlu1 %3828 }
 0x6d6   : > { %v3891_v47 = vsel %vm2873_vm9, %v3889_v13, %v3829_v51 }
 0x6d7   : > { %4999 = vrot.lane.b32.xlu0 %v7942_v48, %s6212_s23  ;;  %v3893_v46 = vsel %vm2876_vm10, %v3891_v47, %v3837_v38  ;;  %v2906_v38 = vld [vmem:[#allocation15 + $0xc] sm:$0xf] }
 0x6d9   : > { %v7946_v7 = vpop.permute.xlu0 %4997  ;;  %v3845_v24 = vpop.permute.xlu1 %3844 }
 0x6da   : > { %v3895_v27 = vsel %vm2879_vm11, %v3893_v46, %v3845_v24  ;;  %v4091_v46 = vld [vmem:[#allocation15 + $0x1c] sm:$0xf] }
 0x6db   : > { %5103 = vrot.lane.b32.xlu0 %v4902_v1, %s6214_s21 }
 0x6dd   : > { %v2922_v54 = vpop.permute.xlu0 %2921  ;;  %v3853_v14 = vpop.permute.xlu1 %3852 }
 0x6de   : > { %v2927_v58 = vsel %vm2885_vm13, %v2920_v35, %v2922_v54  ;;  %v2928_v63 = vsel %vm2885_vm13, %v2922_v54, %v2924_v31  ;;  %v3897_v16 = vsel %vm2882_vm12, %v3895_v27, %v3853_v14 }
 0x6df   : > { %5505 = vmatprep.subr.msk.mxu1 %vm2935_vm14, %v2928_v63 }
 0x6e0   : > { %5506 = vmatpush1.msk.msra.mxu1 %vm2935_vm14, %v2927_v58  ;;  %v3987_v58 = vld [vmem:[#allocation15 + $0x10] sm:$0xf] }
 0x6e1   : > { %v4846_v34 = vpop.permute.xlu1 %4845  ;;  %v3100_v8 = vpop.permute.xlu0 %3099 }
 0x6e2   : > { %v4896_v12 = vsel %vm2879_vm11, %v4894_v43, %v4846_v34 }
 0x6e5   : > { %v4854_v21 = vpop.permute.xlu1 %4853 }
 0x6e6   : > { %v4898_v1 = vsel %vm2882_vm12, %v4896_v12, %v4854_v21 }
 0x6e9   : > { %v3861_v23 = vpop.permute.xlu1 %3860 }
 0x6ea   : > { %v3899_v59 = vsel %vm2885_vm13, %v3897_v16, %v3861_v23 }
 0x6eb   : > { %4000 = vrot.lane.b32.xlu0 %v3899_v59, %s6212_s23  ;;  %4100 = vrot.lane.b32.xlu1 %v3899_v59, %s6214_s21 }
 0x6ed   : > { %v2916_v13 = vpop.permute.xlu1 %2915 }
 0x6ee   : > { %v2926_v26 = vsel %vm2885_vm13, %v2916_v13, %v2918_v6 }
 0x6ef   : > { %5099 = vrot.lane.b32.xlu0 %v7942_v48, %s6214_s21  ;;  %5095 = vrot.lane.b32.xlu1 %v7889_v45, %s6214_s21 }
 0x6f0   : > { %2970 = vmatprep.subr.mxu1 %v2926_v26 }
 0x6f1   : > { %v4862_v36 = vpop.permute.xlu1 %4861 }
 0x6f2   : > { %v7974_v49 = vsel %vm2885_vm13, %v4898_v1, %v4862_v36 }
 0x6f3   : > { %5001 = vrot.lane.b32.xlu0 %v7974_v49, %s6212_s23  ;;  %5101 = vrot.lane.b32.xlu1 %v7974_v49, %s6214_s21  ;;  %s6082_s23 = sshll.u32 %s6216_s24, 4  ;;  %s6083_s23 = int_to_ptr.vmem [resolvable:$false] %s6082_s23 }
 0x6f4   : > { %s6084_s20 = scalar_lea.vmem %s6083_s23, 1024  ;;  %p6085_p6 = scmp.lt.s32.totalorder %s8058_s11, %s6083_s23 }
 0x6f5   : > { %v2914_v4 = vpop.permute.xlu1 %2913  ;;  %p6086_p9 = scmp.lt.s32.totalorder %s6084_s20, %s6078_s7 }
 0x6f6   : > { %v2925_v35 = vsel %vm2885_vm13, %v2914_v4, %v2916_v13 }
 0x6f7   : > { %5097 = vrot.lane.b32.xlu0 %v7783_v11, %s6214_s21  ;;  %5093 = vrot.lane.b32.xlu1 %v7899_v9, %s6214_s21  ;;  %v3105_v11 = vsel %vm2882_vm12, %v7917_v28, %v3100_v8  ;;  %p6087_p10 = por %p6086_p9, %p6085_p6 }
 0x6f8   : > { %2971 = vmatpush1.msra.mxu1 %v2925_v35 }
 0x6f9   : > { %5508 = vmatprep.subr.msk.mxu1 %vm2935_vm14, %v7793_v44  ;;  %v3102_v5 = vpop.permute.xlu1 %3101  ;;  %5507 = vmatmul.mubr.msk.f32.vlgmr.msra.gmra.mxu1 %vm2931_vm15, %v2906_v38  ;;  %p6088_p11 = pnand %p6087_p10, %p6081_p1 }
 0x6fa   : > { %v3106_v40 = vsel %vm2882_vm12, %v3100_v8, %v3102_v5  ;;  %5509 = vmatpush1.msk.msra.mxu1 %vm2935_vm14, %v7736_v37  ;;  %3082 = vmatprep.mubr.f32.mxu1 %v8208_v19  ;;  %v5191_v37 = vld [vmem:[%s8136_s12] sm:$0xf] }
 0x6fb   : > { %3048 = vmatprep.subr.mxu1 %v7834_v22  ;;  %5511 = vmatprep.subr.msk.mxu0 %vm2935_vm14, %v3106_v40 }
 0x6fc   : > { %3049 = vmatpush1.msra.mxu1 %v7848_v0  ;;  %5512 = vmatpush1.msk.msra.mxu0 %vm2935_vm14, %v3105_v11  ;;  %v3903_v0 = vld [vmem:[#allocation15 + $0x4] sm:$0xf] }
 0x6fd   : > { %5514 = vmatprep.subr.msk.mxu1 %vm2935_vm14, %v3899_v59  ;;  %v3094_v44 = vpop.permute.xlu1 %3093  ;;  %5510 = vmatmul.mubr.msk.f32.vlgmr.msra.gmra.mxu1 %vm2931_vm15, %v2904_v30 }
 0x6fe   : > { %5515 = vmatpush1.msk.msra.mxu1 %vm2935_vm14, %v7923_v42  ;;  %v3104_v22 = vsel %vm2882_vm12, %v3094_v44, %v7927_v29  ;;  %3977 = vmatprep.mubr.f32.mxu1 %v8208_v19 }
 0x6ff   : > { %3943 = vmatprep.subr.mxu1 %v7606_v25  ;;  %3146 = vmatprep.subr.mxu0 %v3104_v22 }
 0x700   : > { %3944 = vmatpush1.msra.mxu1 %v7876_v17  ;;  %5194 = vperm.xlu0 %5893, %v5191_v37  }
 0x701   : > { %v3092_v6 = vpop.permute.xlu1 %3091  ;;  %5516 = vmatmul.mubr.msk.f32.vlgmr.msra.gmra.mxu1 %vm2931_vm15, %v3903_v0 }
 0x702   : > { %v3103_v20 = vsel %vm2882_vm12, %v3092_v6, %v3094_v44  ;;  %4181 = vmatprep.mubr.f32.mxu1 %v8208_v19 }
 0x703   : > { %3147 = vmatpush1.msra.mxu0 %v3103_v20 }
 0x704   : > { %5513 = vmatmul.mubr.msk.f32.vlgmr.msra.gmra.mxu0 %vm2931_vm15, %v3090_v62 }
 0x705   : > { %4081 = vmatprep.mubr.f32.mxu0 %v8208_v19  ;;  %v3995_v10 = vpop.permute.xlu1 %3994 }
 0x706   : > { %v4005_v54 = vsel %vm2885_vm13, %v3995_v10, %v7932_v50  ;;  %v4904_v50 = vld [vmem:[#allocation15 + $0x8] sm:$0xf] }
 0x709   : > { %v3993_v28 = vpop.permute.xlu1 %3992 }
 0x70a   : > { %v4004_v63 = vsel %vm2885_vm13, %v3993_v28, %v3995_v10 }
 0x70d   : > { %v4095_v25 = vpop.permute.xlu1 %4094 }
 0x70e   : > { %v4105_v14 = vsel %vm2882_vm12, %v4095_v25, %v7939_v3 }
 0x711   : > { %v4093_v53 = vpop.permute.xlu1 %4092 }
 0x712   : > { %v4104_v34 = vsel %vm2882_vm12, %v4093_v53, %v4095_v25 }
 0x715   : > { %v4996_v61 = vpop.permute.xlu1 %4995 }
 0x719   : > { %v4994_v42 = vpop.permute.xlu1 %4993 }
 0x71a   : > { %v5005_v2 = vsel %vm2885_vm13, %v4994_v42, %v4996_v61 }
 0x721   : > { %v4003_v55 = vpop.permute.xlu1 %4002 }
 0x72b   : > { %v5004_v52 = vpop.permute.xlu1 %5003 }
 0x73d   : > { %v3999_v56 = vpop.permute.xlu0 %3998 }
 0x741   : > { %v4103_v17 = vpop.permute.xlu0 %4102 }
 0x745   : > { %v4099_v15 = vpop.permute.xlu0 %4098 }
 0x749   : > { %v5000_v29 = vpop.permute.xlu0 %4999 }
 0x74d   : > { %v5104_v33 = vpop.permute.xlu0 %5103 }
 0x75d   : > { %v4101_v41 = vpop.permute.xlu1 %4100  ;;  %v4001_v31 = vpop.permute.xlu0 %4000 }
 0x75e   : > { %v4106_v57 = vsel %vm2882_vm12, %v4099_v15, %v4101_v41  ;;  %v4107_v60 = vsel %vm2882_vm12, %v4101_v41, %v4103_v17  ;;  %v4006_v51 = vsel %vm2885_vm13, %v3999_v56, %v4001_v31  ;;  %v4007_v24 = vsel %vm2885_vm13, %v4001_v31, %v4003_v55 }
 0x75f   : > { %5517 = vmatprep.subr.msk.mxu0 %vm2935_vm14, %v4007_v24  ;;  %5520 = vmatprep.subr.msk.mxu1 %vm2935_vm14, %v4107_v60 }
 0x760   : > { %5518 = vmatpush1.msk.msra.mxu0 %vm2935_vm14, %v4006_v51  ;;  %5521 = vmatpush1.msk.msra.mxu1 %vm2935_vm14, %v4106_v57 }
 0x761   : > { %v5096_v47 = vpop.permute.xlu1 %5095  ;;  %4047 = vmatprep.subr.mxu0 %v4005_v54  ;;  %4147 = vmatprep.subr.mxu1 %v4105_v14  ;;  %v5100_v21 = vpop.permute.xlu0 %5099 }
 0x762   : > { %4048 = vmatpush1.msra.mxu0 %v4004_v63  ;;  %4148 = vmatpush1.msra.mxu1 %v4104_v34 }
 0x763   : > { %5519 = vmatmul.mubr.msk.f32.vlgmr.msra.gmra.mxu0 %vm2931_vm15, %v3987_v58  ;;  %5523 = vmatprep.subr.msk.mxu0 %vm2935_vm14, %v7974_v49 }
 0x764   : > { %5524 = vmatpush1.msk.msra.mxu0 %vm2935_vm14, %v7942_v48  ;;  %5522 = vmatmul.mubr.msk.f32.vlgmr.msra.gmra.mxu1 %vm2931_vm15, %v4091_v46  ;;  %v4988_v48 = vld [vmem:[#allocation15 + $0x14] sm:$0xf] }
 0x765   : > { %v5102_v3 = vpop.permute.xlu1 %5101  ;;  %4944 = vmatprep.subr.mxu0 %v7889_v45  ;;  %v5002_v32 = vpop.permute.xlu0 %5001  ;;  %4978 = vmatprep.mubr.f32.mxu0 %v8208_v19  ;;  %v5006_v45 = vsel %vm2885_vm13, %v4996_v61, %v7946_v7  ;;  %v5092_v7 = vld [vmem:[#allocation15 + $0x20] sm:$0xf] }
 0x766   : > { %v5107_v27 = vsel %vm2882_vm12, %v5100_v21, %v5102_v3  ;;  %v5108_v16 = vsel %vm2882_vm12, %v5102_v3, %v5104_v33  ;;  %v5007_v23 = vsel %vm2885_vm13, %v5000_v29, %v5002_v32  ;;  %v5008_v59 = vsel %vm2885_vm13, %v5002_v32, %v5004_v52  ;;  %4945 = vmatpush1.msra.mxu0 %v7899_v9 }
 0x767   : > { %5525 = vmatmul.mubr.msk.f32.vlgmr.msra.gmra.mxu0 %vm2931_vm15, %v4904_v50  ;;  %5526 = vmatprep.subr.msk.mxu1 %vm2935_vm14, %v5008_v59 }
 0x768   : > { %5529 = vmatprep.subr.msk.mxu0 %vm2935_vm14, %v5108_v16  ;;  %5527 = vmatpush1.msk.msra.mxu1 %vm2935_vm14, %v5007_v23 }
 0x769   : > { %5530 = vmatpush1.msk.msra.mxu0 %vm2935_vm14, %v5107_v27  ;;  %v5094_v13 = vpop.permute.xlu1 %5093  ;;  %5048 = vmatprep.subr.mxu1 %v5006_v45  ;;  %v5098_v9 = vpop.permute.xlu0 %5097 }
 0x76a   : > { %v5105_v39 = vsel %vm2882_vm12, %v5094_v13, %v5096_v47  ;;  %5049 = vmatpush1.msra.mxu1 %v5005_v2  ;;  %5082 = vmatprep.mubr.f32.mxu1 %v8208_v19  ;;  %v5106_v26 = vsel %vm2882_vm12, %v5096_v47, %v5098_v9 }
 0x76b   : > { %5528 = vmatmul.mubr.msk.f32.vlgmr.msra.gmra.mxu1 %vm2931_vm15, %v4988_v48  ;;  %5148 = vmatprep.subr.mxu0 %v5106_v26 }
 0x76c   : > { %5149 = vmatpush1.msra.mxu0 %v5105_v39  ;;  %5182 = vmatprep.mubr.f32.mxu0 %v8208_v19 }
 0x76d   : > { %5531 = vmatmul.mubr.msk.f32.vlgmr.msra.gmra.mxu0 %vm2931_vm15, %v5092_v7 }
 0x76e   : > { %6091 = shalt.err (!%p6088_p11)
}
 0x76f   : > { %s6092_s22 = scalar_lea.hbm %s8063_s2, 512  ;;  %s6096_s3 = scalar_lea.hbm %s8138_s14, 1024 }
 0x770   : > { %p6093_p4 = scmp.ne.s32.totalorder %s8063_s2, %s6092_s22  ;;  %p6097_p0 = scmp.lt.s32.totalorder %s8063_s2, %s8138_s14 }
 0x771   : > { %p6098_p2 = scmp.lt.s32.totalorder %s6096_s3, %s6092_s22 }
 0x772   : > { %p6094_p7 = pnand %p6093_p4, %p8233_p12 }
 0x773   : > { %p6099_p5 = por %p6098_p2, %p6097_p0 }
 0x774   : > { %p6095_p13 = pneg %p6094_p7 }
 0x776   : > { %p6100_p8 = pnand %p6099_p5, %p6095_p13 }
 0x778   : > { %6103 = shalt.err (!%p6100_p8)
}
 0x779   : > { %s6217_s6 = smov 128   ;;  %s6218_s7 = smov 8  }
 0x77a   : > { %5787 = dma.vmem_to_hbm [thread:$0]  (%p8233_p12), %s8058_s11, 512, %s8063_s2, %s5210_s4, %s6217_s6, %s6217_s6, %s6218_s7  }
 0x77b   : > { %s5436_s11 = sshll.u32 %s6470_s18, 3  ;;  %v5195_v52 = vpop.permute.xlu0 %5194  ;;  %s5542_s2 = sshll.u32 %s6316_s19, 7 }
 0x77c   : > { %s585_s4 = scalar_lea.vmem [#allocation16], %s5436_s11  ;;  %s8234_s22 = sld [smem:[#allocation45_spill]] }
 0x77d   : > { %s5224_s24 = sshll.u32 %s585_s4, 4  ;;  %s5205_s17 = scalar_lea.sflag [#allocation5], %s6470_s18  ;;  %s5225_s24 = int_to_ptr.vmem [resolvable:$true] %s5224_s24 }
 0x77e   : > { %s6104_s3 = scalar_lea.vmem %s5225_s24, 128  ;;  %s6219_s26 = smov [#allocation16]  }
 0x77f   : > { %p6105_p3 = scmp.ne.s32.totalorder %s5225_s24, %s6104_s3  ;;  %s6108_s13 = sshll.u32 %s6219_s26, 4  ;;  %s6109_s13 = int_to_ptr.vmem [resolvable:$false] %s6108_s13 }
 0x780   : > { %s6110_s19 = scalar_lea.vmem %s6109_s13, 256  ;;  %p6111_p9 = scmp.lt.s32.totalorder %s5225_s24, %s6109_s13 }
 0x781   : > { %p6106_p1 = pnand %p6105_p3, %p8233_p12  ;;  %p6112_p10 = scmp.lt.s32.totalorder %s6110_s19, %s6104_s3 }
 0x782   : > { %s5222_s21 = scalar_lea.hbm %s8234_s22, %s5542_s2 }
 0x783   : > { %p6107_p6 = pneg %p6106_p1  ;;  %p6113_p11 = por %p6112_p10, %p6111_p9 }
 0x785   : > { %p6114_p4 = pnand %p6113_p11, %p6107_p6 }
 0x7b9   : > { %v3006_v19 = vpop.f32.mrf.mxu1 }
 0x7bb   : > { %v3008_v18 = vpop.f32.mrf.mxu1 }
 0x7bd   : > { %v3084_v43 = vpop.f32.mrf.mxu1 }
 0x7be   : > { %v3085_v36 = vadd.f32 %v3084_v43, %v3006_v19 }
 0x7bf   : > { %v3086_v12 = vpop.f32.mrf.mxu1 }
 0x7c0   : > { %v3087_v49 = vadd.f32 %v3086_v12, %v3008_v18 }
 0x7c1   : > { %v3979_v35 = vpop.f32.mrf.mxu1 }
 0x7c3   : > { %v3981_v5 = vpop.f32.mrf.mxu1 }
 0x7c4   : > { %v3182_v1 = vpop.f32.mrf.mxu0 }
 0x7c5   : > { %v3187_v38 = vadd.f32 %v3182_v1, %v3085_v36 }
 0x7c6   : > { %v3184_v4 = vpop.f32.mrf.mxu0 }
 0x7c7   : > { %v3188_v8 = vadd.f32 %v3184_v4, %v3087_v49  ;;  %v3984_v40 = vadd.f32 %v3979_v35, %v3187_v38 }
 0x7c9   : > { %v3985_v11 = vadd.f32 %v3981_v5, %v3188_v8 }
 0x823   : > { %v4083_v30 = vpop.f32.mrf.mxu0 }
 0x824   : > { %v4088_v44 = vadd.f32 %v4083_v30, %v3984_v40  ;;  %v4183_v37 = vpop.f32.mrf.mxu1 }
 0x825   : > { %v4085_v22 = vpop.f32.mrf.mxu0 }
 0x826   : > { %v4089_v0 = vadd.f32 %v4085_v22, %v3985_v11  ;;  %v4188_v6 = vadd.f32 %v4183_v37, %v4088_v44  ;;  %v4185_v62 = vpop.f32.mrf.mxu1 }
 0x827   : > { %v4980_v20 = vpop.f32.mrf.mxu0 }
 0x828   : > { %v4189_v10 = vadd.f32 %v4185_v62, %v4089_v0  ;;  %v4985_v25 = vadd.f32 %v4980_v20, %v4188_v6 }
 0x829   : > { %v4982_v28 = vpop.f32.mrf.mxu0 }
 0x82a   : > { %v4986_v53 = vadd.f32 %v4982_v28, %v4189_v10 }
 0x82b   : > { %v5084_v56 = vpop.f32.mrf.mxu1 }
 0x82c   : > { %v5089_v17 = vadd.f32 %v5084_v56, %v4985_v25 }
 0x82d   : > { %v5086_v61 = vpop.f32.mrf.mxu1  ;;  %v5184_v15 = vpop.f32.mrf.mxu0 }
 0x82e   : > { %v5090_v42 = vadd.f32 %v5086_v61, %v4986_v53  ;;  %v5189_v29 = vadd.f32 %v5184_v15, %v5089_v17 }
 0x82f   : > { %v5186_v55 = vpop.f32.mrf.mxu0 }
 0x830   : > { %v5190_v33 = vadd.f32 %v5186_v55, %v5090_v42  ;;  %v5197_v41 = vadd.f32 %v5195_v52, %v5189_v29 }
 0x832   : > { %v5198_v31 = vadd.f32 %v5195_v52, %v5190_v33 }
 0x834   : > { %v5201_v57 = vcombine.low %v5197_v41, %v5198_v31 }
 0x836   : > { %5203 = vst [vmem:[%s585_s4] sm:$0xff] %v5201_v57 }
 0x837   : > { %6117 = shalt.err (!%p6114_p4)
}
 0x838   : > { %s6118_s6 = scalar_lea.hbm %s5222_s21, 128  ;;  %s6122_s11 = scalar_lea.hbm %s8234_s22, 256 }
 0x839   : > { %p6119_p7 = scmp.ne.s32.totalorder %s5222_s21, %s6118_s6  ;;  %p6123_p2 = scmp.lt.s32.totalorder %s5222_s21, %s8234_s22 }
 0x83a   : > { %p6124_p5 = scmp.lt.s32.totalorder %s6122_s11, %s6118_s6 }
 0x83b   : > { %p6120_p13 = pnand %p6119_p7, %p8233_p12 }
 0x83c   : > { %p6125_p8 = por %p6124_p5, %p6123_p2 }
 0x83d   : > { %p6121_p0 = pneg %p6120_p13 }
 0x83f   : > { %p6126_p3 = pnand %p6125_p8, %p6121_p0 }
 0x841   : > { %6129 = shalt.err (!%p6126_p3)
}
 0x842   : > { %5786 = dma.vmem_to_hbm [thread:$0]  (%p8233_p12), %s5225_s24, 128, %s5222_s21, %s5205_s17  }
 0x843 PF: > { %s5252_s23 = sand.u32 1, %s6176_s29   ;;  %p8235_p1 = scmp.ne.s32.totalorder %s8182_s28, 0 }
 0x844   : > { %p8236_p6 = scmp.ge.s32.totalorder %s6188_s16, 2  ;;  %s5253_s20 = scalar_lea.sflag [#allocation5], %s5252_s23 }
 0x846   : > { %p5814_p9 = pnand %p8236_p6, %p8235_p1 }
 0x848   : > { %p5815_p10 = pneg %p5814_p9 }
 0x84a   : > { %6167 = dma.done.wait (%p5815_p10), %s5253_s20, 128  }
 0x84b   : > { %6169 = vsyncadd (%p5815_p10), %s5253_s20, 4294967168  ;;  %s5262_s3 = scalar_lea.sflag [#allocation18], %s5252_s23 }
 0x84c   : > { %6171 = dma.done.wait (%p5815_p10), %s5262_s3, 512  }
 0x84d   : > { %6173 = vsyncadd (%p5815_p10), %s5262_s3, 4294966784  ;;  %s8237_s27 = sld [smem:[#allocation26_spill]]  ;;  %p35_p12 = scmp.ge.s32.totalorder %s6395_s25, 4  }
 0x84e   : > { %s8238_s29 = smov %s6180_s30  ;;  %s8239_s30 = smov %s6184_s15 }
 0x84f   : > { %s8241_s16 = smov %s6395_s25  ;;  %37 = sbr.rel (!%p35_p12) target bundleno = 19 (0x13), region = 181 }
 0x853   : > { %s8240_s15 = smov %s8237_s27 }
 0x854   :  { %5267 = vsyncpa [#allocation4], 1 }
 0x855   :  { %5269 = vsyncpa [#allocation4 + $0x1], 1 }
 0x856   :  { %5270 = vsyncpa [#allocation11], 1 }
 0x857   :  { %5271 = vsyncpa [#allocation14], 1 }
 0x858   :  { %5272 = vsyncpa [#allocation5], 1 }
 0x859   :  { %5274 = vsyncpa [#allocation5 + $0x1], 1 }
 0x85a   :  { %5275 = vsyncpa [#allocation18], 1 }
 0x85b   :  { %5277 = vsyncpa [#allocation18 + $0x1], 1 }
 0x85c   :  { %5278 = vsyncpa [#allocation6], 1 }
 0x85d   :  { %5280 = vsyncpa [#allocation6 + $0x1], 1 }
 0x85e   :  { %5281 = vsyncpa [#allocation7], 1 }
 0x85f   :  { %5283 = vsyncpa [#allocation7 + $0x1], 1 }

</bundles_post_ra>
